<compile_context>
chip_gen: v7x
topology: tpu7x:2x2x1
jax: 0.10.0
libtpu: 0.0.40
codegen_flags: <defaults>
</compile_context>

<pallas_src>
import functools

import jax
import jax.numpy as jnp
from jax import lax
from jax.experimental import pallas as pl
from jax.experimental.pallas import tpu as pltpu


def _vmem_limit_bytes():
    """Per-generation scoped-VMEM cap: ~3/4 of physical, capped at 96 MiB.

    v5e/v6e (128 MiB physical) -> 96 MiB; v7x (64 MiB physical) -> 48 MiB; safe fallback
    of 48 MiB if the hardware query is unavailable.
    """
    cap = 64 << 20
    try:
        info = pltpu.get_tpu_info()
        cap = int(getattr(info, "vmem_capacity_bytes", cap)) or cap
    except Exception:
        pass
    return int(min((cap * 3) // 4, 96 << 20))


_VMEM_LIMIT = _vmem_limit_bytes()


def _compiler_params(**kw):
    # Compat shim: newer jax exposes pltpu.CompilerParams, older jax TPUCompilerParams.
    cls = getattr(pltpu, "CompilerParams", None) or getattr(pltpu, "TPUCompilerParams", None)
    return cls(**kw) if cls is not None else None


# ----------------------------------------------------------------------------
# Pallas kernels
# ----------------------------------------------------------------------------

def _sepconv_bn_kernel(x_ref, wdw_ref, wpw_ref, shift_ref, *rest,
                       H, W, apply_relu, has_res):
    """[ReLU ->] depthwise 3x3 (pad=1) -> pointwise 1x1 -> folded BN [-> + identity residual].

    x_ref:     (1, H, W, Cin)       un-padded NHWC tile (one batch element)
    wdw_ref:   (9, Cin)   f32       depthwise taps, row k = ki*3 + kj
    wpw_ref:   (Cin, Cout) bf16     pointwise weight with BN scale folded in
    shift_ref: (1, Cout)  f32       BN shift (beta - mean*scale)
    res_ref:   (1, H*W, Cout) f32   optional identity-skip residual (only if has_res)
    o_ref:     (1, H*W, Cout)       bf16 (intermediate layer) or f32 (fused residual)
    pad_ref:   (H+2, W+2, Cin) f32  VMEM scratch holding the zero-padded tile
    """
    if has_res:
        res_ref, o_ref, pad_ref = rest
    else:
        res_ref = None
        o_ref, pad_ref = rest
    cin = x_ref.shape[3]

    # ReLU hoisted out of the 9-tap loop: one pass over the (H, W, Cin) tile.
    xv = x_ref[0].astype(jnp.float32)
    if apply_relu:
        xv = jnp.maximum(xv, 0.0)       # relu then zero-pad == zero-pad then relu

    # In-kernel zero padding (VMEM scratch): removes the host-side jnp.pad and its full
    # HBM round trip of the activation for every rep layer.
    pad_ref[...] = jnp.zeros(pad_ref.shape, pad_ref.dtype)
    pad_ref[1:H + 1, 1:W + 1, :] = xv

    # Depthwise 3x3: 9-tap VPU accumulation.  The sublane (W-axis) shifted slab is read
    # once per kj and reused across ki; the ki shifts are cheap leading-dim slices.
    acc = jnp.zeros((H, W, cin), jnp.float32)
    for kj in range(3):
        col = pad_ref[:, kj:kj + W, :]                  # (H+2, W, Cin)
        for ki in range(3):
            acc = acc + col[ki:ki + H] * wdw_ref[ki * 3 + kj, :]

    # Pointwise 1x1 conv == channel matmul: bf16 operands, f32 MXU accumulation.
    y = jnp.dot(acc.reshape(H * W, cin).astype(jnp.bfloat16), wpw_ref[...],
                preferred_element_type=jnp.float32)
    y = y + shift_ref[...]
    if has_res:
        y = y + res_ref[0].astype(jnp.float32)          # fused identity residual
    o_ref[0] = y.astype(o_ref.dtype)


def pallas_sepconv_bn(x, w_dw, w_pw_bf16, shift, H, W, apply_relu,
                      residual=None, out_dtype=jnp.bfloat16):
    N, _, _, cin = x.shape
    cout = w_pw_bf16.shape[1]
    has_res = residual is not None
    kern = functools.partial(_sepconv_bn_kernel, H=H, W=W,
                             apply_relu=apply_relu, has_res=has_res)
    in_specs = [
        pl.BlockSpec((1, H, W, cin), lambda n: (n, 0, 0, 0)),
        pl.BlockSpec((9, cin), lambda n: (0, 0)),
        pl.BlockSpec((cin, cout), lambda n: (0, 0)),
        pl.BlockSpec((1, cout), lambda n: (0, 0)),
    ]
    args = [x, w_dw, w_pw_bf16, shift]
    if has_res:
        in_specs.append(pl.BlockSpec((1, H * W, cout), lambda n: (n, 0, 0)))
        args.append(residual)
    return pl.pallas_call(
        kern,
        out_shape=jax.ShapeDtypeStruct((N, H * W, cout), out_dtype),
        grid=(N,),
        in_specs=in_specs,
        out_specs=pl.BlockSpec((1, H * W, cout), lambda n: (n, 0, 0)),
        scratch_shapes=[pltpu.VMEM((H + 2, W + 2, cin), jnp.float32)],
        compiler_params=_compiler_params(
            dimension_semantics=("parallel",), vmem_limit_bytes=_VMEM_LIMIT),
    )(*args)


def _tail_kernel(y_ref, x_ref, w_ref, shift_ref, o_ref, pad_ref,
                 *, H, W, Ho, Wo, s, pool):
    """Fused block tail: [strided MaxPool2d(3, s, pad=1)] + skip 1x1 conv (folded BN) + add.

    y_ref:     (1, H, W, Cout)        rep-branch output (bf16)
    x_ref:     (1, H, W, Cin)         original block input (f32)
    w_ref:     (Cin, Cout) bf16       skip 1x1 weight with BN scale folded in
    shift_ref: (1, Cout)  f32         skip BN shift
    o_ref:     (1, Ho*Wo, Cout) f32   block output rows
    pad_ref:   (H+2, W+2, Cout) f32   VMEM scratch (-inf padded tile; only used if pool)
    """
    cout = o_ref.shape[2]
    cin = x_ref.shape[3]

    if pool:
        # MaxPool2d(3, s, padding=1): pad with -inf in VMEM, then 9 taps read directly at
        # stride s -> only (Ho, Wo) of window-max work, no host-side stride slice.
        pad_ref[...] = jnp.full(pad_ref.shape, -jnp.inf, pad_ref.dtype)
        pad_ref[1:H + 1, 1:W + 1, :] = y_ref[0].astype(jnp.float32)
        m = pad_ref[pl.ds(0, Ho, s), pl.ds(0, Wo, s), :]
        for ki in range(3):
            for kj in range(3):
                if ki == 0 and kj == 0:
                    continue
                m = jnp.maximum(m, pad_ref[pl.ds(ki, Ho, s), pl.ds(kj, Wo, s), :])
        m = m.reshape(Ho * Wo, cout)
    else:                                   # strides == 1: no pool in the PyTorch module
        m = y_ref[0].astype(jnp.float32).reshape(Ho * Wo, cout)

    # Skip branch: x subsampled at stride s in-kernel, 1x1 conv == matmul (bf16 MXU).
    if s == 1:
        xs = x_ref[...].reshape(Ho * Wo, cin)
    else:
        xs = x_ref[:, pl.ds(0, Ho, s), pl.ds(0, Wo, s), :].reshape(Ho * Wo, cin)
    skip = jnp.dot(xs.astype(jnp.bfloat16), w_ref[...],
                   preferred_element_type=jnp.float32)
    o_ref[0] = m + skip + shift_ref[...]


def pallas_tail(y, x, w_bf16, shift, H, W, Ho, Wo, s, pool):
    N = y.shape[0]
    cout = w_bf16.shape[1]
    cin = x.shape[3]
    kern = functools.partial(_tail_kernel, H=H, W=W, Ho=Ho, Wo=Wo, s=s, pool=pool)
    return pl.pallas_call(
        kern,
        out_shape=jax.ShapeDtypeStruct((N, Ho * Wo, cout), jnp.float32),
        grid=(N,),
        in_specs=[
            pl.BlockSpec((1, H, W, cout), lambda n: (n, 0, 0, 0)),
            pl.BlockSpec((1, H, W, cin), lambda n: (n, 0, 0, 0)),
            pl.BlockSpec((cin, cout), lambda n: (0, 0)),
            pl.BlockSpec((1, cout), lambda n: (0, 0)),
        ],
        out_specs=pl.BlockSpec((1, Ho * Wo, cout), lambda n: (n, 0, 0)),
        scratch_shapes=[pltpu.VMEM((H + 2, W + 2, cout), jnp.float32)],
        compiler_params=_compiler_params(
            dimension_semantics=("parallel",), vmem_limit_bytes=_VMEM_LIMIT),
    )(y, x, w_bf16, shift)


# ----------------------------------------------------------------------------
# Block config / params / forward
# ----------------------------------------------------------------------------

def fold_bn(gamma, beta, mean, var, eps=1e-5):
    scale = gamma / jnp.sqrt(var + eps)
    shift = beta - mean * scale
    return scale, shift


def block_config(in_filters, out_filters, reps, strides=1,
                 start_with_relu=True, grow_first=True):
    """Mirrors Block.__init__ bookkeeping; each entry is (cin, cout, relu_before)."""
    layers = []
    filters = in_filters
    if grow_first:
        layers.append([in_filters, out_filters, True])
        filters = out_filters
    for _ in range(reps - 1):
        layers.append([filters, filters, True])
    if not grow_first:
        layers.append([in_filters, out_filters, True])
    if not start_with_relu:
        layers[0][2] = False
    return dict(
        layers=[tuple(l) for l in layers],
        strides=strides,
        has_skip=(out_filters != in_filters) or (strides != 1),
        in_filters=in_filters,
        out_filters=out_filters,
    )


def init_block_params(key, cfg):
    p = {"layers": []}
    keys = jax.random.split(key, len(cfg["layers"]) + 1)
    for k_layer, (cin, cout, _) in zip(keys[:-1], cfg["layers"]):
        ks = jax.random.split(k_layer, 6)
        p["layers"].append(dict(
            w_dw=0.2 * jax.random.normal(ks[0], (9, cin), jnp.float32),
            w_pw=(1.0 / jnp.sqrt(cin)) * jax.random.normal(ks[1], (cin, cout), jnp.float32),
            gamma=1.0 + 0.1 * jax.random.normal(ks[2], (cout,), jnp.float32),
            beta=0.1 * jax.random.normal(ks[3], (cout,), jnp.float32),
            mean=0.1 * jax.random.normal(ks[4], (cout,), jnp.float32),
            var=jnp.abs(jax.random.normal(ks[5], (cout,), jnp.float32)) + 0.5,
        ))
    if cfg["has_skip"]:
        ks = jax.random.split(keys[-1], 5)
        cin, cout = cfg["in_filters"], cfg["out_filters"]
        p["skip"] = dict(
            w=(1.0 / jnp.sqrt(cin)) * jax.random.normal(ks[0], (cin, cout), jnp.float32),
            gamma=1.0 + 0.1 * jax.random.normal(ks[1], (cout,), jnp.float32),
            beta=0.1 * jax.random.normal(ks[2], (cout,), jnp.float32),
            mean=0.1 * jax.random.normal(ks[3], (cout,), jnp.float32),
            var=jnp.abs(jax.random.normal(ks[4], (cout,), jnp.float32)) + 0.5,
        )
    return p


def block_forward(x_nchw, params, cfg):
    # NCHW -> NHWC (channels in lanes)
    x = jnp.transpose(x_nchw, (0, 2, 3, 1)).astype(jnp.float32)
    N, H, W, _ = x.shape
    s = cfg["strides"]
    n_layers = len(cfg["layers"])

    # ---- rep branch: fused [ReLU ->] SeparableConv2d -> BN per layer --------------
    y = x
    for li, (lp, (cin, cout, apply_relu)) in enumerate(zip(params["layers"], cfg["layers"])):
        scale, shift = fold_bn(lp["gamma"], lp["beta"], lp["mean"], lp["var"])
        w_pw_folded = (lp["w_pw"] * scale[None, :]).astype(jnp.bfloat16)
        shift_row = shift.reshape(1, -1).astype(jnp.float32)
        fuse_identity = (li == n_layers - 1) and (not cfg["has_skip"])
        residual = x.reshape(N, H * W, cout) if fuse_identity else None
        out_dtype = jnp.float32 if fuse_identity else jnp.bfloat16
        y = pallas_sepconv_bn(y, lp["w_dw"], w_pw_folded, shift_row, H, W, apply_relu,
                              residual=residual, out_dtype=out_dtype)
        y = y.reshape(N, H, W, cout)

    # ---- tail: [maxpool] + skip conv/BN + residual add (single fused kernel) -------
    if cfg["has_skip"]:
        sp = params["skip"]
        scale, shift = fold_bn(sp["gamma"], sp["beta"], sp["mean"], sp["var"])
        w_skip = (sp["w"] * scale[None, :]).astype(jnp.bfloat16)
        Ho = (H - 1) // s + 1
        Wo = (W - 1) // s + 1
        out = pallas_tail(y, x, w_skip, shift.reshape(1, -1).astype(jnp.float32),
                          H, W, Ho, Wo, s, pool=(s != 1))
        out = out.reshape(N, Ho, Wo, cfg["out_filters"])
    else:
        out = y                                   # identity residual already fused in

    return jnp.transpose(out, (0, 3, 1, 2))       # back to NCHW, like the PyTorch module


# ----------------------------------------------------------------------------
# Pure-JAX f32 reference (eval-mode BN), for a tolerance check
# ----------------------------------------------------------------------------

def reference_forward(x_nchw, params, cfg):
    s = cfg["strides"]
    x = jnp.transpose(x_nchw, (0, 2, 3, 1)).astype(jnp.float32)
    y = x
    for lp, (cin, cout, apply_relu) in zip(params["layers"], cfg["layers"]):
        t = jnp.maximum(y, 0.0) if apply_relu else y
        w_dw = lp["w_dw"].reshape(3, 3, cin)[:, :, None, :]        # HWIO, I=1 (depthwise)
        dw = lax.conv_general_dilated(
            t, w_dw, window_strides=(1, 1), padding=((1, 1), (1, 1)),
            dimension_numbers=("NHWC", "HWIO", "NHWC"), feature_group_count=cin)
        pw = jnp.einsum("nhwc,cd->nhwd", dw, lp["w_pw"])
        scale, shift = fold_bn(lp["gamma"], lp["beta"], lp["mean"], lp["var"])
        y = pw * scale + shift
    if s != 1:
        y = lax.reduce_window(y, -jnp.inf, lax.max, (1, 3, 3, 1), (1, s, s, 1),
                              ((0, 0), (1, 1), (1, 1), (0, 0)))
    if cfg["has_skip"]:
        sp = params["skip"]
        scale, shift = fold_bn(sp["gamma"], sp["beta"], sp["mean"], sp["var"])
        skip = jnp.einsum("nhwc,cd->nhwd", x[:, ::s, ::s, :], sp["w"]) * scale + shift
        y = y + skip
    else:
        y = y + x
    return jnp.transpose(y, (0, 3, 1, 2))


# ----------------------------------------------------------------------------
# Main
# ----------------------------------------------------------------------------

if __name__ == "__main__":
    key = jax.random.PRNGKey(0)
    k_x, k_p = jax.random.split(key)

    # Block(in_filters=64, out_filters=128, reps=2, strides=2,
    #       start_with_relu=True, grow_first=True) on a (2, 64, 16, 16) input.
    N, C_IN, H, W = 2, 64, 16, 16
    C_OUT, REPS, STRIDES = 128, 2, 2

    cfg = block_config(C_IN, C_OUT, reps=REPS, strides=STRIDES,
                       start_with_relu=True, grow_first=True)
    params = init_block_params(k_p, cfg)
    x = jax.random.normal(k_x, (N, C_IN, H, W), jnp.float32)   # NCHW input

    fwd = jax.jit(functools.partial(block_forward, cfg=cfg))
    out = jax.block_until_ready(fwd(x, params))

    Ho = (H + 2 - 3) // STRIDES + 1   # PyTorch MaxPool2d(3, strides, 1) output size
    assert out.shape == (N, C_OUT, Ho, Ho), out.shape
    assert bool(jnp.all(jnp.isfinite(out)))

    # Loose tolerance vs. pure-f32 reference (kernel uses bf16 MXU operands and bf16
    # intermediate activations, the intended TPU inference dtype).
    ref = jax.jit(functools.partial(reference_forward, cfg=cfg))(x, params)
    max_err = float(jnp.max(jnp.abs(out - ref)))
    assert max_err < 3e-1, max_err

    print("KERNEL_OK")
</pallas_src>

<mosaic_0001>
module attributes {stable_mosaic.version = 11 : i64} {
  func.func @_sepconv_bn_kernel(%arg0: i32, %arg1: memref<1x16x16x64xf32, #tpu.memory_space<vmem>>, %arg2: memref<9x64xf32, #tpu.memory_space<vmem>>, %arg3: memref<64x128xbf16, #tpu.memory_space<vmem>>, %arg4: memref<1x128xf32, #tpu.memory_space<vmem>>, %arg5: memref<1x256x128xbf16, #tpu.memory_space<vmem>>, %arg6: memref<18x18x64xf32, #tpu.memory_space<vmem>>) attributes {dimension_semantics = [#tpu.dimension_semantics<parallel>], iteration_bounds = array<i64: 2>, scalar_prefetch = 0 : i64, scratch_operands = 1 : i64, tpu.core_type = #tpu.core_type<tc>, window_params = [{transform_indices = @transform_0, window_bounds = array<i64: 1, 16, 16, 64>}, {pipeline_mode = #tpu.pipeline_mode<synchronous>, transform_indices = @transform_1, window_bounds = array<i64: 9, 64>}, {pipeline_mode = #tpu.pipeline_mode<synchronous>, transform_indices = @transform_2, window_bounds = array<i64: 64, 128>}, {pipeline_mode = #tpu.pipeline_mode<synchronous>, transform_indices = @transform_3, window_bounds = array<i64: 1, 128>}, {transform_indices = @transform_4, window_bounds = array<i64: 1, 256, 128>}]} {
    %c0 = arith.constant 0 : index
    %c0_0 = arith.constant 0 : index
    %c0_1 = arith.constant 0 : index
    %c0_2 = arith.constant 0 : index
    %0 = vector.load %arg1[%c0, %c0_0, %c0_1, %c0_2] : memref<1x16x16x64xf32, #tpu.memory_space<vmem>>, vector<1x16x16x64xf32>
    %1 = vector.shape_cast %0 : vector<1x16x16x64xf32> to vector<16x16x64xf32>
    %cst = arith.constant 0.000000e+00 : f32
    %2 = vector.broadcast %cst : f32 to vector<16x16x64xf32>
    %3 = arith.maximumf %1, %2 : vector<16x16x64xf32>
    %cst_3 = arith.constant 0.000000e+00 : f32
    %4 = vector.broadcast %cst_3 : f32 to vector<18x18x64xf32>
    %c0_4 = arith.constant 0 : index
    %c0_5 = arith.constant 0 : index
    %c0_6 = arith.constant 0 : index
    %5 = vector.load %arg6[%c0_4, %c0_5, %c0_6] : memref<18x18x64xf32, #tpu.memory_space<vmem>>, vector<18x18x64xf32>
    tpu.vector_store %arg6[%c0_4, %c0_5, %c0_6], %4 {strides = array<i32>} : memref<18x18x64xf32, #tpu.memory_space<vmem>>, vector<18x18x64xf32>,
    %c1 = arith.constant 1 : index
    %c1_7 = arith.constant 1 : index
    %c0_8 = arith.constant 0 : index
    %6 = vector.load %arg6[%c1, %c1_7, %c0_8] : memref<18x18x64xf32, #tpu.memory_space<vmem>>, vector<16x16x64xf32>
    tpu.vector_store %arg6[%c1, %c1_7, %c0_8], %3 {strides = array<i32>} : memref<18x18x64xf32, #tpu.memory_space<vmem>>, vector<16x16x64xf32>,
    %cst_9 = arith.constant 0.000000e+00 : f32
    %7 = vector.broadcast %cst_9 : f32 to vector<16x16x64xf32>
    %c0_10 = arith.constant 0 : index
    %c0_11 = arith.constant 0 : index
    %c0_12 = arith.constant 0 : index
    %8 = vector.load %arg6[%c0_10, %c0_11, %c0_12] : memref<18x18x64xf32, #tpu.memory_space<vmem>>, vector<18x16x64xf32>
    %9 = vector.extract_strided_slice %8 {offsets = [0, 0, 0], sizes = [16, 16, 64], strides = [1, 1, 1]} : vector<18x16x64xf32> to vector<16x16x64xf32>
    %c0_13 = arith.constant 0 : index
    %c0_14 = arith.constant 0 : index
    %10 = vector.load %arg2[%c0_13, %c0_14] : memref<9x64xf32, #tpu.memory_space<vmem>>, vector<1x64xf32>
    %11 = vector.shape_cast %10 : vector<1x64xf32> to vector<64xf32>
    %12 = vector.shape_cast %11 : vector<64xf32> to vector<1x1x64xf32>
    %13 = vector.broadcast %12 : vector<1x1x64xf32> to vector<16x16x64xf32>
    %14 = arith.mulf %9, %13 : vector<16x16x64xf32>
    %15 = arith.addf %7, %14 : vector<16x16x64xf32>
    %16 = vector.extract_strided_slice %8 {offsets = [1, 0, 0], sizes = [16, 16, 64], strides = [1, 1, 1]} : vector<18x16x64xf32> to vector<16x16x64xf32>
    %c3 = arith.constant 3 : index
    %c0_15 = arith.constant 0 : index
    %17 = vector.load %arg2[%c3, %c0_15] : memref<9x64xf32, #tpu.memory_space<vmem>>, vector<1x64xf32>
    %18 = vector.shape_cast %17 : vector<1x64xf32> to vector<64xf32>
    %19 = vector.shape_cast %18 : vector<64xf32> to vector<1x1x64xf32>
    %20 = vector.broadcast %19 : vector<1x1x64xf32> to vector<16x16x64xf32>
    %21 = arith.mulf %16, %20 : vector<16x16x64xf32>
    %22 = arith.addf %15, %21 : vector<16x16x64xf32>
    %23 = vector.extract_strided_slice %8 {offsets = [2, 0, 0], sizes = [16, 16, 64], strides = [1, 1, 1]} : vector<18x16x64xf32> to vector<16x16x64xf32>
    %c6 = arith.constant 6 : index
    %c0_16 = arith.constant 0 : index
    %24 = vector.load %arg2[%c6, %c0_16] : memref<9x64xf32, #tpu.memory_space<vmem>>, vector<1x64xf32>
    %25 = vector.shape_cast %24 : vector<1x64xf32> to vector<64xf32>
    %26 = vector.shape_cast %25 : vector<64xf32> to vector<1x1x64xf32>
    %27 = vector.broadcast %26 : vector<1x1x64xf32> to vector<16x16x64xf32>
    %28 = arith.mulf %23, %27 : vector<16x16x64xf32>
    %29 = arith.addf %22, %28 : vector<16x16x64xf32>
    %c0_17 = arith.constant 0 : index
    %c1_18 = arith.constant 1 : index
    %c0_19 = arith.constant 0 : index
    %30 = vector.load %arg6[%c0_17, %c1_18, %c0_19] : memref<18x18x64xf32, #tpu.memory_space<vmem>>, vector<18x16x64xf32>
    %31 = vector.extract_strided_slice %30 {offsets = [0, 0, 0], sizes = [16, 16, 64], strides = [1, 1, 1]} : vector<18x16x64xf32> to vector<16x16x64xf32>
    %c1_20 = arith.constant 1 : index
    %c0_21 = arith.constant 0 : index
    %32 = vector.load %arg2[%c1_20, %c0_21] : memref<9x64xf32, #tpu.memory_space<vmem>>, vector<1x64xf32>
    %33 = vector.shape_cast %32 : vector<1x64xf32> to vector<64xf32>
    %34 = vector.shape_cast %33 : vector<64xf32> to vector<1x1x64xf32>
    %35 = vector.broadcast %34 : vector<1x1x64xf32> to vector<16x16x64xf32>
    %36 = arith.mulf %31, %35 : vector<16x16x64xf32>
    %37 = arith.addf %29, %36 : vector<16x16x64xf32>
    %38 = vector.extract_strided_slice %30 {offsets = [1, 0, 0], sizes = [16, 16, 64], strides = [1, 1, 1]} : vector<18x16x64xf32> to vector<16x16x64xf32>
    %c4 = arith.constant 4 : index
    %c0_22 = arith.constant 0 : index
    %39 = vector.load %arg2[%c4, %c0_22] : memref<9x64xf32, #tpu.memory_space<vmem>>, vector<1x64xf32>
    %40 = vector.shape_cast %39 : vector<1x64xf32> to vector<64xf32>
    %41 = vector.shape_cast %40 : vector<64xf32> to vector<1x1x64xf32>
    %42 = vector.broadcast %41 : vector<1x1x64xf32> to vector<16x16x64xf32>
    %43 = arith.mulf %38, %42 : vector<16x16x64xf32>
    %44 = arith.addf %37, %43 : vector<16x16x64xf32>
    %45 = vector.extract_strided_slice %30 {offsets = [2, 0, 0], sizes = [16, 16, 64], strides = [1, 1, 1]} : vector<18x16x64xf32> to vector<16x16x64xf32>
    %c7 = arith.constant 7 : index
    %c0_23 = arith.constant 0 : index
    %46 = vector.load %arg2[%c7, %c0_23] : memref<9x64xf32, #tpu.memory_space<vmem>>, vector<1x64xf32>
    %47 = vector.shape_cast %46 : vector<1x64xf32> to vector<64xf32>
    %48 = vector.shape_cast %47 : vector<64xf32> to vector<1x1x64xf32>
    %49 = vector.broadcast %48 : vector<1x1x64xf32> to vector<16x16x64xf32>
    %50 = arith.mulf %45, %49 : vector<16x16x64xf32>
    %51 = arith.addf %44, %50 : vector<16x16x64xf32>
    %c0_24 = arith.constant 0 : index
    %c2 = arith.constant 2 : index
    %c0_25 = arith.constant 0 : index
    %52 = vector.load %arg6[%c0_24, %c2, %c0_25] : memref<18x18x64xf32, #tpu.memory_space<vmem>>, vector<18x16x64xf32>
    %53 = vector.extract_strided_slice %52 {offsets = [0, 0, 0], sizes = [16, 16, 64], strides = [1, 1, 1]} : vector<18x16x64xf32> to vector<16x16x64xf32>
    %c2_26 = arith.constant 2 : index
    %c0_27 = arith.constant 0 : index
    %54 = vector.load %arg2[%c2_26, %c0_27] : memref<9x64xf32, #tpu.memory_space<vmem>>, vector<1x64xf32>
    %55 = vector.shape_cast %54 : vector<1x64xf32> to vector<64xf32>
    %56 = vector.shape_cast %55 : vector<64xf32> to vector<1x1x64xf32>
    %57 = vector.broadcast %56 : vector<1x1x64xf32> to vector<16x16x64xf32>
    %58 = arith.mulf %53, %57 : vector<16x16x64xf32>
    %59 = arith.addf %51, %58 : vector<16x16x64xf32>
    %60 = vector.extract_strided_slice %52 {offsets = [1, 0, 0], sizes = [16, 16, 64], strides = [1, 1, 1]} : vector<18x16x64xf32> to vector<16x16x64xf32>
    %c5 = arith.constant 5 : index
    %c0_28 = arith.constant 0 : index
    %61 = vector.load %arg2[%c5, %c0_28] : memref<9x64xf32, #tpu.memory_space<vmem>>, vector<1x64xf32>
    %62 = vector.shape_cast %61 : vector<1x64xf32> to vector<64xf32>
    %63 = vector.shape_cast %62 : vector<64xf32> to vector<1x1x64xf32>
    %64 = vector.broadcast %63 : vector<1x1x64xf32> to vector<16x16x64xf32>
    %65 = arith.mulf %60, %64 : vector<16x16x64xf32>
    %66 = arith.addf %59, %65 : vector<16x16x64xf32>
    %67 = vector.extract_strided_slice %52 {offsets = [2, 0, 0], sizes = [16, 16, 64], strides = [1, 1, 1]} : vector<18x16x64xf32> to vector<16x16x64xf32>
    %c8 = arith.constant 8 : index
    %c0_29 = arith.constant 0 : index
    %68 = vector.load %arg2[%c8, %c0_29] : memref<9x64xf32, #tpu.memory_space<vmem>>, vector<1x64xf32>
    %69 = vector.shape_cast %68 : vector<1x64xf32> to vector<64xf32>
    %70 = vector.shape_cast %69 : vector<64xf32> to vector<1x1x64xf32>
    %71 = vector.broadcast %70 : vector<1x1x64xf32> to vector<16x16x64xf32>
    %72 = arith.mulf %67, %71 : vector<16x16x64xf32>
    %73 = arith.addf %66, %72 : vector<16x16x64xf32>
    %74 = vector.shape_cast %73 : vector<16x16x64xf32> to vector<256x64xf32>
    %75 = arith.truncf %74 : vector<256x64xf32> to vector<256x64xbf16>
    %c0_30 = arith.constant 0 : index
    %c0_31 = arith.constant 0 : index
    %76 = vector.load %arg3[%c0_30, %c0_31] : memref<64x128xbf16, #tpu.memory_space<vmem>>, vector<64x128xbf16>
    %cst_32 = arith.constant dense<0.000000e+00> : vector<256x128xf32>
    %77 = tpu.matmul %75, %76, %cst_32 {dimension_numbers = #tpu.dot_dimension_numbers<[1], [0], [0], [1], [0, 0, 1, 1], [], []>} : vector<256x64xbf16>, vector<64x128xbf16>, vector<256x128xf32> -> vector<256x128xf32>
    %c0_33 = arith.constant 0 : index
    %c0_34 = arith.constant 0 : index
    %78 = vector.load %arg4[%c0_33, %c0_34] : memref<1x128xf32, #tpu.memory_space<vmem>>, vector<1x128xf32>
    %79 = vector.broadcast %78 : vector<1x128xf32> to vector<256x128xf32>
    %80 = arith.addf %77, %79 : vector<256x128xf32>
    %81 = arith.truncf %80 : vector<256x128xf32> to vector<256x128xbf16>
    %c0_35 = arith.constant 0 : index
    %c0_36 = arith.constant 0 : index
    %c0_37 = arith.constant 0 : index
    %82 = vector.load %arg5[%c0_35, %c0_36, %c0_37] : memref<1x256x128xbf16, #tpu.memory_space<vmem>>, vector<1x256x128xbf16>
    %83 = vector.shape_cast %82 : vector<1x256x128xbf16> to vector<256x128xbf16>
    %84 = vector.shape_cast %81 : vector<256x128xbf16> to vector<1x256x128xbf16>
    tpu.vector_store %arg5[%c0_35, %c0_36, %c0_37], %84 {strides = array<i32>} : memref<1x256x128xbf16, #tpu.memory_space<vmem>>, vector<1x256x128xbf16>,
    return
  }
  func.func @transform_0(%arg0: i32) -> (i32, i32, i32, i32) {
    %c0_i32 = arith.constant 0 : i32
    %c0_i32_0 = arith.constant 0 : i32
    %c0_i32_1 = arith.constant 0 : i32
    %c0_i32_2 = arith.constant 0 : i32
    return %arg0, %c0_i32, %c0_i32_0, %c0_i32_1 : i32, i32, i32, i32
  }
  func.func @transform_1(%arg0: i32) -> (i32, i32) {
    %c0_i32 = arith.constant 0 : i32
    %c0_i32_0 = arith.constant 0 : i32
    %c0_i32_1 = arith.constant 0 : i32
    return %c0_i32, %c0_i32_0 : i32, i32
  }
  func.func @transform_2(%arg0: i32) -> (i32, i32) {
    %c0_i32 = arith.constant 0 : i32
    %c0_i32_0 = arith.constant 0 : i32
    %c0_i32_1 = arith.constant 0 : i32
    return %c0_i32, %c0_i32_0 : i32, i32
  }
  func.func @transform_3(%arg0: i32) -> (i32, i32) {
    %c0_i32 = arith.constant 0 : i32
    %c0_i32_0 = arith.constant 0 : i32
    %c0_i32_1 = arith.constant 0 : i32
    return %c0_i32, %c0_i32_0 : i32, i32
  }
  func.func @transform_4(%arg0: i32) -> (i32, i32, i32) {
    %c0_i32 = arith.constant 0 : i32
    %c0_i32_0 = arith.constant 0 : i32
    %c0_i32_1 = arith.constant 0 : i32
    return %arg0, %c0_i32, %c0_i32_0 : i32, i32, i32
  }
}

module attributes {stable_mosaic.version = 11 : i64} {
  func.func @_sepconv_bn_kernel(%arg0: i32, %arg1: memref<1x16x16x128xbf16, #tpu.memory_space<vmem>>, %arg2: memref<9x128xf32, #tpu.memory_space<vmem>>, %arg3: memref<128x128xbf16, #tpu.memory_space<vmem>>, %arg4: memref<1x128xf32, #tpu.memory_space<vmem>>, %arg5: memref<1x256x128xbf16, #tpu.memory_space<vmem>>, %arg6: memref<18x18x128xf32, #tpu.memory_space<vmem>>) attributes {dimension_semantics = [#tpu.dimension_semantics<parallel>], iteration_bounds = array<i64: 2>, scalar_prefetch = 0 : i64, scratch_operands = 1 : i64, tpu.core_type = #tpu.core_type<tc>, window_params = [{transform_indices = @transform_0, window_bounds = array<i64: 1, 16, 16, 128>}, {pipeline_mode = #tpu.pipeline_mode<synchronous>, transform_indices = @transform_1, window_bounds = array<i64: 9, 128>}, {pipeline_mode = #tpu.pipeline_mode<synchronous>, transform_indices = @transform_2, window_bounds = array<i64: 128, 128>}, {pipeline_mode = #tpu.pipeline_mode<synchronous>, transform_indices = @transform_3, window_bounds = array<i64: 1, 128>}, {transform_indices = @transform_4, window_bounds = array<i64: 1, 256, 128>}]} {
    %c0 = arith.constant 0 : index
    %c0_0 = arith.constant 0 : index
    %c0_1 = arith.constant 0 : index
    %c0_2 = arith.constant 0 : index
    %0 = vector.load %arg1[%c0, %c0_0, %c0_1, %c0_2] : memref<1x16x16x128xbf16, #tpu.memory_space<vmem>>, vector<1x16x16x128xbf16>
    %1 = vector.shape_cast %0 : vector<1x16x16x128xbf16> to vector<16x16x128xbf16>
    %2 = arith.extf %1 : vector<16x16x128xbf16> to vector<16x16x128xf32>
    %cst = arith.constant 0.000000e+00 : f32
    %3 = vector.broadcast %cst : f32 to vector<16x16x128xf32>
    %4 = arith.maximumf %2, %3 : vector<16x16x128xf32>
    %cst_3 = arith.constant 0.000000e+00 : f32
    %5 = vector.broadcast %cst_3 : f32 to vector<18x18x128xf32>
    %c0_4 = arith.constant 0 : index
    %c0_5 = arith.constant 0 : index
    %c0_6 = arith.constant 0 : index
    %6 = vector.load %arg6[%c0_4, %c0_5, %c0_6] : memref<18x18x128xf32, #tpu.memory_space<vmem>>, vector<18x18x128xf32>
    tpu.vector_store %arg6[%c0_4, %c0_5, %c0_6], %5 {strides = array<i32>} : memref<18x18x128xf32, #tpu.memory_space<vmem>>, vector<18x18x128xf32>,
    %c1 = arith.constant 1 : index
    %c1_7 = arith.constant 1 : index
    %c0_8 = arith.constant 0 : index
    %7 = vector.load %arg6[%c1, %c1_7, %c0_8] : memref<18x18x128xf32, #tpu.memory_space<vmem>>, vector<16x16x128xf32>
    tpu.vector_store %arg6[%c1, %c1_7, %c0_8], %4 {strides = array<i32>} : memref<18x18x128xf32, #tpu.memory_space<vmem>>, vector<16x16x128xf32>,
    %cst_9 = arith.constant 0.000000e+00 : f32
    %8 = vector.broadcast %cst_9 : f32 to vector<16x16x128xf32>
    %c0_10 = arith.constant 0 : index
    %c0_11 = arith.constant 0 : index
    %c0_12 = arith.constant 0 : index
    %9 = vector.load %arg6[%c0_10, %c0_11, %c0_12] : memref<18x18x128xf32, #tpu.memory_space<vmem>>, vector<18x16x128xf32>
    %10 = vector.extract_strided_slice %9 {offsets = [0, 0, 0], sizes = [16, 16, 128], strides = [1, 1, 1]} : vector<18x16x128xf32> to vector<16x16x128xf32>
    %c0_13 = arith.constant 0 : index
    %c0_14 = arith.constant 0 : index
    %11 = vector.load %arg2[%c0_13, %c0_14] : memref<9x128xf32, #tpu.memory_space<vmem>>, vector<1x128xf32>
    %12 = vector.shape_cast %11 : vector<1x128xf32> to vector<128xf32>
    %13 = vector.shape_cast %12 : vector<128xf32> to vector<1x1x128xf32>
    %14 = vector.broadcast %13 : vector<1x1x128xf32> to vector<16x16x128xf32>
    %15 = arith.mulf %10, %14 : vector<16x16x128xf32>
    %16 = arith.addf %8, %15 : vector<16x16x128xf32>
    %17 = vector.extract_strided_slice %9 {offsets = [1, 0, 0], sizes = [16, 16, 128], strides = [1, 1, 1]} : vector<18x16x128xf32> to vector<16x16x128xf32>
    %c3 = arith.constant 3 : index
    %c0_15 = arith.constant 0 : index
    %18 = vector.load %arg2[%c3, %c0_15] : memref<9x128xf32, #tpu.memory_space<vmem>>, vector<1x128xf32>
    %19 = vector.shape_cast %18 : vector<1x128xf32> to vector<128xf32>
    %20 = vector.shape_cast %19 : vector<128xf32> to vector<1x1x128xf32>
    %21 = vector.broadcast %20 : vector<1x1x128xf32> to vector<16x16x128xf32>
    %22 = arith.mulf %17, %21 : vector<16x16x128xf32>
    %23 = arith.addf %16, %22 : vector<16x16x128xf32>
    %24 = vector.extract_strided_slice %9 {offsets = [2, 0, 0], sizes = [16, 16, 128], strides = [1, 1, 1]} : vector<18x16x128xf32> to vector<16x16x128xf32>
    %c6 = arith.constant 6 : index
    %c0_16 = arith.constant 0 : index
    %25 = vector.load %arg2[%c6, %c0_16] : memref<9x128xf32, #tpu.memory_space<vmem>>, vector<1x128xf32>
    %26 = vector.shape_cast %25 : vector<1x128xf32> to vector<128xf32>
    %27 = vector.shape_cast %26 : vector<128xf32> to vector<1x1x128xf32>
    %28 = vector.broadcast %27 : vector<1x1x128xf32> to vector<16x16x128xf32>
    %29 = arith.mulf %24, %28 : vector<16x16x128xf32>
    %30 = arith.addf %23, %29 : vector<16x16x128xf32>
    %c0_17 = arith.constant 0 : index
    %c1_18 = arith.constant 1 : index
    %c0_19 = arith.constant 0 : index
    %31 = vector.load %arg6[%c0_17, %c1_18, %c0_19] : memref<18x18x128xf32, #tpu.memory_space<vmem>>, vector<18x16x128xf32>
    %32 = vector.extract_strided_slice %31 {offsets = [0, 0, 0], sizes = [16, 16, 128], strides = [1, 1, 1]} : vector<18x16x128xf32> to vector<16x16x128xf32>
    %c1_20 = arith.constant 1 : index
    %c0_21 = arith.constant 0 : index
    %33 = vector.load %arg2[%c1_20, %c0_21] : memref<9x128xf32, #tpu.memory_space<vmem>>, vector<1x128xf32>
    %34 = vector.shape_cast %33 : vector<1x128xf32> to vector<128xf32>
    %35 = vector.shape_cast %34 : vector<128xf32> to vector<1x1x128xf32>
    %36 = vector.broadcast %35 : vector<1x1x128xf32> to vector<16x16x128xf32>
    %37 = arith.mulf %32, %36 : vector<16x16x128xf32>
    %38 = arith.addf %30, %37 : vector<16x16x128xf32>
    %39 = vector.extract_strided_slice %31 {offsets = [1, 0, 0], sizes = [16, 16, 128], strides = [1, 1, 1]} : vector<18x16x128xf32> to vector<16x16x128xf32>
    %c4 = arith.constant 4 : index
    %c0_22 = arith.constant 0 : index
    %40 = vector.load %arg2[%c4, %c0_22] : memref<9x128xf32, #tpu.memory_space<vmem>>, vector<1x128xf32>
    %41 = vector.shape_cast %40 : vector<1x128xf32> to vector<128xf32>
    %42 = vector.shape_cast %41 : vector<128xf32> to vector<1x1x128xf32>
    %43 = vector.broadcast %42 : vector<1x1x128xf32> to vector<16x16x128xf32>
    %44 = arith.mulf %39, %43 : vector<16x16x128xf32>
    %45 = arith.addf %38, %44 : vector<16x16x128xf32>
    %46 = vector.extract_strided_slice %31 {offsets = [2, 0, 0], sizes = [16, 16, 128], strides = [1, 1, 1]} : vector<18x16x128xf32> to vector<16x16x128xf32>
    %c7 = arith.constant 7 : index
    %c0_23 = arith.constant 0 : index
    %47 = vector.load %arg2[%c7, %c0_23] : memref<9x128xf32, #tpu.memory_space<vmem>>, vector<1x128xf32>
    %48 = vector.shape_cast %47 : vector<1x128xf32> to vector<128xf32>
    %49 = vector.shape_cast %48 : vector<128xf32> to vector<1x1x128xf32>
    %50 = vector.broadcast %49 : vector<1x1x128xf32> to vector<16x16x128xf32>
    %51 = arith.mulf %46, %50 : vector<16x16x128xf32>
    %52 = arith.addf %45, %51 : vector<16x16x128xf32>
    %c0_24 = arith.constant 0 : index
    %c2 = arith.constant 2 : index
    %c0_25 = arith.constant 0 : index
    %53 = vector.load %arg6[%c0_24, %c2, %c0_25] : memref<18x18x128xf32, #tpu.memory_space<vmem>>, vector<18x16x128xf32>
    %54 = vector.extract_strided_slice %53 {offsets = [0, 0, 0], sizes = [16, 16, 128], strides = [1, 1, 1]} : vector<18x16x128xf32> to vector<16x16x128xf32>
    %c2_26 = arith.constant 2 : index
    %c0_27 = arith.constant 0 : index
    %55 = vector.load %arg2[%c2_26, %c0_27] : memref<9x128xf32, #tpu.memory_space<vmem>>, vector<1x128xf32>
    %56 = vector.shape_cast %55 : vector<1x128xf32> to vector<128xf32>
    %57 = vector.shape_cast %56 : vector<128xf32> to vector<1x1x128xf32>
    %58 = vector.broadcast %57 : vector<1x1x128xf32> to vector<16x16x128xf32>
    %59 = arith.mulf %54, %58 : vector<16x16x128xf32>
    %60 = arith.addf %52, %59 : vector<16x16x128xf32>
    %61 = vector.extract_strided_slice %53 {offsets = [1, 0, 0], sizes = [16, 16, 128], strides = [1, 1, 1]} : vector<18x16x128xf32> to vector<16x16x128xf32>
    %c5 = arith.constant 5 : index
    %c0_28 = arith.constant 0 : index
    %62 = vector.load %arg2[%c5, %c0_28] : memref<9x128xf32, #tpu.memory_space<vmem>>, vector<1x128xf32>
    %63 = vector.shape_cast %62 : vector<1x128xf32> to vector<128xf32>
    %64 = vector.shape_cast %63 : vector<128xf32> to vector<1x1x128xf32>
    %65 = vector.broadcast %64 : vector<1x1x128xf32> to vector<16x16x128xf32>
    %66 = arith.mulf %61, %65 : vector<16x16x128xf32>
    %67 = arith.addf %60, %66 : vector<16x16x128xf32>
    %68 = vector.extract_strided_slice %53 {offsets = [2, 0, 0], sizes = [16, 16, 128], strides = [1, 1, 1]} : vector<18x16x128xf32> to vector<16x16x128xf32>
    %c8 = arith.constant 8 : index
    %c0_29 = arith.constant 0 : index
    %69 = vector.load %arg2[%c8, %c0_29] : memref<9x128xf32, #tpu.memory_space<vmem>>, vector<1x128xf32>
    %70 = vector.shape_cast %69 : vector<1x128xf32> to vector<128xf32>
    %71 = vector.shape_cast %70 : vector<128xf32> to vector<1x1x128xf32>
    %72 = vector.broadcast %71 : vector<1x1x128xf32> to vector<16x16x128xf32>
    %73 = arith.mulf %68, %72 : vector<16x16x128xf32>
    %74 = arith.addf %67, %73 : vector<16x16x128xf32>
    %75 = vector.shape_cast %74 : vector<16x16x128xf32> to vector<256x128xf32>
    %76 = arith.truncf %75 : vector<256x128xf32> to vector<256x128xbf16>
    %c0_30 = arith.constant 0 : index
    %c0_31 = arith.constant 0 : index
    %77 = vector.load %arg3[%c0_30, %c0_31] : memref<128x128xbf16, #tpu.memory_space<vmem>>, vector<128x128xbf16>
    %cst_32 = arith.constant dense<0.000000e+00> : vector<256x128xf32>
    %78 = tpu.matmul %76, %77, %cst_32 {dimension_numbers = #tpu.dot_dimension_numbers<[1], [0], [0], [1], [0, 0, 1, 1], [], []>} : vector<256x128xbf16>, vector<128x128xbf16>, vector<256x128xf32> -> vector<256x128xf32>
    %c0_33 = arith.constant 0 : index
    %c0_34 = arith.constant 0 : index
    %79 = vector.load %arg4[%c0_33, %c0_34] : memref<1x128xf32, #tpu.memory_space<vmem>>, vector<1x128xf32>
    %80 = vector.broadcast %79 : vector<1x128xf32> to vector<256x128xf32>
    %81 = arith.addf %78, %80 : vector<256x128xf32>
    %82 = arith.truncf %81 : vector<256x128xf32> to vector<256x128xbf16>
    %c0_35 = arith.constant 0 : index
    %c0_36 = arith.constant 0 : index
    %c0_37 = arith.constant 0 : index
    %83 = vector.load %arg5[%c0_35, %c0_36, %c0_37] : memref<1x256x128xbf16, #tpu.memory_space<vmem>>, vector<1x256x128xbf16>
    %84 = vector.shape_cast %83 : vector<1x256x128xbf16> to vector<256x128xbf16>
    %85 = vector.shape_cast %82 : vector<256x128xbf16> to vector<1x256x128xbf16>
    tpu.vector_store %arg5[%c0_35, %c0_36, %c0_37], %85 {strides = array<i32>} : memref<1x256x128xbf16, #tpu.memory_space<vmem>>, vector<1x256x128xbf16>,
    return
  }
  func.func @transform_0(%arg0: i32) -> (i32, i32, i32, i32) {
    %c0_i32 = arith.constant 0 : i32
    %c0_i32_0 = arith.constant 0 : i32
    %c0_i32_1 = arith.constant 0 : i32
    %c0_i32_2 = arith.constant 0 : i32
    return %arg0, %c0_i32, %c0_i32_0, %c0_i32_1 : i32, i32, i32, i32
  }
  func.func @transform_1(%arg0: i32) -> (i32, i32) {
    %c0_i32 = arith.constant 0 : i32
    %c0_i32_0 = arith.constant 0 : i32
    %c0_i32_1 = arith.constant 0 : i32
    return %c0_i32, %c0_i32_0 : i32, i32
  }
  func.func @transform_2(%arg0: i32) -> (i32, i32) {
    %c0_i32 = arith.constant 0 : i32
    %c0_i32_0 = arith.constant 0 : i32
    %c0_i32_1 = arith.constant 0 : i32
    return %c0_i32, %c0_i32_0 : i32, i32
  }
  func.func @transform_3(%arg0: i32) -> (i32, i32) {
    %c0_i32 = arith.constant 0 : i32
    %c0_i32_0 = arith.constant 0 : i32
    %c0_i32_1 = arith.constant 0 : i32
    return %c0_i32, %c0_i32_0 : i32, i32
  }
  func.func @transform_4(%arg0: i32) -> (i32, i32, i32) {
    %c0_i32 = arith.constant 0 : i32
    %c0_i32_0 = arith.constant 0 : i32
    %c0_i32_1 = arith.constant 0 : i32
    return %arg0, %c0_i32, %c0_i32_0 : i32, i32, i32
  }
}

module attributes {stable_mosaic.version = 11 : i64} {
  func.func @_tail_kernel(%arg0: i32, %arg1: memref<1x16x16x128xbf16, #tpu.memory_space<vmem>>, %arg2: memref<1x16x16x64xf32, #tpu.memory_space<vmem>>, %arg3: memref<64x128xbf16, #tpu.memory_space<vmem>>, %arg4: memref<1x128xf32, #tpu.memory_space<vmem>>, %arg5: memref<1x64x128xf32, #tpu.memory_space<vmem>>, %arg6: memref<18x18x128xf32, #tpu.memory_space<vmem>>) attributes {dimension_semantics = [#tpu.dimension_semantics<parallel>], iteration_bounds = array<i64: 2>, scalar_prefetch = 0 : i64, scratch_operands = 1 : i64, tpu.core_type = #tpu.core_type<tc>, window_params = [{transform_indices = @transform_0, window_bounds = array<i64: 1, 16, 16, 128>}, {transform_indices = @transform_1, window_bounds = array<i64: 1, 16, 16, 64>}, {pipeline_mode = #tpu.pipeline_mode<synchronous>, transform_indices = @transform_2, window_bounds = array<i64: 64, 128>}, {pipeline_mode = #tpu.pipeline_mode<synchronous>, transform_indices = @transform_3, window_bounds = array<i64: 1, 128>}, {transform_indices = @transform_4, window_bounds = array<i64: 1, 64, 128>}]} {
    %cst = arith.constant 0xFF800000 : f32
    %0 = vector.broadcast %cst : f32 to vector<18x18x128xf32>
    %c0 = arith.constant 0 : index
    %c0_0 = arith.constant 0 : index
    %c0_1 = arith.constant 0 : index
    %1 = vector.load %arg6[%c0, %c0_0, %c0_1] : memref<18x18x128xf32, #tpu.memory_space<vmem>>, vector<18x18x128xf32>
    tpu.vector_store %arg6[%c0, %c0_0, %c0_1], %0 {strides = array<i32>} : memref<18x18x128xf32, #tpu.memory_space<vmem>>, vector<18x18x128xf32>,
    %c0_2 = arith.constant 0 : index
    %c0_3 = arith.constant 0 : index
    %c0_4 = arith.constant 0 : index
    %c0_5 = arith.constant 0 : index
    %2 = vector.load %arg1[%c0_2, %c0_3, %c0_4, %c0_5] : memref<1x16x16x128xbf16, #tpu.memory_space<vmem>>, vector<1x16x16x128xbf16>
    %3 = vector.shape_cast %2 : vector<1x16x16x128xbf16> to vector<16x16x128xbf16>
    %4 = arith.extf %3 : vector<16x16x128xbf16> to vector<16x16x128xf32>
    %c1 = arith.constant 1 : index
    %c1_6 = arith.constant 1 : index
    %c0_7 = arith.constant 0 : index
    %5 = vector.load %arg6[%c1, %c1_6, %c0_7] : memref<18x18x128xf32, #tpu.memory_space<vmem>>, vector<16x16x128xf32>
    tpu.vector_store %arg6[%c1, %c1_6, %c0_7], %4 {strides = array<i32>} : memref<18x18x128xf32, #tpu.memory_space<vmem>>, vector<16x16x128xf32>,
    %c0_8 = arith.constant 0 : index
    %c0_9 = arith.constant 0 : index
    %c0_10 = arith.constant 0 : index
    %6 = tpu.strided_load %arg6[%c0_8, %c0_9, %c0_10] {strides = array<i32: 2, 2, 1>} : memref<18x18x128xf32, #tpu.memory_space<vmem>>, vector<8x8x128xf32>
    %c0_11 = arith.constant 0 : index
    %c1_12 = arith.constant 1 : index
    %c0_13 = arith.constant 0 : index
    %7 = tpu.strided_load %arg6[%c0_11, %c1_12, %c0_13] {strides = array<i32: 2, 2, 1>} : memref<18x18x128xf32, #tpu.memory_space<vmem>>, vector<8x8x128xf32>
    %8 = arith.maximumf %6, %7 : vector<8x8x128xf32>
    %c0_14 = arith.constant 0 : index
    %c2 = arith.constant 2 : index
    %c0_15 = arith.constant 0 : index
    %9 = tpu.strided_load %arg6[%c0_14, %c2, %c0_15] {strides = array<i32: 2, 2, 1>} : memref<18x18x128xf32, #tpu.memory_space<vmem>>, vector<8x8x128xf32>
    %10 = arith.maximumf %8, %9 : vector<8x8x128xf32>
    %c1_16 = arith.constant 1 : index
    %c0_17 = arith.constant 0 : index
    %c0_18 = arith.constant 0 : index
    %11 = tpu.strided_load %arg6[%c1_16, %c0_17, %c0_18] {strides = array<i32: 2, 2, 1>} : memref<18x18x128xf32, #tpu.memory_space<vmem>>, vector<8x8x128xf32>
    %12 = arith.maximumf %10, %11 : vector<8x8x128xf32>
    %c1_19 = arith.constant 1 : index
    %c1_20 = arith.constant 1 : index
    %c0_21 = arith.constant 0 : index
    %13 = tpu.strided_load %arg6[%c1_19, %c1_20, %c0_21] {strides = array<i32: 2, 2, 1>} : memref<18x18x128xf32, #tpu.memory_space<vmem>>, vector<8x8x128xf32>
    %14 = arith.maximumf %12, %13 : vector<8x8x128xf32>
    %c1_22 = arith.constant 1 : index
    %c2_23 = arith.constant 2 : index
    %c0_24 = arith.constant 0 : index
    %15 = tpu.strided_load %arg6[%c1_22, %c2_23, %c0_24] {strides = array<i32: 2, 2, 1>} : memref<18x18x128xf32, #tpu.memory_space<vmem>>, vector<8x8x128xf32>
    %16 = arith.maximumf %14, %15 : vector<8x8x128xf32>
    %c2_25 = arith.constant 2 : index
    %c0_26 = arith.constant 0 : index
    %c0_27 = arith.constant 0 : index
    %17 = tpu.strided_load %arg6[%c2_25, %c0_26, %c0_27] {strides = array<i32: 2, 2, 1>} : memref<18x18x128xf32, #tpu.memory_space<vmem>>, vector<8x8x128xf32>
    %18 = arith.maximumf %16, %17 : vector<8x8x128xf32>
    %c2_28 = arith.constant 2 : index
    %c1_29 = arith.constant 1 : index
    %c0_30 = arith.constant 0 : index
    %19 = tpu.strided_load %arg6[%c2_28, %c1_29, %c0_30] {strides = array<i32: 2, 2, 1>} : memref<18x18x128xf32, #tpu.memory_space<vmem>>, vector<8x8x128xf32>
    %20 = arith.maximumf %18, %19 : vector<8x8x128xf32>
    %c2_31 = arith.constant 2 : index
    %c2_32 = arith.constant 2 : index
    %c0_33 = arith.constant 0 : index
    %21 = tpu.strided_load %arg6[%c2_31, %c2_32, %c0_33] {strides = array<i32: 2, 2, 1>} : memref<18x18x128xf32, #tpu.memory_space<vmem>>, vector<8x8x128xf32>
    %22 = arith.maximumf %20, %21 : vector<8x8x128xf32>
    %23 = vector.shape_cast %22 : vector<8x8x128xf32> to vector<64x128xf32>
    %c0_34 = arith.constant 0 : index
    %c0_35 = arith.constant 0 : index
    %c0_36 = arith.constant 0 : index
    %c0_37 = arith.constant 0 : index
    %24 = tpu.strided_load %arg2[%c0_34, %c0_35, %c0_36, %c0_37] {strides = array<i32: 1, 2, 2, 1>} : memref<1x16x16x64xf32, #tpu.memory_space<vmem>>, vector<1x8x8x64xf32>
    %25 = vector.shape_cast %24 : vector<1x8x8x64xf32> to vector<64x64xf32>
    %26 = arith.truncf %25 : vector<64x64xf32> to vector<64x64xbf16>
    %c0_38 = arith.constant 0 : index
    %c0_39 = arith.constant 0 : index
    %27 = vector.load %arg3[%c0_38, %c0_39] : memref<64x128xbf16, #tpu.memory_space<vmem>>, vector<64x128xbf16>
    %cst_40 = arith.constant dense<0.000000e+00> : vector<64x128xf32>
    %28 = tpu.matmul %26, %27, %cst_40 {dimension_numbers = #tpu.dot_dimension_numbers<[1], [0], [0], [1], [0, 0, 1, 1], [], []>} : vector<64x64xbf16>, vector<64x128xbf16>, vector<64x128xf32> -> vector<64x128xf32>
    %29 = arith.addf %23, %28 : vector<64x128xf32>
    %c0_41 = arith.constant 0 : index
    %c0_42 = arith.constant 0 : index
    %30 = vector.load %arg4[%c0_41, %c0_42] : memref<1x128xf32, #tpu.memory_space<vmem>>, vector<1x128xf32>
    %31 = vector.broadcast %30 : vector<1x128xf32> to vector<64x128xf32>
    %32 = arith.addf %29, %31 : vector<64x128xf32>
    %c0_43 = arith.constant 0 : index
    %c0_44 = arith.constant 0 : index
    %c0_45 = arith.constant 0 : index
    %33 = vector.load %arg5[%c0_43, %c0_44, %c0_45] : memref<1x64x128xf32, #tpu.memory_space<vmem>>, vector<1x64x128xf32>
    %34 = vector.shape_cast %33 : vector<1x64x128xf32> to vector<64x128xf32>
    %35 = vector.shape_cast %32 : vector<64x128xf32> to vector<1x64x128xf32>
    tpu.vector_store %arg5[%c0_43, %c0_44, %c0_45], %35 {strides = array<i32>} : memref<1x64x128xf32, #tpu.memory_space<vmem>>, vector<1x64x128xf32>,
    return
  }
  func.func @transform_0(%arg0: i32) -> (i32, i32, i32, i32) {
    %c0_i32 = arith.constant 0 : i32
    %c0_i32_0 = arith.constant 0 : i32
    %c0_i32_1 = arith.constant 0 : i32
    %c0_i32_2 = arith.constant 0 : i32
    return %arg0, %c0_i32, %c0_i32_0, %c0_i32_1 : i32, i32, i32, i32
  }
  func.func @transform_1(%arg0: i32) -> (i32, i32, i32, i32) {
    %c0_i32 = arith.constant 0 : i32
    %c0_i32_0 = arith.constant 0 : i32
    %c0_i32_1 = arith.constant 0 : i32
    %c0_i32_2 = arith.constant 0 : i32
    return %arg0, %c0_i32, %c0_i32_0, %c0_i32_1 : i32, i32, i32, i32
  }
  func.func @transform_2(%arg0: i32) -> (i32, i32) {
    %c0_i32 = arith.constant 0 : i32
    %c0_i32_0 = arith.constant 0 : i32
    %c0_i32_1 = arith.constant 0 : i32
    return %c0_i32, %c0_i32_0 : i32, i32
  }
  func.func @transform_3(%arg0: i32) -> (i32, i32) {
    %c0_i32 = arith.constant 0 : i32
    %c0_i32_0 = arith.constant 0 : i32
    %c0_i32_1 = arith.constant 0 : i32
    return %c0_i32, %c0_i32_0 : i32, i32
  }
  func.func @transform_4(%arg0: i32) -> (i32, i32, i32) {
    %c0_i32 = arith.constant 0 : i32
    %c0_i32_0 = arith.constant 0 : i32
    %c0_i32_1 = arith.constant 0 : i32
    return %arg0, %c0_i32, %c0_i32_0 : i32, i32, i32
  }
}

</mosaic_0001>

<bundles_post_ra>
// kernel: block_forward.5
= control target key start
LH: loop header
LB: loop body
LE: loop exit
PB: predicated region body
PF: predicated region fallthrough
CT: control target
= control target key end

     0   :  { %9 = vsyncpa [#allocation4], 0  ;;  %s1320_s0 = inlined_call_operand.vmem [shape: bf16[2,16,16,128], index: 0, kind: input, shape index: {}]   ;;  %s1321_s1 = inlined_call_operand.vmem [shape: f32[2,16,16,64], index: 1, kind: input, shape index: {}]   ;;  %s1322_s2 = inlined_call_operand.vmem [shape: bf16[64,128], index: 2, kind: input, shape index: {}]   ;;  %s1323_s3 = inlined_call_operand.vmem [shape: f32[1,128], index: 3, kind: input, shape index: {}]   ;;  %s1324_s4 = inlined_call_operand.hbm [shape: f32[2,64,128], index: 4, kind: output, shape index: {}]  }
   0x1   :  { %11 = vsyncpa [#allocation4 + $0x1], 0  ;;  %s1151_s15 = smov 0   ;;  %s1153_s16 = smov 0  }
   0x2   :  { %s1155_s17 = smov 0   ;;  %s1157_s18 = smov 0  }
   0x3 LB: > { %s1172_s19 = sadd.s32 4294967295, %s1120_s18   ;;  %s868_s20 = sadd.s32 4294967294, %s1120_s18   ;;  %s1120_s18 = sphi %s1157_s18, %s1330_s18   ;;  %s1116_s17 = sphi %s1155_s17, %s1329_s17   ;;  %s1112_s16 = sphi %s1153_s16, %s1328_s16   ;;  %s1108_s15 = sphi %s1151_s15, %s1327_s15  }
   0x4   : > { %s1176_s21 = sadd.s32 1, %s1120_s18   ;;  %s118_s22 = sadd.s32 1, %s1116_s17 }
   0x5   : > { %s115_s23 = ssub.s32 %s1120_s18, %s1176_s21  ;;  %p128_p0 = scmp.ne.s32.totalorder %s1116_s17, %s1112_s16 }
   0x6   : > { %p116_p1 = scmp.eq.s32.totalorder %s115_s23, 0  ;;  %p129_p2 = scmp.eq.s32.totalorder %s1172_s19, 1 }
   0x7   : > { %p134_p3 = scmp.ne.s32.totalorder %s1112_s16, %s1108_s15  ;;  %p135_p4 = scmp.eq.s32.totalorder %s868_s20, 1 }
   0x8   : > { %s1187_s24 = scalar_select %p116_p1, %s1116_s17, %s118_s22  }
   0x9   : > { %p1189_p5 = por %p129_p2, %p128_p0  ;;  %p1193_p6 = por %p135_p4, %p134_p3 }
   0xa   : > { %p871_p7 = scmp.ge.s32.totalorder %s1120_s18, 1  ;;  %p175_p8 = scmp.lt.s32.totalorder %s1120_s18, 3 }
   0xc   : > { %p176_p9 = pnand %p871_p7, %p175_p8 }
   0xd   : > { %v1054_v0 = vld [vmem:[%s1322_s2] sm:$0xff] (!%p176_p9)   ;;  %p206_p10 = scmp.lt.s32.totalorder (!%p176_p9), %s1172_s19, 1  ;;  %v1206_v1 = vld [vmem:[%s1322_s2 + $0x8] sm:$0xff] (!%p176_p9)   ;;  %v1214_v2 = vld [vmem:[%s1322_s2 + $0x10] sm:$0xff] (!%p176_p9)   ;;  %vm625_vm0 = vcmask (!%p176_p9), 523264   ;;  %v1122_v3 = vmov (!%p176_p9), -inf  }
   0xe   : > { %179 = sbr.rel (%p176_p9) target bundleno = 270 (0x10e), region = 36  ;;  %988 = vmatprep.subr.bf16.mxu0 (!%p176_p9), %v1054_v0  ;;  %1004 = vmatprep.subr.bf16.mxu1 (!%p176_p9), %v1054_v0  ;;  %229 = vst [vmem:[#allocation2 + $0x60] sm:$0xff] (!%p176_p9), %v1122_v3  ;;  %230 = vst [vmem:[#allocation2 + $0x68] sm:$0xff] (!%p176_p9), %v1122_v3  ;;  %v1057_v9 = vld [vmem:[%s1322_s2 + $0x18] sm:$0xff] (!%p176_p9)   ;;  %s203_s27 = sand.u32 (!%p176_p9), 1, %s1112_s16  }
   0xf   : > { %989 = vmatpush3.bf16.msra.mxu0 (!%p176_p9), %v1054_v0  ;;  %1008 = vmatpush3.bf16.msra.mxu1 (!%p176_p9), %v1054_v0  ;;  %231 = vst [vmem:[#allocation2 + $0x70] sm:$0x3] (!%p176_p9), %v1122_v3  ;;  %232 = vst [vmem:[#allocation2 + $0x78] sm:$0xff] (!%p176_p9), %v1122_v3  ;;  %s872_s28 = sshll.u32 (!%p176_p9), %s203_s27, 6  ;;  %s1279_s10 = scalar_lea.sflag (!%p176_p9), [#allocation4], %s203_s27 }
  0x10   : > { %990 = vmatprep.subr.bf16.mxu0 (!%p176_p9), %v1206_v1  ;;  %1005 = vmatprep.subr.bf16.mxu1 (!%p176_p9), %v1206_v1  ;;  %233 = vst [vmem:[#allocation2 + $0x80] sm:$0xff] (!%p176_p9), %v1122_v3  ;;  %234 = vst [vmem:[#allocation2 + $0x88] sm:$0x3] (!%p176_p9), %v1122_v3  ;;  %s205_s6 = scalar_lea.vmem (!%p176_p9), [#allocation3], %s872_s28 }
  0x11   : > { %235 = vst [vmem:[#allocation2 + $0x90] sm:$0xff] (!%p176_p9), %v1122_v3  ;;  %236 = vst [vmem:[#allocation2 + $0x98] sm:$0xff] (!%p176_p9), %v1122_v3  ;;  %s748_s7 = sshll.u32 (!%p176_p9), %s205_s6, 4  ;;  %s1275_s7 = int_to_ptr.vmem [resolvable:$true] %s748_s7 }
  0x12   : > { %237 = vst [vmem:[#allocation2 + $0xa0] sm:$0x3] (!%p176_p9), %v1122_v3  ;;  %217 = vst [vmem:[#allocation2] sm:$0xff] (!%p176_p9), %v1122_v3  ;;  %s1058_s11 = scalar_lea.vmem (!%p176_p9), %s1275_s7, 1024 }
  0x13   : > { %218 = vst [vmem:[#allocation2 + $0x8] sm:$0xff] (!%p176_p9), %v1122_v3  ;;  %219 = vst [vmem:[#allocation2 + $0x10] sm:$0x3] (!%p176_p9), %v1122_v3  ;;  %991 = vmatpush3.bf16.msra.mxu0 (!%p176_p9), %v1206_v1  ;;  %1009 = vmatpush3.bf16.msra.mxu1 (!%p176_p9), %v1206_v1  ;;  %p1059_p11 = scmp.ne.s32.totalorder (!%p176_p9), %s1275_s7, %s1058_s11 }
  0x14   : > { %220 = vst [vmem:[#allocation2 + $0x18] sm:$0xff] (!%p176_p9), %v1122_v3  ;;  %221 = vst [vmem:[#allocation2 + $0x20] sm:$0xff] (!%p176_p9), %v1122_v3  ;;  %992 = vmatprep.subr.bf16.mxu0 (!%p176_p9), %v1214_v2  ;;  %1006 = vmatprep.subr.bf16.mxu1 (!%p176_p9), %v1214_v2 }
  0x15   : > { %s207_s5 = scalar_select %p206_p10, %s1172_s19, 1  ;;  %222 = vst [vmem:[#allocation2 + $0x28] sm:$0x3] %v1122_v3  ;;  %223 = vst [vmem:[#allocation2 + $0x30] sm:$0xff] %v1122_v3 }
  0x16   : > { %224 = vst [vmem:[#allocation2 + $0x38] sm:$0xff] %v1122_v3  ;;  %225 = vst [vmem:[#allocation2 + $0x40] sm:$0x3] %v1122_v3  ;;  %p1060_p12 = pnand %p1059_p11, %p1189_p5 }
  0x17   : > { %s898_s8 = sshll.u32 %s207_s5, 7  ;;  %s899_s9 = sshll.u32 %s207_s5, 8  ;;  %226 = vst [vmem:[#allocation2 + $0x48] sm:$0xff] %v1122_v3  ;;  %227 = vst [vmem:[#allocation2 + $0x50] sm:$0xff] %v1122_v3  ;;  %993 = vmatpush3.bf16.msra.mxu0 %v1214_v2  ;;  %1010 = vmatpush3.bf16.msra.mxu1 %v1214_v2 }
  0x18   : > { %s1219_s12 = scalar_lea.vmem %s1320_s0, %s898_s8  ;;  %s1224_s20 = scalar_lea.vmem %s1321_s1, %s899_s9  ;;  %228 = vst [vmem:[#allocation2 + $0x58] sm:$0x3] %v1122_v3  ;;  %238 = vst [vmem:[#allocation2 + $0xa8] sm:$0xff] %v1122_v3  ;;  %994 = vmatprep.subr.bf16.mxu0 %v1057_v9  ;;  %1007 = vmatprep.subr.bf16.mxu1 %v1057_v9 }
  0x19   : > { %239 = vst [vmem:[#allocation2 + $0xb0] sm:$0xff] %v1122_v3  ;;  %240 = vst [vmem:[#allocation2 + $0xb8] sm:$0x3] %v1122_v3  ;;  %v574_v4 = vld [vmem:[%s1224_s20] ss:$2 sm:$0xff]  ;;  %v967_v11 = vld [vmem:[%s1219_s12 + $0x18] sm:$0xff]   ;;  %p1061_p13 = pneg %p1060_p12 }
  0x1a   : > { %241 = vst [vmem:[#allocation2 + $0xc0] sm:$0xff] %v1122_v3  ;;  %242 = vst [vmem:[#allocation2 + $0xc8] sm:$0xff] %v1122_v3  ;;  %v877_v5 = vld [vmem:[%s1224_s20 + $0x20] ss:$2 sm:$0xff]  ;;  %v915_v12 = vunpack.c.l.bf16 %v967_v11  ;;  %v916_v13 = vunpack.c.h.bf16 %v967_v11  ;;  %v975_v26 = vld [vmem:[%s1219_s12 + $0x58] sm:$0xff]   ;;  %s900_s5 = sshll.u32 %s1172_s19, 10 }
  0x1b   : > { %243 = vst [vmem:[#allocation2 + $0xd0] sm:$0x3] %v1122_v3  ;;  %244 = vst [vmem:[#allocation2 + $0xd8] sm:$0xff] %v1122_v3  ;;  %v880_v6 = vld [vmem:[%s1224_s20 + $0x80] ss:$2 sm:$0xff]  ;;  %v589_v7 = vpack.c.bf16 %v877_v5, %v574_v4  ;;  %995 = vmatpush3.bf16.msra.mxu0 %v1057_v9  ;;  %1011 = vmatpush3.bf16.msra.mxu1 %v1057_v9  ;;  %v947_v27 = vunpack.c.l.bf16 %v975_v26  ;;  %v948_v28 = vunpack.c.h.bf16 %v975_v26  ;;  %v971_v29 = vld [vmem:[%s1219_s12 + $0x38] sm:$0xff]   ;;  %s1273_s9 = scalar_lea.hbm %s1324_s4, %s900_s5 }
  0x1c   : > { %245 = vst [vmem:[#allocation2 + $0xe0] sm:$0xff] %v1122_v3  ;;  %246 = vst [vmem:[#allocation2 + $0xe8] sm:$0x3] %v1122_v3  ;;  %v881_v8 = vld [vmem:[%s1224_s20 + $0xa0] ss:$2 sm:$0xff]  ;;  %v931_v31 = vunpack.c.l.bf16 %v971_v29  ;;  %v932_v32 = vunpack.c.h.bf16 %v971_v29  ;;  %v970_v50 = vld [vmem:[%s1219_s12 + $0x30] sm:$0xff]  }
  0x1d   : > { %247 = vst [vmem:[#allocation2 + $0xf0] sm:$0xff] %v1122_v3  ;;  %248 = vst [vmem:[#allocation2 + $0xf8] sm:$0xff] %v1122_v3  ;;  %v591_v10 = vpack.c.bf16 %v881_v8, %v880_v6  ;;  %996 = vmatprep.mubr.msk.bf16.mxu0 %vm625_vm0, %v589_v7  ;;  %v968_v14 = vld [vmem:[%s1219_s12 + $0x20] sm:$0xff]   ;;  %v969_v15 = vld [vmem:[%s1219_s12 + $0x28] sm:$0xff]   ;;  %v927_v52 = vunpack.c.l.bf16 %v970_v50  ;;  %v928_v53 = vunpack.c.h.bf16 %v970_v50 }
  0x1e   : > { %249 = vst [vmem:[#allocation2 + $0x100] sm:$0x3] %v1122_v3  ;;  %250 = vst [vmem:[#allocation2 + $0x108] sm:$0xff] %v1122_v3  ;;  %v878_v16 = vld [vmem:[%s1224_s20 + $0x40] ss:$2 sm:$0xff]  ;;  %v919_v17 = vunpack.c.l.bf16 %v968_v14  ;;  %v920_v18 = vunpack.c.h.bf16 %v968_v14  ;;  %v923_v19 = vunpack.c.l.bf16 %v969_v15  ;;  %v924_v20 = vunpack.c.h.bf16 %v969_v15  ;;  %v978_v51 = vld [vmem:[%s1219_s12 + $0x70] sm:$0xff]  }
  0x1f   : > { %251 = vst [vmem:[#allocation2 + $0x110] sm:$0xff] %v1122_v3  ;;  %252 = vst [vmem:[#allocation2 + $0x118] sm:$0x3] %v1122_v3  ;;  %1000 = vmatprep.mubr.msk.bf16.mxu1 %vm625_vm0, %v591_v10  ;;  %v879_v21 = vld [vmem:[%s1224_s20 + $0x60] ss:$2 sm:$0xff]  ;;  %v959_v54 = vunpack.c.l.bf16 %v978_v51  ;;  %v960_v55 = vunpack.c.h.bf16 %v978_v51  ;;  %v966_v56 = vld [vmem:[%s1219_s12 + $0x10] sm:$0xff]  }
  0x20   : > { %253 = vst [vmem:[#allocation2 + $0x120] sm:$0xff] %v1122_v3  ;;  %254 = vst [vmem:[#allocation2 + $0x128] sm:$0xff] %v1122_v3  ;;  %v882_v22 = vld [vmem:[%s1224_s20 + $0xc0] ss:$2 sm:$0xff]  ;;  %v590_v24 = vpack.c.bf16 %v879_v21, %v878_v16  ;;  %v974_v57 = vld [vmem:[%s1219_s12 + $0x50] sm:$0xff]   ;;  %v911_v58 = vunpack.c.l.bf16 %v966_v56  ;;  %v912_v59 = vunpack.c.h.bf16 %v966_v56 }
  0x21   : > { %255 = vst [vmem:[#allocation2 + $0x130] sm:$0x3] %v1122_v3  ;;  %256 = vst [vmem:[#allocation2 + $0x138] sm:$0xff] %v1122_v3  ;;  %v883_v23 = vld [vmem:[%s1224_s20 + $0xe0] ss:$2 sm:$0xff]  ;;  %v943_v60 = vunpack.c.l.bf16 %v974_v57  ;;  %v944_v61 = vunpack.c.h.bf16 %v974_v57  ;;  %v979_v62 = vld [vmem:[%s1219_s12 + $0x78] sm:$0xff]  }
  0x22   : > { %257 = vst [vmem:[#allocation2 + $0x140] sm:$0xff] %v1122_v3  ;;  %258 = vst [vmem:[#allocation2 + $0x148] sm:$0x3] %v1122_v3  ;;  %v592_v25 = vpack.c.bf16 %v883_v23, %v882_v22  ;;  %997 = vmatmul.mubr.msk.bf16.vlgmr.msra.gmra.mrb[0].mxu0 %vm625_vm0, %v590_v24  ;;  %v977_v30 = vld [vmem:[%s1219_s12 + $0x68] sm:$0xff]   ;;  %v976_v37 = vld [vmem:[%s1219_s12 + $0x60] sm:$0xff]   ;;  %v963_v63 = vunpack.c.l.bf16 %v979_v62  ;;  %v964_v0 = vunpack.c.h.bf16 %v979_v62 }
  0x23   : > { %259 = vst [vmem:[#allocation2 + $0x150] sm:$0xff] %v1122_v3  ;;  %260 = vst [vmem:[#allocation2 + $0x158] sm:$0xff] %v1122_v3  ;;  %v955_v33 = vunpack.c.l.bf16 %v977_v30  ;;  %v956_v34 = vunpack.c.h.bf16 %v977_v30  ;;  %v965_v35 = vld [vmem:[%s1219_s12 + $0x8] sm:$0xff]   ;;  %v951_v42 = vunpack.c.l.bf16 %v976_v37  ;;  %v952_v43 = vunpack.c.h.bf16 %v976_v37  ;;  %v902_v44 = vld [vmem:[%s1219_s12] sm:$0xff]  }
  0x24   : > { %261 = vst [vmem:[#allocation2 + $0x160] sm:$0x3] %v1122_v3  ;;  %262 = vst [vmem:[#allocation2 + $0x168] sm:$0xff] %v1122_v3  ;;  %1001 = vmatmul.mubr.msk.bf16.vlgmr.msra.gmra.mrb[0].mxu1 %vm625_vm0, %v592_v25  ;;  %v973_v36 = vld [vmem:[%s1219_s12 + $0x48] sm:$0xff]   ;;  %v907_v38 = vunpack.c.l.bf16 %v965_v35  ;;  %v908_v39 = vunpack.c.h.bf16 %v965_v35  ;;  %v972_v45 = vld [vmem:[%s1219_s12 + $0x40] sm:$0xff]   ;;  %v903_v46 = vunpack.c.l.bf16 %v902_v44  ;;  %v904_v47 = vunpack.c.h.bf16 %v902_v44  ;;  %s1123_s12 = smov [#allocation3]  }
  0x25   : > { %263 = vst [vmem:[#allocation2 + $0x170] sm:$0xff] %v1122_v3  ;;  %264 = vst [vmem:[#allocation2 + $0x178] sm:$0x3] %v1122_v3  ;;  %v939_v40 = vunpack.c.l.bf16 %v973_v36  ;;  %v940_v41 = vunpack.c.h.bf16 %v973_v36  ;;  %v935_v48 = vunpack.c.l.bf16 %v972_v45  ;;  %v936_v49 = vunpack.c.h.bf16 %v972_v45  ;;  %v368_v5 = vld [vmem:[#allocation2] ss:$2 sm:$0xff]  ;;  %s1062_s13 = sshll.u32 %s1123_s12, 4  ;;  %s1063_s13 = int_to_ptr.vmem [resolvable:$false] %s1062_s13 }
  0x26   : > { %265 = vst [vmem:[#allocation2 + $0x180] sm:$0xff] %v1122_v3  ;;  %266 = vst [vmem:[#allocation2 + $0x188] sm:$0xff] %v1122_v3  ;;  %v384_v6 = vld [vmem:[#allocation2 + $0x1] ss:$2 sm:$0xff]  ;;  %v408_v23 = vld [vmem:[#allocation2 + $0x2] ss:$2 sm:$0xff]  ;;  %p1065_p0 = scmp.lt.s32.totalorder %s1275_s7, %s1063_s13 }
  0x27   : > { %267 = vst [vmem:[#allocation2 + $0x190] sm:$0x3] %v1122_v3  ;;  %342 = vst [vmem:[#allocation2 + $0x61] sm:$0xff] %v915_v12  ;;  %v399_v21 = vmax.f32 %v368_v5, %v384_v6  ;;  %s1064_s14 = scalar_lea.vmem %s1063_s13, 2048 }
  0x28   : > { %343 = vst [vmem:[#allocation2 + $0x69] sm:$0xff] %v916_v13  ;;  %344 = vst [vmem:[#allocation2 + $0x79] sm:$0xff] %v919_v17  ;;  %p1066_p1 = scmp.lt.s32.totalorder %s1064_s14, %s1058_s11 }
  0x29   : > { %345 = vst [vmem:[#allocation2 + $0x81] sm:$0xff] %v920_v18  ;;  %346 = vst [vmem:[#allocation2 + $0x91] sm:$0xff] %v923_v19  ;;  %v423_v37 = vmax.f32 %v399_v21, %v408_v23 }
  0x2a   : > { %347 = vst [vmem:[#allocation2 + $0x99] sm:$0xff] %v924_v20  ;;  %358 = vst [vmem:[#allocation2 + $0x121] sm:$0xff] %v947_v27  ;;  %p1067_p2 = por %p1066_p1, %p1065_p0 }
  0x2b   : > { %359 = vst [vmem:[#allocation2 + $0x129] sm:$0xff] %v948_v28  ;;  %350 = vst [vmem:[#allocation2 + $0xc1] sm:$0xff] %v931_v31 }
  0x2c   : > { %351 = vst [vmem:[#allocation2 + $0xc9] sm:$0xff] %v932_v32  ;;  %362 = vst [vmem:[#allocation2 + $0x151] sm:$0xff] %v955_v33  ;;  %p1068_p3 = pnand %p1067_p2, %p1061_p13 }
  0x2d   : > { %363 = vst [vmem:[#allocation2 + $0x159] sm:$0xff] %v956_v34  ;;  %338 = vst [vmem:[#allocation2 + $0x31] sm:$0xff] %v907_v38 }
  0x2e   : > { %339 = vst [vmem:[#allocation2 + $0x39] sm:$0xff] %v908_v39  ;;  %354 = vst [vmem:[#allocation2 + $0xf1] sm:$0xff] %v939_v40 }
  0x2f   : > { %355 = vst [vmem:[#allocation2 + $0xf9] sm:$0xff] %v940_v41  ;;  %360 = vst [vmem:[#allocation2 + $0x139] sm:$0xff] %v951_v42  ;;  %v372_v1 = vld [vmem:[#allocation2 + $0x60] ss:$2 sm:$0xff]  ;;  %v388_v2 = vld [vmem:[#allocation2 + $0x61] ss:$2 sm:$0xff] }
  0x30   : > { %361 = vst [vmem:[#allocation2 + $0x141] sm:$0xff] %v952_v43  ;;  %336 = vst [vmem:[#allocation2 + $0x19] sm:$0xff] %v903_v46  ;;  %v401_v14 = vmax.f32 %v372_v1, %v388_v2  ;;  %v412_v19 = vld [vmem:[#allocation2 + $0x62] ss:$2 sm:$0xff]  ;;  %v459_v51 = vld [vmem:[#allocation2 + $0x79] ss:$2 sm:$0xff] }
  0x31   : > { %337 = vst [vmem:[#allocation2 + $0x21] sm:$0xff] %v904_v47  ;;  %352 = vst [vmem:[#allocation2 + $0xd9] sm:$0xff] %v935_v48  ;;  %v374_v9 = vld [vmem:[#allocation2 + $0x90] ss:$2 sm:$0xff]  ;;  %v390_v10 = vld [vmem:[#allocation2 + $0x91] ss:$2 sm:$0xff] }
  0x32   : > { %353 = vst [vmem:[#allocation2 + $0xe1] sm:$0xff] %v936_v49  ;;  %348 = vst [vmem:[#allocation2 + $0xa9] sm:$0xff] %v927_v52  ;;  %v380_v3 = vld [vmem:[#allocation2 + $0x120] ss:$2 sm:$0xff]  ;;  %v396_v4 = vld [vmem:[#allocation2 + $0x121] ss:$2 sm:$0xff]  ;;  %v402_v25 = vmax.f32 %v374_v9, %v390_v10  ;;  %v425_v31 = vmax.f32 %v401_v14, %v412_v19 }
  0x33   : > { %349 = vst [vmem:[#allocation2 + $0xb1] sm:$0xff] %v928_v53  ;;  %364 = vst [vmem:[#allocation2 + $0x169] sm:$0xff] %v959_v54  ;;  %v376_v7 = vld [vmem:[#allocation2 + $0xc0] ss:$2 sm:$0xff]  ;;  %v392_v8 = vld [vmem:[#allocation2 + $0xc1] ss:$2 sm:$0xff]  ;;  %v405_v15 = vmax.f32 %v380_v3, %v396_v4 }
  0x34   : > { %365 = vst [vmem:[#allocation2 + $0x171] sm:$0xff] %v960_v55  ;;  %340 = vst [vmem:[#allocation2 + $0x49] sm:$0xff] %v911_v58  ;;  %v382_v11 = vld [vmem:[#allocation2 + $0x150] ss:$2 sm:$0xff]  ;;  %v398_v12 = vld [vmem:[#allocation2 + $0x151] ss:$2 sm:$0xff]  ;;  %v403_v22 = vmax.f32 %v376_v7, %v392_v8 }
  0x35   : > { %341 = vst [vmem:[#allocation2 + $0x51] sm:$0xff] %v912_v59  ;;  %356 = vst [vmem:[#allocation2 + $0x109] sm:$0xff] %v943_v60  ;;  %v370_v13 = vld [vmem:[#allocation2 + $0x30] ss:$2 sm:$0xff]  ;;  %v386_v16 = vld [vmem:[#allocation2 + $0x31] ss:$2 sm:$0xff]  ;;  %v406_v26 = vmax.f32 %v382_v11, %v398_v12 }
  0x36   : > { %357 = vst [vmem:[#allocation2 + $0x111] sm:$0xff] %v944_v61  ;;  %366 = vst [vmem:[#allocation2 + $0x181] sm:$0xff] %v963_v63  ;;  %v378_v17 = vld [vmem:[#allocation2 + $0xf0] ss:$2 sm:$0xff]  ;;  %v394_v18 = vld [vmem:[#allocation2 + $0xf1] ss:$2 sm:$0xff]  ;;  %v400_v29 = vmax.f32 %v370_v13, %v386_v16 }
  0x37   : > { %367 = vst [vmem:[#allocation2 + $0x189] sm:$0xff] %v964_v0  ;;  %v420_v20 = vld [vmem:[#allocation2 + $0x122] ss:$2 sm:$0xff]  ;;  %v414_v27 = vld [vmem:[#allocation2 + $0x92] ss:$2 sm:$0xff]  ;;  %v404_v30 = vmax.f32 %v378_v17, %v394_v18 }
  0x38   : > { %v416_v24 = vld [vmem:[#allocation2 + $0xc2] ss:$2 sm:$0xff]  ;;  %v422_v28 = vld [vmem:[#allocation2 + $0x152] ss:$2 sm:$0xff]  ;;  %v429_v32 = vmax.f32 %v405_v15, %v420_v20  ;;  %v426_v41 = vmax.f32 %v402_v25, %v414_v27  ;;  %v467_v52 = vld [vmem:[#allocation2 + $0x139] ss:$2 sm:$0xff] }
  0x39   : > { %v410_v33 = vld [vmem:[#allocation2 + $0x32] ss:$2 sm:$0xff]  ;;  %v427_v38 = vmax.f32 %v403_v22, %v416_v24  ;;  %v430_v42 = vmax.f32 %v406_v26, %v422_v28  ;;  %v455_v55 = vld [vmem:[#allocation2 + $0x19] ss:$2 sm:$0xff] }
  0x3a   : > { %v418_v34 = vld [vmem:[#allocation2 + $0xf2] ss:$2 sm:$0xff]  ;;  %v424_v45 = vmax.f32 %v400_v29, %v410_v33  ;;  %v463_v56 = vld [vmem:[#allocation2 + $0xd9] ss:$2 sm:$0xff]  ;;  %v461_v59 = vld [vmem:[#allocation2 + $0xa9] ss:$2 sm:$0xff] }
  0x3b   : > { %v435_v35 = vld [vmem:[#allocation2 + $0x78] ss:$2 sm:$0xff]  ;;  %v437_v43 = vld [vmem:[#allocation2 + $0xa8] ss:$2 sm:$0xff]  ;;  %v428_v46 = vmax.f32 %v404_v30, %v418_v34  ;;  %v469_v60 = vld [vmem:[#allocation2 + $0x169] ss:$2 sm:$0xff] }
  0x3c   : > { %v443_v36 = vld [vmem:[#allocation2 + $0x138] ss:$2 sm:$0xff]  ;;  %v445_v44 = vld [vmem:[#allocation2 + $0x168] ss:$2 sm:$0xff]  ;;  %v448_v47 = vmax.f32 %v425_v31, %v435_v35  ;;  %v449_v57 = vmax.f32 %v426_v41, %v437_v43  ;;  %v457_v1 = vld [vmem:[#allocation2 + $0x49] ss:$2 sm:$0xff] }
  0x3d   : > { %v431_v39 = vld [vmem:[#allocation2 + $0x18] ss:$2 sm:$0xff]  ;;  %v452_v48 = vmax.f32 %v429_v32, %v443_v36  ;;  %v433_v49 = vld [vmem:[#allocation2 + $0x48] ss:$2 sm:$0xff]  ;;  %v453_v58 = vmax.f32 %v430_v42, %v445_v44  ;;  %v465_v2 = vld [vmem:[#allocation2 + $0x109] ss:$2 sm:$0xff] }
  0x3e   : > { %v439_v40 = vld [vmem:[#allocation2 + $0xd8] ss:$2 sm:$0xff]  ;;  %v441_v50 = vld [vmem:[#allocation2 + $0x108] ss:$2 sm:$0xff]  ;;  %v446_v53 = vmax.f32 %v423_v37, %v431_v39  ;;  %v447_v61 = vmax.f32 %v424_v45, %v433_v49  ;;  %v472_v63 = vmax.f32 %v448_v47, %v459_v51  ;;  %v473_v9 = vmax.f32 %v449_v57, %v461_v59  ;;  %v531_v35 = vld [vmem:[#allocation2 + $0x91] ss:$2 sm:$0xff] }
  0x3f   : > { %v450_v54 = vmax.f32 %v427_v38, %v439_v40  ;;  %v451_v62 = vmax.f32 %v428_v46, %v441_v50  ;;  %v476_v0 = vmax.f32 %v452_v48, %v467_v52  ;;  %v483_v3 = vld [vmem:[#allocation2 + $0x7a] ss:$2 sm:$0xff]  ;;  %v477_v10 = vmax.f32 %v453_v58, %v469_v60  ;;  %v485_v11 = vld [vmem:[#allocation2 + $0xaa] ss:$2 sm:$0xff]  ;;  %v539_v36 = vld [vmem:[#allocation2 + $0x151] ss:$2 sm:$0xff] }
  0x40   : > { %v491_v4 = vld [vmem:[#allocation2 + $0x13a] ss:$2 sm:$0xff]  ;;  %v470_v5 = vmax.f32 %v446_v53, %v455_v55  ;;  %v493_v12 = vld [vmem:[#allocation2 + $0x16a] ss:$2 sm:$0xff]  ;;  %v471_v13 = vmax.f32 %v447_v61, %v457_v1  ;;  %v496_v15 = vmax.f32 %v472_v63, %v483_v3  ;;  %v497_v25 = vmax.f32 %v473_v9, %v485_v11  ;;  %v527_v39 = vld [vmem:[#allocation2 + $0x31] ss:$2 sm:$0xff] }
  0x41   : > { %v474_v6 = vmax.f32 %v450_v54, %v463_v56  ;;  %v479_v7 = vld [vmem:[#allocation2 + $0x1a] ss:$2 sm:$0xff]  ;;  %v475_v14 = vmax.f32 %v451_v62, %v465_v2  ;;  %v500_v16 = vmax.f32 %v476_v0, %v491_v4  ;;  %v481_v17 = vld [vmem:[#allocation2 + $0x4a] ss:$2 sm:$0xff]  ;;  %v501_v26 = vmax.f32 %v477_v10, %v493_v12  ;;  %v535_v40 = vld [vmem:[#allocation2 + $0xf1] ss:$2 sm:$0xff] }
  0x42   : > { %v487_v8 = vld [vmem:[#allocation2 + $0xda] ss:$2 sm:$0xff]  ;;  %v489_v18 = vld [vmem:[#allocation2 + $0x10a] ss:$2 sm:$0xff]  ;;  %v494_v21 = vmax.f32 %v470_v5, %v479_v7  ;;  %v495_v29 = vmax.f32 %v471_v13, %v481_v17  ;;  %v533_v43 = vld [vmem:[#allocation2 + $0xc1] ss:$2 sm:$0xff] }
  0x43   : > { %v507_v19 = vld [vmem:[#allocation2 + $0x90] ss:$2 sm:$0xff]  ;;  %v498_v22 = vmax.f32 %v474_v6, %v487_v8  ;;  %v509_v27 = vld [vmem:[#allocation2 + $0xc0] ss:$2 sm:$0xff]  ;;  %v499_v30 = vmax.f32 %v475_v14, %v489_v18  ;;  %v541_v44 = vld [vmem:[#allocation2 + $0x181] ss:$2 sm:$0xff] }
  0x44   : > { %v515_v20 = vld [vmem:[#allocation2 + $0x150] ss:$2 sm:$0xff]  ;;  %v517_v28 = vld [vmem:[#allocation2 + $0x180] ss:$2 sm:$0xff]  ;;  %v520_v31 = vmax.f32 %v496_v15, %v507_v19  ;;  %v521_v41 = vmax.f32 %v497_v25, %v509_v27  ;;  %v529_v49 = vld [vmem:[#allocation2 + $0x61] ss:$2 sm:$0xff] }
  0x45   : > { %v503_v23 = vld [vmem:[#allocation2 + $0x30] ss:$2 sm:$0xff]  ;;  %v524_v32 = vmax.f32 %v500_v16, %v515_v20  ;;  %v505_v33 = vld [vmem:[#allocation2 + $0x60] ss:$2 sm:$0xff]  ;;  %v525_v42 = vmax.f32 %v501_v26, %v517_v28  ;;  %v537_v50 = vld [vmem:[#allocation2 + $0x121] ss:$2 sm:$0xff] }
  0x46   : > { %v511_v24 = vld [vmem:[#allocation2 + $0xf0] ss:$2 sm:$0xff]  ;;  %v513_v34 = vld [vmem:[#allocation2 + $0x120] ss:$2 sm:$0xff]  ;;  %v518_v37 = vmax.f32 %v494_v21, %v503_v23  ;;  %v519_v45 = vmax.f32 %v495_v29, %v505_v33  ;;  %v544_v47 = vmax.f32 %v520_v31, %v531_v35  ;;  %v545_v57 = vmax.f32 %v521_v41, %v533_v43 }
  0x47   : > { %v522_v38 = vmax.f32 %v498_v22, %v511_v24  ;;  %v523_v46 = vmax.f32 %v499_v30, %v513_v34  ;;  %v548_v48 = vmax.f32 %v524_v32, %v539_v36  ;;  %v555_v51 = vld [vmem:[#allocation2 + $0x92] ss:$2 sm:$0xff]  ;;  %v549_v58 = vmax.f32 %v525_v42, %v541_v44  ;;  %v557_v59 = vld [vmem:[#allocation2 + $0xc2] ss:$2 sm:$0xff] }
  0x48   : > { %v563_v52 = vld [vmem:[#allocation2 + $0x152] ss:$2 sm:$0xff]  ;;  %v542_v53 = vmax.f32 %v518_v37, %v527_v39  ;;  %v565_v60 = vld [vmem:[#allocation2 + $0x182] ss:$2 sm:$0xff]  ;;  %v543_v61 = vmax.f32 %v519_v45, %v529_v49  ;;  %v568_v63 = vmax.f32 %v544_v47, %v555_v51  ;;  %v569_v5 = vmax.f32 %v545_v57, %v557_v59 }
  0x49   : > { %v546_v54 = vmax.f32 %v522_v38, %v535_v40  ;;  %v551_v55 = vld [vmem:[#allocation2 + $0x32] ss:$2 sm:$0xff]  ;;  %v547_v62 = vmax.f32 %v523_v46, %v537_v50  ;;  %v572_v0 = vmax.f32 %v548_v48, %v563_v52  ;;  %v553_v1 = vld [vmem:[#allocation2 + $0x62] ss:$2 sm:$0xff]  ;;  %v573_v6 = vmax.f32 %v549_v58, %v565_v60 }
  0x4a   : > { %v559_v56 = vld [vmem:[#allocation2 + $0xf2] ss:$2 sm:$0xff]  ;;  %v561_v2 = vld [vmem:[#allocation2 + $0x122] ss:$2 sm:$0xff]  ;;  %v566_v3 = vmax.f32 %v542_v53, %v551_v55  ;;  %v567_v10 = vmax.f32 %v543_v61, %v553_v1 }
  0x4b   : > { %v570_v4 = vmax.f32 %v546_v54, %v559_v56  ;;  %v892_v8 = vld [vmem:[%s1323_s3] ss:$0 sm:$0xff]  ;;  %v571_v11 = vmax.f32 %v547_v62, %v561_v2 }
  0xf5   : > { %v998_v7 = vpop.f32.mrb[0].mxu0 }
  0xf6   : > { %v705_v12 = vadd.f32 %v998_v7, %v568_v63  ;;  %v672_v14 = vpop.f32.mrb[1].mxu0 }
  0xf7   : > { %v1002_v9 = vpop.f32.mrb[0].mxu1  ;;  %v703_v16 = vadd.f32 %v672_v14, %v566_v3  ;;  %v999_v18 = vpop.f32.mrb[2].mxu0 }
  0xf8   : > { %v709_v13 = vadd.f32 %v1002_v9, %v572_v0  ;;  %v688_v15 = vpop.f32.mrb[1].mxu1  ;;  %v720_v20 = vadd.f32 %v892_v8, %v705_v12  ;;  %v706_v22 = vadd.f32 %v999_v18, %v569_v5  ;;  %v675_v24 = vpop.f32.mrb[3].mxu0 }
  0xf9   : > { %v707_v17 = vadd.f32 %v688_v15, %v570_v4  ;;  %v1003_v19 = vpop.f32.mrb[2].mxu1  ;;  %v718_v26 = vadd.f32 %v892_v8, %v703_v16  ;;  %v704_v28 = vadd.f32 %v675_v24, %v567_v10 }
  0xfa   : > { %v724_v21 = vadd.f32 %v892_v8, %v709_v13  ;;  %v710_v23 = vadd.f32 %v1003_v19, %v573_v6  ;;  %v691_v25 = vpop.f32.mrb[3].mxu1  ;;  %728 = vst [vmem:[%s205_s6 + $0x10] sm:$0xff] %v720_v20  ;;  %v721_v30 = vadd.f32 %v892_v8, %v706_v22 }
  0xfb   : > { %v722_v27 = vadd.f32 %v892_v8, %v707_v17  ;;  %v708_v29 = vadd.f32 %v691_v25, %v571_v11  ;;  %726 = vst [vmem:[%s205_s6] sm:$0xff] %v718_v26  ;;  %v719_v32 = vadd.f32 %v892_v8, %v704_v28 }
  0xfc   : > { %732 = vst [vmem:[%s205_s6 + $0x30] sm:$0xff] %v724_v21  ;;  %v725_v31 = vadd.f32 %v892_v8, %v710_v23  ;;  %729 = vst [vmem:[%s205_s6 + $0x18] sm:$0xff] %v721_v30 }
  0xfd   : > { %730 = vst [vmem:[%s205_s6 + $0x20] sm:$0xff] %v722_v27  ;;  %v723_v33 = vadd.f32 %v892_v8, %v708_v29  ;;  %727 = vst [vmem:[%s205_s6 + $0x8] sm:$0xff] %v719_v32 }
  0xfe   : > { %733 = vst [vmem:[%s205_s6 + $0x38] sm:$0xff] %v725_v31 }
  0xff   : > { %731 = vst [vmem:[%s205_s6 + $0x28] sm:$0xff] %v723_v33 }
 0x100   : > { %1071 = shalt.err (!%p1068_p3)
}
 0x101   : > { %s1072_s20 = scalar_lea.hbm %s1273_s9, 1024  ;;  %s1076_s27 = scalar_lea.hbm %s1324_s4, 2048 }
 0x102   : > { %p1073_p4 = scmp.ne.s32.totalorder %s1273_s9, %s1072_s20  ;;  %p1077_p9 = scmp.lt.u32.totalorder %s1273_s9, %s1324_s4 }
 0x103   : > { %p1078_p10 = scmp.lt.u32.totalorder %s1076_s27, %s1072_s20  ;;  %p1080_p12 = scmp.lt.u32.totalorder %s1072_s20, %s1273_s9 }
 0x104   : > { %p1074_p7 = pnand %p1073_p4, %p1189_p5 }
 0x105   : > { %p1079_p11 = por %p1078_p10, %p1077_p9 }
 0x106   : > { %p1075_p8 = pneg %p1074_p7 }
 0x107   : > { %p1081_p13 = por %p1080_p12, %p1079_p11 }
 0x109   : > { %p1082_p0 = pnand %p1081_p13, %p1075_p8 }
 0x10b   : > { %1085 = shalt.err (!%p1082_p0)
}
 0x10c   : > { %s1124_s30 = smov 128   ;;  %s1125_s5 = smov 8  }
 0x10d   : > { %1012 = dma.vmem_to_hbm [thread:$0]  (%p1189_p5), %s1275_s7, 1024, %s1273_s9, %s1279_s10, %s1124_s30, %s1124_s30, %s1125_s5  }
 0x10e PF: > { %p1018_p1 = scmp.ge.s32.totalorder %s1120_s18, 2  ;;  %s763_s6 = sand.u32 1, %s1108_s15  }
 0x10f   : > { %s764_s8 = scalar_lea.sflag [#allocation4], %s763_s6 }
 0x110   : > { %p1015_p2 = pnand %p1018_p1, %p1193_p6 }
 0x112   : > { %1103 = dma.done.wait (!%p1015_p2), %s764_s8, 1024  }
 0x113   : > { %1105 = vsyncadd (!%p1015_p2), %s764_s8, 4294966272  ;;  %p14_p3 = scmp.ge.s32.totalorder %s1176_s21, 4   ;;  %s1327_s15 = smov %s1112_s16 }
 0x114   : > { %s1328_s16 = smov %s1116_s17  ;;  %s1329_s17 = smov %s1187_s24 }
 0x115   : > { %s1330_s18 = smov %s1176_s21  ;;  %16 = sbr.rel (!%p14_p3) target bundleno = 3 (0x3), region = 152 }
 0x11c   :  { %769 = vsyncpa [#allocation4], 1 }
 0x11d   :  { %771 = vsyncpa [#allocation4 + $0x1], 1 }

// kernel: block_forward.4
= control target key start
LH: loop header
LB: loop body
LE: loop exit
PB: predicated region body
PF: predicated region fallthrough
CT: control target
= control target key end

     0   :  { %s2004_s15 = smov 0   ;;  %s3216_s0 = inlined_call_operand.vmem [shape: bf16[2,16,16,128], index: 0, kind: input, shape index: {}]   ;;  %s3217_s1 = inlined_call_operand.vmem [shape: f32[9,128], index: 1, kind: input, shape index: {}]   ;;  %s3218_s2 = inlined_call_operand.vmem [shape: bf16[128,128], index: 2, kind: input, shape index: {}]   ;;  %s3219_s3 = inlined_call_operand.vmem [shape: f32[1,128], index: 3, kind: input, shape index: {}]   ;;  %s3220_s4 = inlined_call_operand.vmem [shape: bf16[2,256,128], index: 4, kind: output, shape index: {}]  }
   0x1 LB: > { %s1574_s16 = sadd.s32 4294967295, %s1976_s15   ;;  %p1578_p0 = scmp.ge.s32.totalorder %s1976_s15, 1  ;;  %s1976_s15 = sphi %s2004_s15, %s14_s15  }
   0x2   : > { %p162_p1 = scmp.lt.s32.totalorder %s1976_s15, 3 }
   0x4   : > { %p163_p2 = pnand %p1578_p0, %p162_p1 }
   0x6   : > { %166 = sbr.rel (%p163_p2) target bundleno = 422 (0x1a6), region = 36 }
   0xd   : > { %v1940_v0 = vld [vmem:[%s3218_s2] sm:$0xff]   ;;  %p188_p3 = scmp.lt.s32.totalorder %s1574_s16, 1  ;;  %v2018_v1 = vld [vmem:[%s3218_s2 + $0x8] sm:$0xff]   ;;  %v1978_v2 = vmov 0.0   ;;  %v1942_v3 = vld [vmem:[%s3218_s2 + $0x10] sm:$0xff]  }
   0xe   : > { %1867 = vmatprep.subr.bf16.mxu0 %v1940_v0  ;;  %1915 = vmatprep.subr.bf16.mxu1 %v1940_v0  ;;  %295 = vst [vmem:[#allocation2] sm:$0xff] %v1978_v2  ;;  %296 = vst [vmem:[#allocation2 + $0x8] sm:$0xff] %v1978_v2  ;;  %v1943_v4 = vld [vmem:[%s3218_s2 + $0x18] sm:$0xff]   ;;  %v2045_v11 = vld [vmem:[%s3217_s1] ss:$0 sm:$0xff] }
   0xf   : > { %s3304_s16 = smov (!%p188_p3, %s1574_s16), 1  ;;  %297 = vst [vmem:[#allocation2 + $0x10] sm:$0x3] %v1978_v2  ;;  %298 = vst [vmem:[#allocation2 + $0x18] sm:$0xff] %v1978_v2  ;;  %1868 = vmatpush3.bf16.msra.mxu0 %v1940_v0  ;;  %1923 = vmatpush3.bf16.msra.mxu1 %v1940_v0  ;;  %v1944_v13 = vld [vmem:[%s3218_s2 + $0x20] sm:$0xff]   ;;  %v2061_v21 = vmul.f32 0.0, %v2045_v11 }
  0x10   : > { %299 = vst [vmem:[#allocation2 + $0x20] sm:$0xff] %v1978_v2  ;;  %300 = vst [vmem:[#allocation2 + $0x28] sm:$0x3] %v1978_v2  ;;  %1869 = vmatprep.subr.bf16.mxu0 %v2018_v1  ;;  %1916 = vmatprep.subr.bf16.mxu1 %v2018_v1  ;;  %s1635_s23 = sshll.u32 %s3304_s16, 7  ;;  %v2053_v15 = vld [vmem:[%s3217_s1 + $0x1] ss:$0 sm:$0xff] }
  0x11   : > { %301 = vst [vmem:[#allocation2 + $0x30] sm:$0xff] %v1978_v2  ;;  %302 = vst [vmem:[#allocation2 + $0x38] sm:$0xff] %v1978_v2  ;;  %s2033_s26 = scalar_lea.vmem %s3216_s0, %s1635_s23  ;;  %v2058_v20 = vld [vmem:[%s3217_s1 + $0x4] ss:$0 sm:$0xff]  ;;  %v2072_v24 = vld [vmem:[%s3217_s1 + $0x7] ss:$0 sm:$0xff]  ;;  %s3166_s6 = scalar_lea.vmem %s3220_s4, %s1635_s23 }
  0x12   : > { %303 = vst [vmem:[#allocation2 + $0x40] sm:$0x3] %v1978_v2  ;;  %304 = vst [vmem:[#allocation2 + $0x48] sm:$0xff] %v1978_v2  ;;  %v1670_v5 = vld [vmem:[%s2033_s26] sm:$0xff]   ;;  %v1813_v6 = vld [vmem:[%s2033_s26 + $0x8] sm:$0xff]  }
  0x13   : > { %305 = vst [vmem:[#allocation2 + $0x50] sm:$0xff] %v1978_v2  ;;  %306 = vst [vmem:[#allocation2 + $0x58] sm:$0x3] %v1978_v2  ;;  %1870 = vmatpush3.bf16.msra.mxu0 %v2018_v1  ;;  %1924 = vmatpush3.bf16.msra.mxu1 %v2018_v1  ;;  %v1671_v7 = vunpack.c.l.bf16 %v1670_v5  ;;  %v1672_v8 = vunpack.c.h.bf16 %v1670_v5  ;;  %v1675_v9 = vunpack.c.l.bf16 %v1813_v6  ;;  %v1676_v10 = vunpack.c.h.bf16 %v1813_v6  ;;  %v2077_v26 = vld [vmem:[%s3217_s1 + $0x2] ss:$0 sm:$0xff]  ;;  %v1819_v32 = vld [vmem:[%s2033_s26 + $0x38] sm:$0xff]  }
  0x14   : > { %307 = vst [vmem:[#allocation2 + $0x60] sm:$0xff] %v1978_v2  ;;  %308 = vst [vmem:[#allocation2 + $0x68] sm:$0xff] %v1978_v2  ;;  %1871 = vmatprep.subr.bf16.mxu0 %v1942_v3  ;;  %1917 = vmatprep.subr.bf16.mxu1 %v1942_v3  ;;  %v1820_v37 = vld [vmem:[%s2033_s26 + $0x40] sm:$0xff]   ;;  %v1821_v38 = vld [vmem:[%s2033_s26 + $0x48] sm:$0xff]   ;;  %v1699_v43 = vunpack.c.l.bf16 %v1819_v32  ;;  %v1700_v46 = vunpack.c.h.bf16 %v1819_v32 }
  0x15   : > { %309 = vst [vmem:[#allocation2 + $0x70] sm:$0x3] %v1978_v2  ;;  %310 = vst [vmem:[#allocation2 + $0x78] sm:$0xff] %v1978_v2  ;;  %v625_v12 = vld [vmem:[#allocation2 + $0x1] sm:$0xff]  ;;  %v263_v16 = vmax.f32 %v1671_v7, 0.0  ;;  %v264_v17 = vmax.f32 %v1672_v8, 0.0  ;;  %v1703_v47 = vunpack.c.l.bf16 %v1820_v37  ;;  %v1704_v48 = vunpack.c.h.bf16 %v1820_v37 }
  0x16   : > { %311 = vst [vmem:[#allocation2 + $0x80] sm:$0xff] %v1978_v2  ;;  %312 = vst [vmem:[#allocation2 + $0x88] sm:$0x3] %v1978_v2  ;;  %v626_v14 = vld [vmem:[#allocation2 + $0x9] sm:$0xff]  ;;  %v265_v18 = vmax.f32 %v1675_v9, 0.0  ;;  %v266_v19 = vmax.f32 %v1676_v10, 0.0  ;;  %v2064_v22 = vmul.f32 %v2053_v15, %v625_v12  ;;  %v1707_v49 = vunpack.c.l.bf16 %v1821_v38 }
  0x17   : > { %313 = vst [vmem:[#allocation2 + $0x90] sm:$0xff] %v1978_v2  ;;  %314 = vst [vmem:[#allocation2 + $0x98] sm:$0xff] %v1978_v2  ;;  %1872 = vmatpush3.bf16.msra.mxu0 %v1942_v3  ;;  %1925 = vmatpush3.bf16.msra.mxu1 %v1942_v3  ;;  %v2067_v23 = vmul.f32 %v2053_v15, %v626_v14  ;;  %v868_v25 = vld [vmem:[#allocation2 + $0x2] sm:$0xff]  ;;  %v2080_v27 = vmul.f32 %v2053_v15, %v263_v16  ;;  %v869_v31 = vld [vmem:[#allocation2 + $0xa] sm:$0xff]  ;;  %v1708_v50 = vunpack.c.h.bf16 %v1821_v38 }
  0x18   : > { %315 = vst [vmem:[#allocation2 + $0xa0] sm:$0x3] %v1978_v2  ;;  %316 = vst [vmem:[#allocation2 + $0xa8] sm:$0xff] %v1978_v2  ;;  %1873 = vmatprep.subr.bf16.mxu0 %v1943_v4  ;;  %1918 = vmatprep.subr.bf16.mxu1 %v1943_v4  ;;  %v2083_v28 = vmul.f32 %v2053_v15, %v264_v17  ;;  %v2086_v29 = vmul.f32 %v2053_v15, %v265_v18  ;;  %v1814_v39 = vld [vmem:[%s2033_s26 + $0x10] sm:$0xff]   ;;  %v1945_v44 = vld [vmem:[%s3218_s2 + $0x28] sm:$0xff]   ;;  %v277_v51 = vmax.f32 %v1699_v43, 0.0 }
  0x19   : > { %317 = vst [vmem:[#allocation2 + $0xb0] sm:$0xff] %v1978_v2  ;;  %318 = vst [vmem:[#allocation2 + $0xb8] sm:$0x3] %v1978_v2  ;;  %v2089_v30 = vmul.f32 %v2053_v15, %v266_v19  ;;  %v2093_v33 = vmul.f32 %v2058_v20, %v263_v16  ;;  %v2096_v34 = vmul.f32 %v2058_v20, %v264_v17  ;;  %v1679_v52 = vunpack.c.l.bf16 %v1814_v39  ;;  %v2125_v53 = vld [vmem:[%s3218_s2 + $0x30] sm:$0xff]   ;;  %v2130_v54 = vld [vmem:[%s3217_s1 + $0x3] ss:$0 sm:$0xff] }
  0x1a   : > { %319 = vst [vmem:[#allocation2 + $0xc0] sm:$0xff] %v1978_v2  ;;  %320 = vst [vmem:[#allocation2 + $0xc8] sm:$0xff] %v1978_v2  ;;  %v2099_v35 = vmul.f32 %v2058_v20, %v265_v18  ;;  %v2102_v36 = vmul.f32 %v2058_v20, %v266_v19  ;;  %v2108_v40 = vmul.f32 %v2072_v24, %v265_v18  ;;  %v278_v55 = vmax.f32 %v1700_v46, 0.0  ;;  %v2139_v59 = vld [vmem:[%s3217_s1 + $0x6] ss:$0 sm:$0xff]  ;;  %v2151_v0 = vld [vmem:[%s2033_s26 + $0x50] sm:$0xff]  }
  0x1b   : > { %321 = vst [vmem:[#allocation2 + $0xd0] sm:$0x3] %v1978_v2  ;;  %322 = vst [vmem:[#allocation2 + $0xd8] sm:$0xff] %v1978_v2  ;;  %1874 = vmatpush3.bf16.msra.mxu0 %v1943_v4  ;;  %1926 = vmatpush3.bf16.msra.mxu1 %v1943_v4  ;;  %v2111_v41 = vmul.f32 %v2072_v24, %v266_v19  ;;  %v2114_v42 = vmul.f32 %v2077_v26, %v868_v25  ;;  %v2132_v56 = vmax.f32 %v1703_v47, 0.0  ;;  %v1947_v47 = vld [vmem:[%s3218_s2 + $0x38] sm:$0xff]  }
  0x1c   : > { %323 = vst [vmem:[#allocation2 + $0xe0] sm:$0xff] %v1978_v2  ;;  %324 = vst [vmem:[#allocation2 + $0xe8] sm:$0x3] %v1978_v2  ;;  %1875 = vmatprep.subr.bf16.mxu0 %v1944_v13  ;;  %1919 = vmatprep.subr.bf16.mxu1 %v1944_v13  ;;  %v2120_v45 = vmul.f32 %v2077_v26, %v869_v31  ;;  %v2134_v57 = vmax.f32 %v1704_v48, 0.0  ;;  %v1680_v58 = vunpack.c.h.bf16 %v1814_v39  ;;  %v2141_v60 = vmax.f32 %v1707_v49, 0.0 }
  0x1d   : > { %325 = vst [vmem:[#allocation2 + $0xf0] sm:$0xff] %v1978_v2  ;;  %326 = vst [vmem:[#allocation2 + $0xf8] sm:$0xff] %v1978_v2  ;;  %v2143_v61 = vmax.f32 %v1708_v50, 0.0  ;;  %v2146_v62 = vmul.f32 %v2053_v15, %v277_v51  ;;  %v2148_v63 = vmax.f32 %v1679_v52, 0.0  ;;  %v2156_v4 = vmul.f32 %v2053_v15, %v278_v55  ;;  %v2194_v31 = vld [vmem:[%s3217_s1 + $0x5] ss:$0 sm:$0xff] }
  0x1e   : > { %327 = vst [vmem:[#allocation2 + $0x100] sm:$0x3] %v1978_v2  ;;  %328 = vst [vmem:[#allocation2 + $0x108] sm:$0xff] %v1978_v2  ;;  %v2160_v5 = vmul.f32 %v2053_v15, %v2132_v56  ;;  %v2164_v6 = vmul.f32 %v2053_v15, %v2134_v57  ;;  %v2166_v7 = vmax.f32 %v1680_v58, 0.0  ;;  %v1711_v46 = vunpack.c.l.bf16 %v2151_v0  ;;  %v2216_v50 = vld [vmem:[%s3217_s1 + $0x8] ss:$0 sm:$0xff] }
  0x1f   : > { %329 = vst [vmem:[#allocation2 + $0x110] sm:$0xff] %v1978_v2  ;;  %330 = vst [vmem:[#allocation2 + $0x118] sm:$0x3] %v1978_v2  ;;  %1876 = vmatpush3.bf16.msra.mxu0 %v1944_v13  ;;  %1927 = vmatpush3.bf16.msra.mxu1 %v1944_v13 }
  0x20   : > { %331 = vst [vmem:[#allocation2 + $0x120] sm:$0xff] %v1978_v2  ;;  %332 = vst [vmem:[#allocation2 + $0x128] sm:$0xff] %v1978_v2  ;;  %1877 = vmatprep.subr.bf16.mxu0 %v1945_v44  ;;  %1920 = vmatprep.subr.bf16.mxu1 %v1945_v44 }
  0x21   : > { %333 = vst [vmem:[#allocation2 + $0x130] sm:$0x3] %v1978_v2  ;;  %334 = vst [vmem:[#allocation2 + $0x138] sm:$0xff] %v1978_v2 }
  0x22   : > { %335 = vst [vmem:[#allocation2 + $0x140] sm:$0xff] %v1978_v2  ;;  %336 = vst [vmem:[#allocation2 + $0x148] sm:$0x3] %v1978_v2 }
  0x23   : > { %337 = vst [vmem:[#allocation2 + $0x150] sm:$0xff] %v1978_v2  ;;  %338 = vst [vmem:[#allocation2 + $0x158] sm:$0xff] %v1978_v2  ;;  %1878 = vmatpush3.bf16.msra.mxu0 %v1945_v44  ;;  %1928 = vmatpush3.bf16.msra.mxu1 %v1945_v44 }
  0x24   : > { %339 = vst [vmem:[#allocation2 + $0x160] sm:$0x3] %v1978_v2  ;;  %340 = vst [vmem:[#allocation2 + $0x168] sm:$0xff] %v1978_v2  ;;  %1879 = vmatprep.subr.bf16.mxu0 %v2125_v53  ;;  %1921 = vmatprep.subr.bf16.mxu1 %v2125_v53 }
  0x25   : > { %341 = vst [vmem:[#allocation2 + $0x170] sm:$0xff] %v1978_v2  ;;  %342 = vst [vmem:[#allocation2 + $0x178] sm:$0x3] %v1978_v2 }
  0x26   : > { %343 = vst [vmem:[#allocation2 + $0x180] sm:$0xff] %v1978_v2  ;;  %344 = vst [vmem:[#allocation2 + $0x188] sm:$0xff] %v1978_v2 }
  0x27   : > { %345 = vst [vmem:[#allocation2 + $0x190] sm:$0x3] %v1978_v2  ;;  %346 = vst [vmem:[#allocation2 + $0x198] sm:$0xff] %v1978_v2  ;;  %1880 = vmatpush3.bf16.msra.mxu0 %v2125_v53  ;;  %1929 = vmatpush3.bf16.msra.mxu1 %v2125_v53 }
  0x28   : > { %347 = vst [vmem:[#allocation2 + $0x1a0] sm:$0xff] %v1978_v2  ;;  %348 = vst [vmem:[#allocation2 + $0x1a8] sm:$0x3] %v1978_v2  ;;  %1881 = vmatprep.subr.bf16.mxu0 %v1947_v47  ;;  %1922 = vmatprep.subr.bf16.mxu1 %v1947_v47 }
  0x29   : > { %350 = vst [vmem:[#allocation2 + $0x19] sm:$0xff] %v263_v16  ;;  %351 = vst [vmem:[#allocation2 + $0x21] sm:$0xff] %v264_v17 }
  0x2a   : > { %352 = vst [vmem:[#allocation2 + $0x31] sm:$0xff] %v265_v18  ;;  %353 = vst [vmem:[#allocation2 + $0x39] sm:$0xff] %v266_v19 }
  0x2b   : > { %3244 = vst [vmem:[#allocation3_spill] sm:$0xff] %v2086_v29  ;;  %3245 = vst [vmem:[#allocation4_spill] sm:$0xff] %v2089_v30  ;;  %1882 = vmatpush3.bf16.msra.mxu0 %v1947_v47  ;;  %1930 = vmatpush3.bf16.msra.mxu1 %v1947_v47  ;;  %v751_v47 = vmul.f32 %v2058_v20, %v2132_v56 }
  0x2c   : > { %364 = vst [vmem:[#allocation2 + $0xc1] sm:$0xff] %v277_v51  ;;  %365 = vst [vmem:[#allocation2 + $0xc9] sm:$0xff] %v278_v55  ;;  %v1712_v51 = vunpack.c.h.bf16 %v2151_v0 }
  0x2d   : > { %366 = vst [vmem:[#allocation2 + $0xd9] sm:$0xff] %v2132_v56  ;;  %367 = vst [vmem:[#allocation2 + $0xe1] sm:$0xff] %v2134_v57  ;;  %v2308_v56 = vmul.f32 %v2058_v20, %v2143_v61 }
  0x2e   : > { %368 = vst [vmem:[#allocation2 + $0xf1] sm:$0xff] %v2141_v60  ;;  %369 = vst [vmem:[#allocation2 + $0xf9] sm:$0xff] %v2143_v61 }
  0x2f   : > { %354 = vst [vmem:[#allocation2 + $0x49] sm:$0xff] %v2148_v63  ;;  %355 = vst [vmem:[#allocation2 + $0x51] sm:$0xff] %v2166_v7 }
  0x30   : > { %v384_v1 = vld [vmem:[#allocation2 + $0x18] sm:$0xff]  ;;  %v385_v2 = vld [vmem:[#allocation2 + $0x20] sm:$0xff] }
  0x31   : > { %v386_v3 = vld [vmem:[#allocation2 + $0x30] sm:$0xff]  ;;  %v387_v8 = vld [vmem:[#allocation2 + $0x38] sm:$0xff]  ;;  %v2169_v9 = vmul.f32 %v2045_v11, %v384_v1  ;;  %v2172_v10 = vmul.f32 %v2045_v11, %v385_v2  ;;  %v492_v13 = vmul.f32 %v2130_v54, %v384_v1  ;;  %v871_v16 = vld [vmem:[#allocation2 + $0x22] sm:$0xff]  ;;  %v493_v18 = vmul.f32 %v2130_v54, %v385_v2 }
  0x32   : > { %v2175_v12 = vmul.f32 %v2045_v11, %v386_v3  ;;  %v870_v14 = vld [vmem:[#allocation2 + $0x1a] sm:$0xff]  ;;  %v2182_v17 = vmul.f32 %v2045_v11, %v387_v8  ;;  %v2186_v19 = vmul.f32 %v2130_v54, %v386_v3  ;;  %v2189_v25 = vmul.f32 %v2130_v54, %v387_v8  ;;  %v872_v39 = vld [vmem:[#allocation2 + $0x32] sm:$0xff] }
  0x33   : > { %v524_v32 = vadd.f32 %v492_v13, %v2061_v21  ;;  %v561_v37 = vmul.f32 %v2139_v59, %v386_v3  ;;  %v562_v38 = vmul.f32 %v2139_v59, %v387_v8  ;;  %v873_v43 = vld [vmem:[#allocation2 + $0x3a] sm:$0xff]  ;;  %v525_v44 = vadd.f32 %v493_v18, %v2061_v21 }
  0x34   : > { %3246 = vst [vmem:[#allocation5_spill] sm:$0xff] %v2182_v17  ;;  %v2208_v48 = vmul.f32 %v2077_v26, %v870_v14  ;;  %v2211_v49 = vmul.f32 %v2077_v26, %v871_v16  ;;  %v2220_v55 = vmul.f32 %v2077_v26, %v872_v39  ;;  %v2223_v58 = vmul.f32 %v2077_v26, %v873_v43  ;;  %v2233_v13 = vld [vmem:[#allocation2 + $0xc0] sm:$0xff] }
  0x35   : > { %v593_v52 = vadd.f32 %v561_v37, %v524_v32  ;;  %v978_v21 = vmul.f32 %v2194_v31, %v870_v14  ;;  %v594_v1 = vadd.f32 %v562_v38, %v525_v44  ;;  %v979_v2 = vmul.f32 %v2194_v31, %v871_v16  ;;  %3251 = vst [vmem:[#allocation10_spill] sm:$0xff] %v2233_v13  ;;  %v2240_v16 = vld [vmem:[#allocation2 + $0xc8] sm:$0xff]  ;;  %v2242_v32 = vld [vmem:[#allocation2 + $0xd8] sm:$0xff]  ;;  %v2244_v37 = vld [vmem:[#allocation2 + $0xe0] sm:$0xff] }
  0x36   : > { %3247 = vst [vmem:[#allocation6_spill] sm:$0xff] %v2220_v55  ;;  %3248 = vst [vmem:[#allocation7_spill] sm:$0xff] %v2223_v58  ;;  %v2228_v3 = vmul.f32 %v2194_v31, %v872_v39  ;;  %v2231_v8 = vmul.f32 %v2194_v31, %v873_v43  ;;  %v1047_v14 = vmul.f32 %v2216_v50, %v872_v39  ;;  %v2246_v38 = vmax.f32 %v1711_v46, 0.0  ;;  %v402_v53 = vld [vmem:[#allocation2 + $0xf0] sm:$0xff]  ;;  %v403_v58 = vld [vmem:[#allocation2 + $0xf8] sm:$0xff] }
  0x37   : > { %v698_v0 = vadd.f32 %v2064_v22, %v593_v52  ;;  %v1048_v18 = vmul.f32 %v2216_v50, %v873_v43  ;;  %3252 = vst [vmem:[#allocation11_spill] sm:$0xff] %v2240_v16  ;;  %v699_v44 = vadd.f32 %v2067_v23, %v594_v1  ;;  %v439_v22 = vmul.f32 %v2045_v11, %v2233_v13  ;;  %v2256_v52 = vld [vmem:[%s2033_s26 + $0x18] sm:$0xff]  }
  0x38   : > { %3249 = vst [vmem:[#allocation8_spill] sm:$0xff] %v2228_v3  ;;  %3250 = vst [vmem:[#allocation9_spill] sm:$0xff] %v2231_v8  ;;  %v440_v39 = vmul.f32 %v2045_v11, %v2240_v16  ;;  %v2253_v43 = vmax.f32 %v1712_v51, 0.0  ;;  %v2260_v46 = vmul.f32 %v2045_v11, %v402_v53  ;;  %v2263_v30 = vmul.f32 %v2045_v11, %v403_v58 }
  0x39   : > { %v767_v55 = vadd.f32 %v2093_v33, %v698_v0  ;;  %v508_v23 = vmul.f32 %v2130_v54, %v2242_v32  ;;  %370 = vst [vmem:[#allocation2 + $0x109] sm:$0xff] %v2246_v38  ;;  %v768_v1 = vadd.f32 %v2096_v34, %v699_v44  ;;  %v509_v51 = vmul.f32 %v2130_v54, %v2244_v37  ;;  %v2349_v34 = vld [vmem:[#allocation2 + $0x52] sm:$0xff] }
  0x3a   : > { %3253 = vst [vmem:[#allocation12_spill] sm:$0xff] %v2260_v46  ;;  %3254 = vst [vmem:[#allocation13_spill] sm:$0xff] %v2263_v30  ;;  %v2272_v16 = vmul.f32 %v2130_v54, %v402_v53  ;;  %v2275_v33 = vmul.f32 %v2130_v54, %v403_v58  ;;  %v577_v29 = vmul.f32 %v2139_v59, %v402_v53 }
  0x3b   : > { %371 = vst [vmem:[#allocation2 + $0x111] sm:$0xff] %v2253_v43  ;;  %v836_v0 = vadd.f32 %v2108_v40, %v767_v55  ;;  %v540_v13 = vadd.f32 %v508_v23, %v439_v22  ;;  %v837_v44 = vadd.f32 %v2111_v41, %v768_v1  ;;  %v541_v30 = vadd.f32 %v509_v51, %v440_v39  ;;  %v2294_v55 = vld [vmem:[#allocation2 + $0xc2] sm:$0xff] }
  0x3c   : > { %v578_v46 = vmul.f32 %v2139_v59, %v403_v58  ;;  %v2285_v8 = vmul.f32 %v2053_v15, %v2141_v60  ;;  %v2290_v40 = vmul.f32 %v2053_v15, %v2143_v61  ;;  %3255 = vst [vmem:[#allocation14_spill] sm:$0xff] %v2294_v55  ;;  %v752_v58 = vmul.f32 %v2058_v20, %v2134_v57 }
  0x3d   : > { %v941_v3 = vadd.f32 %v2114_v42, %v836_v0  ;;  %v609_v17 = vadd.f32 %v577_v29, %v540_v13  ;;  %v942_v41 = vadd.f32 %v2120_v45, %v837_v44  ;;  %v2301_v22 = vmul.f32 %v2058_v20, %v2141_v60  ;;  %v2303_v29 = vld [vmem:[#allocation2 + $0xca] sm:$0xff]  ;;  %v886_v42 = vld [vmem:[#allocation2 + $0xda] sm:$0xff]  ;;  %v887_v45 = vld [vmem:[#allocation2 + $0xe2] sm:$0xff] }
  0x3e   : > { %v610_v53 = vadd.f32 %v578_v46, %v541_v30  ;;  %3256 = vst [vmem:[#allocation15_spill] sm:$0xff] %v2303_v29  ;;  %v820_v30 = vmul.f32 %v2072_v24, %v2141_v60  ;;  %v821_v23 = vmul.f32 %v2072_v24, %v2143_v61  ;;  %v925_v1 = vmul.f32 %v2077_v26, %v2294_v55 }
  0x3f   : > { %v1010_v13 = vadd.f32 %v978_v21, %v941_v3  ;;  %v714_v39 = vadd.f32 %v2146_v62, %v609_v17  ;;  %v1011_v46 = vadd.f32 %v979_v2, %v942_v41  ;;  %v888_v62 = vld [vmem:[#allocation2 + $0xf2] sm:$0xff]  ;;  %v889_v17 = vld [vmem:[#allocation2 + $0xfa] sm:$0xff]  ;;  %v926_v51 = vmul.f32 %v2077_v26, %v2303_v29 }
  0x40   : > { %v715_v57 = vadd.f32 %v2156_v4, %v610_v53  ;;  %v2320_v0 = vmul.f32 %v2077_v26, %v886_v42  ;;  %v2323_v4 = vmul.f32 %v2077_v26, %v887_v45  ;;  %v2326_v61 = vmul.f32 %v2077_v26, %v888_v62  ;;  %v2333_v53 = vld [vmem:[#allocation2 + $0x48] sm:$0xff] }
  0x41   : > { %v1079_v21 = vadd.f32 %v1047_v14, %v1010_v13  ;;  %v783_v3 = vadd.f32 %v751_v47, %v714_v39  ;;  %v1080_v60 = vadd.f32 %v1048_v18, %v1011_v46  ;;  %v2329_v14 = vmul.f32 %v2077_v26, %v889_v17  ;;  %v2335_v13 = vld [vmem:[#allocation2 + $0x50] sm:$0xff] }
  0x42   : > { %v784_v2 = vadd.f32 %v752_v58, %v715_v57  ;;  %v994_v47 = vmul.f32 %v2194_v31, %v886_v42  ;;  %v995_v41 = vmul.f32 %v2194_v31, %v887_v45  ;;  %v2338_v39 = vmul.f32 %v2194_v31, %v888_v62  ;;  %v2375_v55 = vld [vmem:[#allocation2 + $0x10a] sm:$0xff] }
  0x43   : > { %v852_v44 = vadd.f32 %v820_v30, %v783_v3  ;;  %3257 = vst [vmem:[#allocation16_spill] sm:$0xff] %v2329_v14  ;;  %v1111_v18 = vpack.c.bf16 %v1080_v60, %v1079_v21  ;;  %v2341_v46 = vmul.f32 %v2194_v31, %v889_v17  ;;  %v2343_v30 = vld [vmem:[#allocation2 + $0x4a] sm:$0xff]  ;;  %v1063_v3 = vmul.f32 %v2216_v50, %v888_v62 }
  0x44   : > { %v853_v58 = vadd.f32 %v821_v23, %v784_v2  ;;  %v1064_v42 = vmul.f32 %v2216_v50, %v889_v17  ;;  %v526_v45 = vadd.f32 %v2186_v19, %v2169_v9  ;;  %v527_v21 = vadd.f32 %v2189_v25, %v2172_v10  ;;  %v2357_v2 = vld [vmem:[#allocation2 + $0x108] sm:$0xff]  ;;  %3258 = vst [vmem:[#allocation17_spill] sm:$0xff] %v2375_v55 }
  0x45   : > { %v957_v57 = vadd.f32 %v925_v1, %v852_v44  ;;  %1883 = vmatprep.mubr.bf16.mxu0 %v1111_v18  ;;  %v563_v60 = vmul.f32 %v2139_v59, %v2333_v53  ;;  %v564_v1 = vmul.f32 %v2139_v59, %v2335_v13  ;;  %v806_v17 = vmul.f32 %v2072_v24, %v2148_v63 }
  0x46   : > { %v958_v23 = vadd.f32 %v926_v51, %v853_v58  ;;  %v807_v9 = vmul.f32 %v2072_v24, %v2166_v7  ;;  %v1049_v19 = vmul.f32 %v2216_v50, %v2343_v30  ;;  %v2365_v51 = vld [vmem:[#allocation2 + $0x110] sm:$0xff]  ;;  %v1050_v18 = vmul.f32 %v2216_v50, %v2349_v34 }
  0x47   : > { %v1026_v62 = vadd.f32 %v994_v47, %v957_v57  ;;  %v595_v25 = vadd.f32 %v563_v60, %v526_v45  ;;  %v596_v44 = vadd.f32 %v564_v1, %v527_v21  ;;  %v441_v47 = vmul.f32 %v2045_v11, %v2242_v32 }
  0x48   : > { %v1027_v10 = vadd.f32 %v995_v41, %v958_v23  ;;  %v442_v57 = vmul.f32 %v2045_v11, %v2244_v37  ;;  %v579_v29 = vmul.f32 %v2139_v59, %v2357_v2  ;;  %v580_v23 = vmul.f32 %v2139_v59, %v2365_v51 }
  0x49   : > { %v1095_v58 = vadd.f32 %v1063_v3, %v1026_v62  ;;  %v700_v41 = vadd.f32 %v2080_v27, %v595_v25  ;;  %v701_v45 = vadd.f32 %v2083_v28, %v596_v44  ;;  %v2381_v3 = vld [vmem:[#allocation2 + $0x112] sm:$0xff]  ;;  %v542_v32 = vadd.f32 %v2272_v16, %v441_v47 }
  0x4a   : > { %v1096_v14 = vadd.f32 %v1064_v42, %v1027_v10  ;;  %3259 = vst [vmem:[#allocation18_spill] sm:$0xff] %v2381_v3  ;;  %v543_v21 = vadd.f32 %v2275_v33, %v442_v57  ;;  %v822_v37 = vmul.f32 %v2072_v24, %v2246_v38  ;;  %v823_v60 = vmul.f32 %v2072_v24, %v2253_v43 }
  0x4b   : > { %v769_v27 = vadd.f32 %v2099_v35, %v700_v41  ;;  %v770_v28 = vadd.f32 %v2102_v36, %v701_v45  ;;  %v1065_v1 = vmul.f32 %v2216_v50, %v2375_v55  ;;  %v611_v62 = vadd.f32 %v579_v29, %v542_v32  ;;  %v3263_v45 = vld [vmem:[#allocation5_spill] sm:$0xff]  ;;  %v3264_v32 = vld [vmem:[#allocation8_spill] sm:$0xff] }
  0x4c   : > { %v1119_v42 = vpack.c.bf16 %v1096_v14, %v1095_v58  ;;  %v612_v10 = vadd.f32 %v580_v23, %v543_v21  ;;  %v1066_v16 = vmul.f32 %v2216_v50, %v2381_v3  ;;  %v1684_v33 = vunpack.c.h.bf16 %v2256_v52 }
  0x4d   : > { %v838_v25 = vadd.f32 %v806_v17, %v769_v27  ;;  %v839_v44 = vadd.f32 %v807_v9, %v770_v28  ;;  %v3260_v47 = vunpack.c.l.bf16 %v2256_v52  ;;  %v496_v35 = vmul.f32 %v2130_v54, %v2333_v53 }
  0x4e   : > { %1899 = vmatprep.mubr.bf16.mxu1 %v1119_v42  ;;  %v716_v36 = vadd.f32 %v2160_v5, %v611_v62  ;;  %v717_v29 = vadd.f32 %v2164_v6, %v612_v10  ;;  %v2404_v58 = vmax.f32 %v1684_v33, 0.0  ;;  %v497_v57 = vmul.f32 %v2130_v54, %v2335_v13 }
  0x4f   : > { %v2398_v14 = vmax.f32 %v3260_v47, 0.0  ;;  %v943_v17 = vadd.f32 %v2208_v48, %v838_v25  ;;  %v944_v9 = vadd.f32 %v2211_v49, %v839_v44  ;;  %v528_v52 = vadd.f32 %v496_v35, %v2175_v12  ;;  %v1823_v49 = vld [vmem:[%s2033_s26 + $0x58] sm:$0xff]   ;;  %v3265_v12 = vld [vmem:[#allocation9_spill] sm:$0xff] }
  0x50   : > { %3262 = vst [vmem:[#allocation20_spill] sm:$0xff] %v2404_v58  ;;  %v2414_v41 = vmul.f32 %v2058_v20, %v2148_v63  ;;  %v785_v5 = vadd.f32 %v2301_v22, %v716_v36  ;;  %v786_v6 = vadd.f32 %v2308_v56, %v717_v29  ;;  %357 = vst [vmem:[#allocation2 + $0x69] sm:$0xff] %v2404_v58  ;;  %v1715_v44 = vunpack.c.l.bf16 %v1823_v49 }
  0x51   : > { %3261 = vst [vmem:[#allocation19_spill] sm:$0xff] %v2398_v14  ;;  %356 = vst [vmem:[#allocation2 + $0x61] sm:$0xff] %v2398_v14  ;;  %v529_v23 = vadd.f32 %v497_v57, %v3263_v45  ;;  %v2422_v48 = vmul.f32 %v2058_v20, %v2166_v7  ;;  %v1012_v21 = vadd.f32 %v3264_v32, %v943_v17  ;;  %v1716_v47 = vunpack.c.h.bf16 %v1823_v49  ;;  %v1816_v49 = vld [vmem:[%s2033_s26 + $0x20] sm:$0xff]  }
  0x52   : > { %v1013_v42 = vadd.f32 %v3265_v12, %v944_v9  ;;  %v2429_v27 = vmul.f32 %v2072_v24, %v2398_v14  ;;  %v2433_v22 = vmul.f32 %v2072_v24, %v2404_v58  ;;  %v854_v56 = vadd.f32 %v822_v37, %v785_v5  ;;  %v3266_v9 = vld [vmem:[#allocation12_spill] sm:$0xff] }
  0x53   : > { %v855_v28 = vadd.f32 %v823_v60, %v786_v6  ;;  %v2437_v62 = vmul.f32 %v2194_v31, %v2343_v30  ;;  %v2441_v10 = vmul.f32 %v2194_v31, %v2349_v34  ;;  %v1081_v33 = vadd.f32 %v1049_v19, %v1012_v21  ;;  %v3267_v6 = vld [vmem:[#allocation13_spill] sm:$0xff] }
  0x54   : > { %v1082_v25 = vadd.f32 %v1050_v18, %v1013_v42  ;;  %v959_v35 = vadd.f32 %v2320_v0, %v854_v56  ;;  %v512_v37 = vmul.f32 %v2130_v54, %v2357_v2  ;;  %v513_v60 = vmul.f32 %v2130_v54, %v2365_v51 }
  0x55   : > { %v960_v36 = vadd.f32 %v2323_v4, %v855_v28  ;;  %v2449_v57 = vmax.f32 %v1715_v44, 0.0  ;;  %v2451_v17 = vmax.f32 %v1716_v47, 0.0  ;;  %v2455_v19 = vmul.f32 %v2058_v20, %v2246_v38 }
  0x56   : > { %v1112_v29 = vpack.c.bf16 %v1082_v25, %v1081_v33  ;;  %v1028_v18 = vadd.f32 %v2338_v39, %v959_v35  ;;  %v544_v5 = vadd.f32 %v512_v37, %v3266_v9  ;;  %v545_v45 = vadd.f32 %v513_v60, %v3267_v6 }
  0x57   : > { %v1029_v0 = vadd.f32 %v2341_v46, %v960_v36  ;;  %v2470_v42 = vld [vmem:[#allocation2 + $0x6a] sm:$0xff]  ;;  %372 = vst [vmem:[#allocation2 + $0x121] sm:$0xff] %v2449_v57  ;;  %373 = vst [vmem:[#allocation2 + $0x129] sm:$0xff] %v2451_v17  ;;  %v2476_v39 = vmul.f32 %v2058_v20, %v2253_v43  ;;  %v2480_v46 = vmul.f32 %v2072_v24, %v2449_v57  ;;  %v1687_v60 = vunpack.c.l.bf16 %v1816_v49 }
  0x58   : > { %v2459_v4 = vld [vmem:[#allocation2 + $0x60] sm:$0xff]  ;;  %1884 = vmatmul.mubr.bf16.vlgmr.msra.gmra.mrb[0].mxu0 %v1112_v29  ;;  %v2464_v32 = vld [vmem:[#allocation2 + $0x68] sm:$0xff]  ;;  %3269 = vst [vmem:[#allocation8_spill] sm:$0xff] %v2470_v42  ;;  %v2484_v56 = vmul.f32 %v2072_v24, %v2451_v17  ;;  %v1097_v28 = vadd.f32 %v1065_v1, %v1028_v18  ;;  %v1052_v35 = vmul.f32 %v2216_v50, %v2470_v42  ;;  %v1688_v29 = vunpack.c.h.bf16 %v1816_v49  ;;  %v3270_v18 = vld [vmem:[#allocation3_spill] sm:$0xff] }
  0x59   : > { %3268 = vst [vmem:[#allocation5_spill] sm:$0xff] %v2464_v32  ;;  %v565_v21 = vmul.f32 %v2139_v59, %v2459_v4  ;;  %v2468_v12 = vld [vmem:[#allocation2 + $0x62] sm:$0xff]  ;;  %v1098_v33 = vadd.f32 %v1066_v16, %v1029_v0  ;;  %v566_v25 = vmul.f32 %v2139_v59, %v2464_v32  ;;  %v2494_v36 = vmul.f32 %v2194_v31, %v2375_v55 }
  0x5a   : > { %v1051_v44 = vmul.f32 %v2216_v50, %v2468_v12  ;;  %v2498_v37 = vmul.f32 %v2194_v31, %v2381_v3  ;;  %v430_v9 = vmul.f32 %v2045_v11, %v2335_v13  ;;  %v498_v6 = vmul.f32 %v2130_v54, %v2459_v4 }
  0x5b   : > { %v597_v47 = vadd.f32 %v565_v21, %v528_v52  ;;  %v1120_v1 = vpack.c.bf16 %v1098_v33, %v1097_v28  ;;  %v598_v16 = vadd.f32 %v566_v25, %v529_v23  ;;  %v429_v52 = vmul.f32 %v2045_v11, %v2333_v53  ;;  %v3271_v21 = vld [vmem:[#allocation4_spill] sm:$0xff] }
  0x5c   : > { %v2508_v3 = vmax.f32 %v1687_v60, 0.0  ;;  %v2510_v28 = vmax.f32 %v1688_v29, 0.0  ;;  %v499_v23 = vmul.f32 %v2130_v54, %v2464_v32  ;;  %v2517_v53 = vmul.f32 %v2053_v15, %v2148_v63 }
  0x5d   : > { %v702_v0 = vadd.f32 %v3270_v18, %v597_v47  ;;  %1900 = vmatmul.mubr.bf16.vlgmr.msra.gmra.mrb[0].mxu1 %v1120_v1  ;;  %v703_v55 = vadd.f32 %v3271_v21, %v598_v16  ;;  %v530_v33 = vadd.f32 %v498_v6, %v429_v52  ;;  %v2521_v13 = vmul.f32 %v2053_v15, %v2166_v7  ;;  %v1824_v6 = vld [vmem:[%s2033_s26 + $0x60] sm:$0xff]   ;;  %v3274_v21 = vld [vmem:[#allocation6_spill] sm:$0xff] }
  0x5e   : > { %3272 = vst [vmem:[#allocation9_spill] sm:$0xff] %v2508_v3  ;;  %3273 = vst [vmem:[#allocation12_spill] sm:$0xff] %v2510_v28  ;;  %v2524_v47 = vld [vmem:[#allocation2 + $0x120] sm:$0xff]  ;;  %v2526_v1 = vld [vmem:[#allocation2 + $0x128] sm:$0xff]  ;;  %v2534_v63 = vmul.f32 %v2058_v20, %v2398_v14  ;;  %v2538_v7 = vmul.f32 %v2058_v20, %v2404_v58  ;;  %v2564_v14 = vmul.f32 %v2077_v26, %v2343_v30 }
  0x5f   : > { %v771_v49 = vadd.f32 %v2414_v41, %v702_v0  ;;  %v772_v25 = vadd.f32 %v2422_v48, %v703_v55  ;;  %v2528_v16 = vld [vmem:[#allocation2 + $0x122] sm:$0xff]  ;;  %358 = vst [vmem:[#allocation2 + $0x79] sm:$0xff] %v2508_v3  ;;  %359 = vst [vmem:[#allocation2 + $0x81] sm:$0xff] %v2510_v28  ;;  %v531_v41 = vadd.f32 %v499_v23, %v430_v9  ;;  %v2545_v29 = vld [vmem:[#allocation2 + $0x12a] sm:$0xff] }
  0x60   : > { %v581_v48 = vmul.f32 %v2139_v59, %v2524_v47  ;;  %v582_v60 = vmul.f32 %v2139_v59, %v2526_v1  ;;  %v1067_v18 = vmul.f32 %v2216_v50, %v2528_v16  ;;  %v1068_v52 = vmul.f32 %v2216_v50, %v2545_v29 }
  0x61   : > { %v840_v55 = vadd.f32 %v2429_v27, %v771_v49  ;;  %v841_v0 = vadd.f32 %v2433_v22, %v772_v25  ;;  %v2554_v9 = vmul.f32 %v2072_v24, %v2508_v3  ;;  %v2558_v27 = vmul.f32 %v2072_v24, %v2510_v28  ;;  %v3275_v22 = vld [vmem:[#allocation7_spill] sm:$0xff] }
  0x62   : > { %v613_v49 = vadd.f32 %v581_v48, %v544_v5  ;;  %v614_v58 = vadd.f32 %v582_v60, %v545_v45  ;;  %v2569_v32 = vmul.f32 %v2077_v26, %v2349_v34  ;;  %v2573_v3 = vmul.f32 %v2194_v31, %v2468_v12 }
  0x63   : > { %v945_v23 = vadd.f32 %v3274_v21, %v840_v55  ;;  %v946_v25 = vadd.f32 %v3275_v22, %v841_v0  ;;  %v2577_v28 = vmul.f32 %v2194_v31, %v2470_v42  ;;  %v1719_v55 = vunpack.c.l.bf16 %v1824_v6 }
  0x64   : > { %v718_v45 = vadd.f32 %v2285_v8, %v613_v49  ;;  %v719_v30 = vadd.f32 %v2290_v40, %v614_v58  ;;  %v1720_v60 = vunpack.c.h.bf16 %v1824_v6  ;;  %v445_v34 = vmul.f32 %v2045_v11, %v2357_v2 }
  0x65   : > { %v1014_v5 = vadd.f32 %v2437_v62, %v945_v23  ;;  %v1015_v48 = vadd.f32 %v2441_v10, %v946_v25  ;;  %v446_v0 = vmul.f32 %v2045_v11, %v2365_v51  ;;  %v2595_v58 = vmax.f32 %v1719_v55, 0.0  ;;  %v3276_v55 = vld [vmem:[#allocation16_spill] sm:$0xff] }
  0x66   : > { %v787_v22 = vadd.f32 %v2455_v19, %v718_v45  ;;  %v788_v42 = vadd.f32 %v2476_v39, %v719_v30  ;;  %v2589_v62 = vld [vmem:[#allocation2 + $0x78] sm:$0xff]  ;;  %v2591_v8 = vld [vmem:[#allocation2 + $0x80] sm:$0xff]  ;;  %v2609_v49 = vmax.f32 %v1720_v60, 0.0  ;;  %v514_v45 = vmul.f32 %v2130_v54, %v2524_v47 }
  0x67   : > { %v1083_v21 = vadd.f32 %v1051_v44, %v1014_v5  ;;  %v2593_v40 = vld [vmem:[#allocation2 + $0x7a] sm:$0xff]  ;;  %v1084_v10 = vadd.f32 %v1052_v35, %v1015_v48  ;;  %v567_v2 = vmul.f32 %v2139_v59, %v2589_v62  ;;  %v568_v51 = vmul.f32 %v2139_v59, %v2591_v8  ;;  %v2601_v44 = vld [vmem:[#allocation2 + $0x82] sm:$0xff]  ;;  %374 = vst [vmem:[#allocation2 + $0x139] sm:$0xff] %v2595_v58 }
  0x68   : > { %v1053_v19 = vmul.f32 %v2216_v50, %v2593_v40  ;;  %v856_v39 = vadd.f32 %v2480_v46, %v787_v22  ;;  %v857_v6 = vadd.f32 %v2484_v56, %v788_v42  ;;  %v1054_v23 = vmul.f32 %v2216_v50, %v2601_v44  ;;  %375 = vst [vmem:[#allocation2 + $0x141] sm:$0xff] %v2609_v49 }
  0x69   : > { %v1113_v35 = vpack.c.bf16 %v1084_v10, %v1083_v21  ;;  %v599_v25 = vadd.f32 %v567_v2, %v530_v33  ;;  %v600_v5 = vadd.f32 %v568_v51, %v531_v41  ;;  %v515_v42 = vmul.f32 %v2130_v54, %v2526_v1 }
  0x6a   : > { %v961_v30 = vadd.f32 %v2326_v61, %v856_v39  ;;  %v962_v48 = vadd.f32 %v3276_v55, %v857_v6  ;;  %v688_v46 = vmul.f32 %v2053_v15, %v2246_v38  ;;  %v546_v41 = vadd.f32 %v514_v45, %v445_v34  ;;  %v1817_v34 = vld [vmem:[%s2033_s26 + $0x28] sm:$0xff]  }
  0x6b   : > { %1887 = vmatprep.mubr.bf16.mxu0 %v1113_v35  ;;  %v704_v56 = vadd.f32 %v2517_v53, %v599_v25  ;;  %v705_v33 = vadd.f32 %v2521_v13, %v600_v5  ;;  %v689_v61 = vmul.f32 %v2053_v15, %v2253_v43  ;;  %v547_v22 = vadd.f32 %v515_v42, %v446_v0  ;;  %v3278_v6 = vld [vmem:[#allocation18_spill] sm:$0xff] }
  0x6c   : > { %v1030_v60 = vadd.f32 %v2494_v36, %v961_v30  ;;  %v1031_v21 = vadd.f32 %v2498_v37, %v962_v48  ;;  %v757_v10 = vmul.f32 %v2058_v20, %v2449_v57  ;;  %v758_v53 = vmul.f32 %v2058_v20, %v2451_v17  ;;  %v3277_v37 = vld [vmem:[#allocation17_spill] sm:$0xff] }
  0x6d   : > { %v773_v2 = vadd.f32 %v2534_v63, %v704_v56  ;;  %v774_v38 = vadd.f32 %v2538_v7, %v705_v33  ;;  %v826_v13 = vmul.f32 %v2072_v24, %v2595_v58  ;;  %v827_v36 = vmul.f32 %v2072_v24, %v2609_v49 }
  0x6e   : > { %v1099_v43 = vadd.f32 %v1067_v18, %v1030_v60  ;;  %v1100_v51 = vadd.f32 %v1068_v52, %v1031_v21  ;;  %v931_v0 = vmul.f32 %v2077_v26, %v3277_v37  ;;  %v2642_v7 = vld [vmem:[#allocation2 + $0x138] sm:$0xff]  ;;  %v932_v35 = vmul.f32 %v2077_v26, %v3278_v6 }
  0x6f   : > { %v842_v39 = vadd.f32 %v2554_v9, %v773_v2  ;;  %v843_v63 = vadd.f32 %v2558_v27, %v774_v38  ;;  %v1000_v25 = vmul.f32 %v2194_v31, %v2528_v16  ;;  %v583_v52 = vmul.f32 %v2139_v59, %v2642_v7  ;;  %v2656_v30 = vld [vmem:[#allocation2 + $0x140] sm:$0xff] }
  0x70   : > { %v1121_v18 = vpack.c.bf16 %v1100_v51, %v1099_v43  ;;  %v2652_v5 = vmul.f32 %v2194_v31, %v2545_v29  ;;  %v1691_v45 = vunpack.c.l.bf16 %v1817_v34  ;;  %3279 = vst [vmem:[#allocation13_spill] sm:$0xff] %v2656_v30  ;;  %v2658_v55 = vld [vmem:[#allocation2 + $0x13a] sm:$0xff]  ;;  %v2660_v48 = vld [vmem:[#allocation2 + $0x142] sm:$0xff]  ;;  %v1692_v42 = vunpack.c.h.bf16 %v1817_v34 }
  0x71   : > { %v947_v9 = vadd.f32 %v2564_v14, %v842_v39  ;;  %v948_v27 = vadd.f32 %v2569_v32, %v843_v63  ;;  %v431_v56 = vmul.f32 %v2045_v11, %v2459_v4  ;;  %v584_v33 = vmul.f32 %v2139_v59, %v2656_v30  ;;  %v3280_v51 = vld [vmem:[#allocation5_spill] sm:$0xff] }
  0x72   : > { %1903 = vmatprep.mubr.bf16.mxu1 %v1121_v18  ;;  %v615_v60 = vadd.f32 %v583_v52, %v546_v41  ;;  %v1069_v14 = vmul.f32 %v2216_v50, %v2658_v55  ;;  %v2670_v32 = vmul.f32 %v2216_v50, %v2660_v48  ;;  %v2674_v38 = vmax.f32 %v1691_v45, 0.0  ;;  %v3282_v52 = vld [vmem:[#allocation20_spill] sm:$0xff] }
  0x73   : > { %v1016_v21 = vadd.f32 %v2573_v3, %v947_v9  ;;  %v1017_v2 = vadd.f32 %v2577_v28, %v948_v27  ;;  %v2676_v34 = vmax.f32 %v1692_v42, 0.0  ;;  %v616_v4 = vadd.f32 %v584_v33, %v547_v22  ;;  %v3281_v28 = vld [vmem:[#allocation19_spill] sm:$0xff]  ;;  %v3284_v42 = vld [vmem:[#allocation12_spill] sm:$0xff] }
  0x74   : > { %v720_v43 = vadd.f32 %v688_v46, %v615_v60  ;;  %v432_v41 = vmul.f32 %v2045_v11, %v3280_v51  ;;  %v500_v37 = vmul.f32 %v2130_v54, %v2589_v62  ;;  %360 = vst [vmem:[#allocation2 + $0x91] sm:$0xff] %v2674_v38  ;;  %v501_v3 = vmul.f32 %v2130_v54, %v2591_v8  ;;  %v1825_v60 = vld [vmem:[%s2033_s26 + $0x68] sm:$0xff]  }
  0x75   : > { %v1085_v39 = vadd.f32 %v1053_v19, %v1016_v21  ;;  %v1086_v63 = vadd.f32 %v1054_v23, %v1017_v2  ;;  %361 = vst [vmem:[#allocation2 + $0x99] sm:$0xff] %v2676_v34  ;;  %v674_v22 = vmul.f32 %v2053_v15, %v3281_v28  ;;  %v721_v46 = vadd.f32 %v689_v61, %v616_v4  ;;  %v3283_v19 = vld [vmem:[#allocation9_spill] sm:$0xff] }
  0x76   : > { %v789_v6 = vadd.f32 %v757_v10, %v720_v43  ;;  %v532_v18 = vadd.f32 %v500_v37, %v431_v56  ;;  %v675_v45 = vmul.f32 %v2053_v15, %v3282_v52  ;;  %v533_v27 = vadd.f32 %v501_v3, %v432_v41  ;;  %v3285_v56 = vld [vmem:[#allocation8_spill] sm:$0xff] }
  0x77   : > { %v1114_v9 = vpack.c.bf16 %v1086_v63, %v1085_v39  ;;  %v743_v23 = vmul.f32 %v2058_v20, %v3283_v19  ;;  %v744_v33 = vmul.f32 %v2058_v20, %v3284_v42  ;;  %v790_v21 = vadd.f32 %v758_v53, %v721_v46 }
  0x78   : > { %v858_v2 = vadd.f32 %v826_v13, %v789_v6  ;;  %v812_v51 = vmul.f32 %v2072_v24, %v2674_v38  ;;  %v813_v61 = vmul.f32 %v2072_v24, %v2676_v34  ;;  %v2701_v10 = vmul.f32 %v2077_v26, %v2468_v12 }
  0x79   : > { %1888 = vmatmul.mubr.bf16.gmra.mrb[4].mxu0 %v1114_v9  ;;  %v2705_v4 = vmul.f32 %v2077_v26, %v3285_v56  ;;  %v2709_v43 = vmul.f32 %v2194_v31, %v2593_v40  ;;  %v2713_v53 = vmul.f32 %v2194_v31, %v2601_v44  ;;  %v859_v13 = vadd.f32 %v827_v36, %v790_v21 }
  0x7a   : > { %v963_v41 = vadd.f32 %v931_v0, %v858_v2  ;;  %v1723_v37 = vunpack.c.l.bf16 %v1825_v60  ;;  %v1724_v39 = vunpack.c.h.bf16 %v1825_v60  ;;  %v447_v12 = vmul.f32 %v2045_v11, %v2524_v47 }
  0x7b   : > { %v448_v63 = vmul.f32 %v2045_v11, %v2526_v1  ;;  %v516_v3 = vmul.f32 %v2130_v54, %v2642_v7  ;;  %v517_v28 = vmul.f32 %v2130_v54, %v2656_v30  ;;  %v964_v46 = vadd.f32 %v932_v35, %v859_v13  ;;  %v2723_v52 = vld [vmem:[#allocation2 + $0x90] sm:$0xff] }
  0x7c   : > { %v1032_v6 = vadd.f32 %v1000_v25, %v963_v41  ;;  %v2725_v36 = vld [vmem:[#allocation2 + $0x98] sm:$0xff]  ;;  %v2729_v9 = vmax.f32 %v1723_v37, 0.0  ;;  %v2731_v47 = vmax.f32 %v1724_v39, 0.0  ;;  %v569_v1 = vmul.f32 %v2139_v59, %v2723_v52 }
  0x7d   : > { %v2727_v0 = vld [vmem:[#allocation2 + $0x92] sm:$0xff]  ;;  %v570_v60 = vmul.f32 %v2139_v59, %v2725_v36  ;;  %v2737_v21 = vld [vmem:[#allocation2 + $0x9a] sm:$0xff]  ;;  %v548_v25 = vadd.f32 %v516_v3, %v447_v12  ;;  %v1033_v2 = vadd.f32 %v2652_v5, %v964_v46  ;;  %v549_v41 = vadd.f32 %v517_v28, %v448_v63 }
  0x7e   : > { %v2741_v35 = vmul.f32 %v2216_v50, %v2727_v0  ;;  %v1101_v56 = vadd.f32 %v1069_v14, %v1032_v6  ;;  %v2746_v13 = vmul.f32 %v2216_v50, %v2737_v21  ;;  %376 = vst [vmem:[#allocation2 + $0x151] sm:$0xff] %v2729_v9  ;;  %377 = vst [vmem:[#allocation2 + $0x159] sm:$0xff] %v2731_v47 }
  0x7f   : > { %v601_v37 = vadd.f32 %v569_v1, %v532_v18  ;;  %v602_v39 = vadd.f32 %v570_v60, %v533_v27  ;;  %v690_v30 = vmul.f32 %v2053_v15, %v2449_v57  ;;  %v691_v12 = vmul.f32 %v2053_v15, %v2451_v17  ;;  %v1818_v18 = vld [vmem:[%s2033_s26 + $0x30] sm:$0xff]  }
  0x80   : > { %v1102_v5 = vadd.f32 %v2670_v32, %v1033_v2  ;;  %v759_v14 = vmul.f32 %v2058_v20, %v2595_v58  ;;  %v760_v3 = vmul.f32 %v2058_v20, %v2609_v49  ;;  %v2761_v46 = vmul.f32 %v2072_v24, %v2729_v9 }
  0x81   : > { %v706_v27 = vadd.f32 %v674_v22, %v601_v37  ;;  %v707_v63 = vadd.f32 %v675_v45, %v602_v39  ;;  %v2766_v57 = vmul.f32 %v2072_v24, %v2731_v47  ;;  %v2770_v15 = vmul.f32 %v2077_v26, %v2528_v16 }
  0x82   : > { %v1122_v17 = vpack.c.bf16 %v1102_v5, %v1101_v56  ;;  %v2774_v32 = vmul.f32 %v2077_v26, %v2545_v29  ;;  %v2778_v20 = vmul.f32 %v2194_v31, %v2658_v55  ;;  %v2782_v22 = vmul.f32 %v2194_v31, %v2660_v48 }
  0x83   : > { %v775_v45 = vadd.f32 %v743_v23, %v706_v27  ;;  %v776_v24 = vadd.f32 %v744_v33, %v707_v63  ;;  %v1695_v28 = vunpack.c.l.bf16 %v1818_v18  ;;  %v1696_v6 = vunpack.c.h.bf16 %v1818_v18 }
  0x84   : > { %1904 = vmatmul.mubr.bf16.gmra.mrb[4].mxu1 %v1122_v17  ;;  %v433_v16 = vmul.f32 %v2045_v11, %v2589_v62  ;;  %v434_v26 = vmul.f32 %v2045_v11, %v2591_v8  ;;  %v502_v29 = vmul.f32 %v2130_v54, %v2723_v52  ;;  %v503_v1 = vmul.f32 %v2130_v54, %v2725_v36 }
  0x85   : > { %v844_v60 = vadd.f32 %v812_v51, %v775_v45  ;;  %v845_v2 = vadd.f32 %v813_v61, %v776_v24  ;;  %v2792_v56 = vld [vmem:[#allocation2 + $0x150] sm:$0xff]  ;;  %v2794_v23 = vld [vmem:[#allocation2 + $0x158] sm:$0xff]  ;;  %v2798_v37 = vmax.f32 %v1695_v28, 0.0  ;;  %v2800_v62 = vmax.f32 %v1696_v6, 0.0  ;;  %v2823_v24 = vld [vmem:[%s3217_s1 + $0x1] ss:$0 sm:$0xff] }
  0x86   : > { %3286 = vst [vmem:[#allocation3_spill] sm:$0xff] %v2792_v56  ;;  %v2796_v33 = vld [vmem:[#allocation2 + $0x152] sm:$0xff]  ;;  %v585_v11 = vmul.f32 %v2139_v59, %v2792_v56  ;;  %v586_v8 = vmul.f32 %v2139_v59, %v2794_v23  ;;  %v2806_v39 = vld [vmem:[#allocation2 + $0x15a] sm:$0xff]  ;;  %v534_v61 = vadd.f32 %v502_v29, %v433_v16  ;;  %v535_v63 = vadd.f32 %v503_v1, %v434_v26 }
  0x87   : > { %3287 = vst [vmem:[#allocation4_spill] sm:$0xff] %v2806_v39  ;;  %v2810_v51 = vmul.f32 %v2216_v50, %v2796_v33  ;;  %v949_v5 = vadd.f32 %v2701_v10, %v844_v60  ;;  %v950_v18 = vadd.f32 %v2705_v4, %v845_v2  ;;  %v2816_v27 = vmul.f32 %v2216_v50, %v2806_v39  ;;  %v1826_v29 = vld [vmem:[%s2033_s26 + $0x70] sm:$0xff]  }
  0x88   : > { %362 = vst [vmem:[#allocation2 + $0xa9] sm:$0xff] %v2798_v37  ;;  %363 = vst [vmem:[#allocation2 + $0xb1] sm:$0xff] %v2800_v62  ;;  %v617_v17 = vadd.f32 %v585_v11, %v548_v25  ;;  %v618_v45 = vadd.f32 %v586_v8, %v549_v41  ;;  %v676_v10 = vmul.f32 %v2823_v24, %v3283_v19  ;;  %v2834_v25 = vld [vmem:[%s3217_s1 + $0x4] ss:$0 sm:$0xff] }
  0x89   : > { %v677_v4 = vmul.f32 %v2823_v24, %v3284_v42  ;;  %v1018_v28 = vadd.f32 %v2709_v43, %v949_v5  ;;  %v1019_v6 = vadd.f32 %v2713_v53, %v950_v18  ;;  %v745_v41 = vmul.f32 %v2834_v25, %v2674_v38  ;;  %v2843_v42 = vld [vmem:[%s3217_s1 + $0x7] ss:$0 sm:$0xff] }
  0x8a   : > { %v746_v16 = vmul.f32 %v2834_v25, %v2676_v34  ;;  %v722_v26 = vadd.f32 %v690_v30, %v617_v17  ;;  %v723_v19 = vadd.f32 %v691_v12, %v618_v45  ;;  %v814_v43 = vmul.f32 %v2843_v42, %v2798_v37  ;;  %v2855_v30 = vld [vmem:[%s3217_s1 + $0x2] ss:$0 sm:$0xff] }
  0x8b   : > { %v815_v53 = vmul.f32 %v2843_v42, %v2800_v62  ;;  %v1087_v1 = vadd.f32 %v2741_v35, %v1018_v28  ;;  %v1088_v60 = vadd.f32 %v2746_v13, %v1019_v6  ;;  %v2859_v12 = vmul.f32 %v2855_v30, %v2593_v40  ;;  %v2876_v40 = vld [vmem:[%s3217_s1] ss:$0 sm:$0xff] }
  0x8c   : > { %v2863_v2 = vmul.f32 %v2855_v30, %v2601_v44  ;;  %v791_v11 = vadd.f32 %v759_v14, %v722_v26  ;;  %v792_v8 = vadd.f32 %v760_v3, %v723_v19  ;;  %v2867_v35 = vmul.f32 %v2194_v31, %v2727_v0  ;;  %v3290_v26 = vld [vmem:[#allocation13_spill] sm:$0xff] }
  0x8d   : > { %v2871_v13 = vmul.f32 %v2194_v31, %v2737_v21  ;;  %v1115_v5 = vpack.c.bf16 %v1088_v60, %v1087_v1  ;;  %v1727_v18 = vunpack.c.l.bf16 %v1826_v29  ;;  %v1728_v17 = vunpack.c.h.bf16 %v1826_v29 }
  0x8e   : > { %v449_v44 = vmul.f32 %v2876_v40, %v2642_v7  ;;  %v860_v14 = vadd.f32 %v2761_v46, %v791_v11  ;;  %v861_v3 = vadd.f32 %v2766_v57, %v792_v8  ;;  %v450_v19 = vmul.f32 %v2876_v40, %v3290_v26 }
  0x8f   : > { %v2882_v45 = vld [vmem:[#allocation2 + $0xa8] sm:$0xff]  ;;  %v2884_v28 = vld [vmem:[#allocation2 + $0xb0] sm:$0xff]  ;;  %v518_v29 = vmul.f32 %v2130_v54, %v2792_v56  ;;  %1891 = vmatprep.mubr.bf16.mxu0 %v1115_v5  ;;  %v2902_v60 = vmax.f32 %v1727_v18, 0.0  ;;  %v2908_v5 = vmax.f32 %v1728_v17, 0.0 }
  0x90   : > { %3288 = vst [vmem:[#allocation6_spill] sm:$0xff] %v2882_v45  ;;  %3289 = vst [vmem:[#allocation7_spill] sm:$0xff] %v2884_v28  ;;  %v2886_v6 = vld [vmem:[#allocation2 + $0xaa] sm:$0xff]  ;;  %v571_v7 = vmul.f32 %v2139_v59, %v2882_v45  ;;  %v572_v46 = vmul.f32 %v2139_v59, %v2884_v28  ;;  %v2896_v57 = vld [vmem:[#allocation2 + $0xb2] sm:$0xff]  ;;  %v965_v11 = vadd.f32 %v2770_v15, %v860_v14 }
  0x91   : > { %v2900_v1 = vmul.f32 %v2216_v50, %v2886_v6  ;;  %v966_v8 = vadd.f32 %v2774_v32, %v861_v3  ;;  %v1058_v54 = vmul.f32 %v2216_v50, %v2896_v57  ;;  %378 = vst [vmem:[#allocation2 + $0x169] sm:$0xff] %v2902_v60  ;;  %v2914_v59 = vld [vmem:[%s3217_s1 + $0x3] ss:$0 sm:$0xff]  ;;  %v550_v15 = vadd.f32 %v518_v29, %v449_v44 }
  0x92   : > { %v603_v26 = vadd.f32 %v571_v7, %v534_v61  ;;  %v604_v56 = vadd.f32 %v572_v46, %v535_v63  ;;  %v519_v18 = vmul.f32 %v2914_v59, %v2794_v23  ;;  %v1034_v32 = vadd.f32 %v2778_v20, %v965_v11  ;;  %379 = vst [vmem:[#allocation2 + $0x171] sm:$0xff] %v2908_v5 }
  0x93   : > { %v1035_v14 = vadd.f32 %v2782_v22, %v966_v8  ;;  %v692_v61 = vmul.f32 %v2823_v24, %v2595_v58  ;;  %v693_v63 = vmul.f32 %v2823_v24, %v2609_v49  ;;  %v761_v46 = vmul.f32 %v2834_v25, %v2729_v9 }
  0x94   : > { %v708_v17 = vadd.f32 %v676_v10, %v603_v26  ;;  %v709_v3 = vadd.f32 %v677_v4, %v604_v56  ;;  %v551_v7 = vadd.f32 %v519_v18, %v450_v19  ;;  %v1103_v44 = vadd.f32 %v2810_v51, %v1034_v32 }
  0x95   : > { %v1104_v20 = vadd.f32 %v2816_v27, %v1035_v14  ;;  %v762_v22 = vmul.f32 %v2834_v25, %v2731_v47  ;;  %v830_v29 = vmul.f32 %v2843_v42, %v2902_v60  ;;  %v831_v49 = vmul.f32 %v2843_v42, %v2908_v5 }
  0x96   : > { %v777_v58 = vadd.f32 %v745_v41, %v708_v17  ;;  %v778_v11 = vadd.f32 %v746_v16, %v709_v3  ;;  %v2937_v56 = vmul.f32 %v2855_v30, %v2658_v55  ;;  %v2941_v51 = vmul.f32 %v2855_v30, %v2660_v48 }
  0x97   : > { %v1123_v10 = vpack.c.bf16 %v1104_v20, %v1103_v44  ;;  %v2945_v27 = vmul.f32 %v2194_v31, %v2796_v33  ;;  %v2949_v4 = vmul.f32 %v2194_v31, %v2806_v39  ;;  %v435_v19 = vmul.f32 %v2876_v40, %v2723_v52  ;;  %v2964_v31 = vld [vmem:[%s3217_s1 + $0x6] ss:$0 sm:$0xff] }
  0x98   : > { %v846_v41 = vadd.f32 %v814_v43, %v777_v58  ;;  %v847_v16 = vadd.f32 %v815_v53, %v778_v11  ;;  %v436_v55 = vmul.f32 %v2876_v40, %v2725_v36  ;;  %v2955_v8 = vld [vmem:[#allocation2 + $0x168] sm:$0xff]  ;;  %v504_v48 = vmul.f32 %v2914_v59, %v2882_v45  ;;  %3291 = vst [vmem:[#allocation16_spill] sm:$0xff] %v2964_v31  ;;  %v3293_v53 = vld [vmem:[#allocation11_spill] sm:$0xff] }
  0x99   : > { %1907 = vmatprep.mubr.bf16.mxu1 %v1123_v10  ;;  %v505_v26 = vmul.f32 %v2914_v59, %v2884_v28  ;;  %v3292_v43 = vld [vmem:[#allocation10_spill] sm:$0xff]  ;;  %v574_v36 = vmul.f32 %v2964_v31, %v3293_v53  ;;  %v2972_v14 = vld [vmem:[#allocation2 + $0x170] sm:$0xff]  ;;  %v587_v17 = vmul.f32 %v2964_v31, %v2955_v8  ;;  %v678_v20 = vmul.f32 %v2823_v24, %v2674_v38 }
  0x9a   : > { %v573_v52 = vmul.f32 %v2964_v31, %v3292_v43  ;;  %v951_v18 = vadd.f32 %v2859_v12, %v846_v41  ;;  %v952_v32 = vadd.f32 %v2863_v2, %v847_v16  ;;  %v2976_v3 = vld [vmem:[#allocation2 + $0x16a] sm:$0xff]  ;;  %v2978_v44 = vld [vmem:[#allocation2 + $0x172] sm:$0xff]  ;;  %v588_v58 = vmul.f32 %v2964_v31, %v2972_v14 }
  0x9b   : > { %3294 = vst [vmem:[#allocation17_spill] sm:$0xff] %v2976_v3  ;;  %v1073_v12 = vmul.f32 %v2216_v50, %v2976_v3  ;;  %v1074_v2 = vmul.f32 %v2216_v50, %v2978_v44  ;;  %v536_v11 = vadd.f32 %v504_v48, %v435_v19  ;;  %v619_v16 = vadd.f32 %v587_v17, %v550_v15  ;;  %v2997_v15 = vld [vmem:[#allocation2 + $0xc1] sm:$0xff] }
  0x9c   : > { %v1020_v10 = vadd.f32 %v2867_v35, %v951_v18  ;;  %v1021_v41 = vadd.f32 %v2871_v13, %v952_v32  ;;  %v537_v43 = vadd.f32 %v505_v26, %v436_v55  ;;  %v620_v53 = vadd.f32 %v588_v58, %v551_v7  ;;  %v3001_v26 = vld [vmem:[#allocation2 + $0xc9] sm:$0xff] }
  0x9d   : > { %v605_v28 = vadd.f32 %v573_v52, %v536_v11  ;;  %v679_v38 = vmul.f32 %v2823_v24, %v2676_v34  ;;  %v747_v31 = vmul.f32 %v2834_v25, %v2798_v37  ;;  %v724_v39 = vadd.f32 %v692_v61, %v619_v16  ;;  %v1827_v52 = vld [vmem:[%s2033_s26 + $0x78] sm:$0xff]   ;;  %v3296_v32 = vld [vmem:[#allocation15_spill] sm:$0xff] }
  0x9e   : > { %v1089_v45 = vadd.f32 %v2900_v1, %v1020_v10  ;;  %v1090_v3 = vadd.f32 %v1058_v54, %v1021_v41  ;;  %v606_v50 = vadd.f32 %v574_v36, %v537_v43  ;;  %v725_v19 = vadd.f32 %v693_v63, %v620_v53  ;;  %v3297_v41 = vld [vmem:[#allocation3_spill] sm:$0xff] }
  0x9f   : > { %v710_v35 = vadd.f32 %v678_v20, %v605_v28  ;;  %v748_v13 = vmul.f32 %v2834_v25, %v2800_v62  ;;  %v816_v7 = vmul.f32 %v2997_v15, %v2843_v42  ;;  %v793_v55 = vadd.f32 %v761_v46, %v724_v39  ;;  %v3013_v39 = vld [vmem:[%s3217_s1 + $0x5] ss:$0 sm:$0xff] }
  0xa0   : > { %v1116_v34 = vpack.c.bf16 %v1090_v3, %v1089_v45  ;;  %v711_v48 = vadd.f32 %v679_v38, %v606_v50  ;;  %v817_v1 = vmul.f32 %v3001_v26, %v2843_v42  ;;  %v794_v54 = vadd.f32 %v762_v22, %v725_v19 }
  0xa1   : > { %v779_v61 = vadd.f32 %v747_v31, %v710_v35  ;;  %v921_v28 = vmul.f32 %v2855_v30, %v2727_v0  ;;  %v922_v63 = vmul.f32 %v2855_v30, %v2737_v21  ;;  %v862_v36 = vadd.f32 %v830_v29, %v793_v55  ;;  %v3022_v21 = vld [vmem:[%s3217_s1 + $0x8] ss:$0 sm:$0xff] }
  0xa2   : > { %1892 = vmatmul.mubr.bf16.gmra.mrb[8].mxu0 %v1116_v34  ;;  %v780_v18 = vadd.f32 %v748_v13, %v711_v48  ;;  %v990_v45 = vmul.f32 %v3013_v39, %v2886_v6  ;;  %v991_v46 = vmul.f32 %v3013_v39, %v2896_v57  ;;  %v863_v22 = vadd.f32 %v831_v49, %v794_v54  ;;  %v3295_v29 = vld [vmem:[#allocation14_spill] sm:$0xff] }
  0xa3   : > { %v848_v0 = vadd.f32 %v816_v7, %v779_v61  ;;  %v1059_v31 = vmul.f32 %v3022_v21, %v3295_v29  ;;  %v1060_v17 = vmul.f32 %v3022_v21, %v3296_v32  ;;  %v967_v3 = vadd.f32 %v2937_v56, %v862_v36  ;;  %v3301_v29 = vld [vmem:[#allocation7_spill] sm:$0xff] }
  0xa4   : > { %v849_v20 = vadd.f32 %v817_v1, %v780_v18  ;;  %v1731_v58 = vunpack.c.l.bf16 %v1827_v52  ;;  %v1732_v11 = vunpack.c.h.bf16 %v1827_v52  ;;  %v968_v10 = vadd.f32 %v2941_v51, %v863_v22  ;;  %v3299_v18 = vld [vmem:[#allocation17_spill] sm:$0xff]  ;;  %v3300_v22 = vld [vmem:[#allocation6_spill] sm:$0xff] }
  0xa5   : > { %v953_v49 = vadd.f32 %v921_v28, %v848_v0  ;;  %v451_v16 = vmul.f32 %v2876_v40, %v3297_v41  ;;  %v452_v43 = vmul.f32 %v2876_v40, %v2794_v23  ;;  %v1036_v53 = vadd.f32 %v2945_v27, %v967_v3 }
  0xa6   : > { %v954_v38 = vadd.f32 %v922_v63, %v849_v20  ;;  %v3035_v50 = vmax.f32 %v1731_v58, 0.0  ;;  %v3037_v19 = vmax.f32 %v1732_v11, 0.0  ;;  %v1037_v56 = vadd.f32 %v2949_v4, %v968_v10  ;;  %v3298_v63 = vld [vmem:[#allocation4_spill] sm:$0xff]  ;;  %v1962_v10 = vld [vmem:[#allocation2 + $0xe0] sm:$0xff] }
  0xa7   : > { %v1022_v35 = vadd.f32 %v990_v45, %v953_v49  ;;  %v520_v51 = vmul.f32 %v2914_v59, %v2955_v8  ;;  %v521_v13 = vmul.f32 %v2914_v59, %v2972_v14  ;;  %v1105_v7 = vadd.f32 %v1073_v12, %v1036_v53  ;;  %v1961_v20 = vld [vmem:[#allocation2 + $0xd8] sm:$0xff] }
  0xa8   : > { %v1023_v34 = vadd.f32 %v991_v46, %v954_v38  ;;  %380 = vst [vmem:[#allocation2 + $0x181] sm:$0xff] %v3035_v50  ;;  %381 = vst [vmem:[#allocation2 + $0x189] sm:$0xff] %v3037_v19  ;;  %v694_v23 = vmul.f32 %v2823_v24, %v2729_v9  ;;  %v695_v27 = vmul.f32 %v2823_v24, %v2731_v47  ;;  %v3302_v58 = vld [vmem:[#allocation16_spill] sm:$0xff] }
  0xa9   : > { %v1106_v4 = vadd.f32 %v1074_v2, %v1037_v56  ;;  %v1091_v55 = vadd.f32 %v1059_v31, %v1022_v35  ;;  %v552_v48 = vadd.f32 %v520_v51, %v451_v16  ;;  %v553_v1 = vadd.f32 %v521_v13, %v452_v43  ;;  %v1959_v31 = vld [vmem:[#allocation2 + $0xc0] sm:$0xff] }
  0xaa   : > { %v1092_v54 = vadd.f32 %v1060_v17, %v1023_v34  ;;  %v3052_v61 = vmul.f32 %v2834_v25, %v2902_v60  ;;  %v3056_v12 = vmul.f32 %v2834_v25, %v2908_v5  ;;  %v3060_v28 = vmul.f32 %v2843_v42, %v3035_v50  ;;  %v1960_v17 = vld [vmem:[#allocation2 + $0xc8] sm:$0xff] }
  0xab   : > { %v1124_v9 = vpack.c.bf16 %v1106_v4, %v1105_v7  ;;  %v3064_v47 = vmul.f32 %v2843_v42, %v3037_v19  ;;  %v3068_v2 = vmul.f32 %v2855_v30, %v2796_v33  ;;  %v3072_v52 = vmul.f32 %v2855_v30, %v3298_v63  ;;  %v1963_v7 = vld [vmem:[#allocation2 + $0xd9] sm:$0xff] }
  0xac   : > { %v1117_v36 = vpack.c.bf16 %v1092_v54, %v1091_v55  ;;  %v3076_v45 = vmul.f32 %v3013_v39, %v3299_v18  ;;  %v3080_v46 = vmul.f32 %v3013_v39, %v2978_v44  ;;  %v437_v0 = vmul.f32 %v2876_v40, %v3300_v22  ;;  %v1964_v55 = vld [vmem:[#allocation2 + $0xe1] sm:$0xff] }
  0xad   : > { %1908 = vmatmul.mubr.bf16.gmra.mrb[8].mxu1 %v1124_v9  ;;  %v438_v33 = vmul.f32 %v2876_v40, %v3301_v29  ;;  %v506_v32 = vmul.f32 %v1959_v31, %v2914_v59  ;;  %v507_v3 = vmul.f32 %v1960_v17, %v2914_v59  ;;  %v575_v11 = vmul.f32 %v1961_v20, %v3302_v58 }
  0xae   : > { %1895 = vmatprep.mubr.bf16.mxu0 %v1117_v36  ;;  %v576_v49 = vmul.f32 %v1962_v10, %v3302_v58  ;;  %v680_v41 = vmul.f32 %v2823_v24, %v2798_v37  ;;  %v681_v16 = vmul.f32 %v2823_v24, %v2800_v62  ;;  %v749_v43 = vmul.f32 %v2997_v15, %v2834_v25  ;;  %v1967_v10 = vld [vmem:[#allocation2 + $0xda] sm:$0xff] }
  0xaf   : > { %v414_v53 = vld [vmem:[#allocation2 + $0x180] sm:$0xff]  ;;  %v415_v38 = vld [vmem:[#allocation2 + $0x188] sm:$0xff]  ;;  %v538_v35 = vadd.f32 %v506_v32, %v437_v0  ;;  %v539_v51 = vadd.f32 %v507_v3, %v438_v33  ;;  %v750_v13 = vmul.f32 %v3001_v26, %v2834_v25  ;;  %v818_v34 = vmul.f32 %v1963_v7, %v2843_v42 }
  0xb0   : > { %v3096_v56 = vld [vmem:[#allocation2 + $0x182] sm:$0xff]  ;;  %v589_v37 = vmul.f32 %v3302_v58, %v414_v53  ;;  %v590_v4 = vmul.f32 %v3302_v58, %v415_v38  ;;  %v3103_v62 = vld [vmem:[#allocation2 + $0x18a] sm:$0xff]  ;;  %v819_v54 = vmul.f32 %v1964_v55, %v2843_v42  ;;  %v923_v36 = vmul.f32 %v2855_v30, %v2886_v6 }
  0xb1   : > { %v1075_v15 = vmul.f32 %v3022_v21, %v3096_v56  ;;  %v1076_v9 = vmul.f32 %v3022_v21, %v3103_v62  ;;  %v607_v63 = vadd.f32 %v575_v11, %v538_v35  ;;  %v608_v26 = vadd.f32 %v576_v49, %v539_v51  ;;  %v1965_v33 = vld [vmem:[#allocation2 + $0xc2] sm:$0xff]  ;;  %v1966_v3 = vld [vmem:[#allocation2 + $0xca] sm:$0xff] }
  0xb2   : > { %v621_v22 = vadd.f32 %v589_v37, %v552_v48  ;;  %v622_v0 = vadd.f32 %v590_v4, %v553_v1  ;;  %v924_v29 = vmul.f32 %v2855_v30, %v2896_v57  ;;  %v992_v31 = vmul.f32 %v1965_v33, %v3013_v39  ;;  %v1968_v51 = vld [vmem:[#allocation2 + $0xe2] sm:$0xff] }
  0xb3   : > { %v712_v32 = vadd.f32 %v680_v41, %v607_v63  ;;  %v713_v17 = vadd.f32 %v681_v16, %v608_v26  ;;  %v993_v20 = vmul.f32 %v1966_v3, %v3013_v39  ;;  %v1061_v11 = vmul.f32 %v1967_v10, %v3022_v21  ;;  %v903_v10 = vld [vmem:[#allocation2 + $0x1a2] sm:$0xff] }
  0xb4   : > { %v726_v49 = vadd.f32 %v694_v23, %v621_v22  ;;  %v727_v35 = vadd.f32 %v695_v27, %v622_v0  ;;  %v1062_v6 = vmul.f32 %v1968_v51, %v3022_v21  ;;  %v453_v48 = vmul.f32 %v2876_v40, %v2955_v8  ;;  %v1969_v27 = vld [vmem:[#allocation2] sm:$0xff] }
  0xb5   : > { %v781_v57 = vadd.f32 %v749_v43, %v712_v32  ;;  %v782_v1 = vadd.f32 %v750_v13, %v713_v17  ;;  %v454_v41 = vmul.f32 %v2876_v40, %v2972_v14  ;;  %v522_v16 = vmul.f32 %v2914_v59, %v414_v53  ;;  %v659_v53 = vld [vmem:[#allocation2 + $0x199] sm:$0xff]  ;;  %v660_v13 = vld [vmem:[#allocation2 + $0x1a1] sm:$0xff] }
  0xb6   : > { %v795_v7 = vadd.f32 %v3052_v61, %v726_v49  ;;  %v796_v37 = vadd.f32 %v3056_v12, %v727_v35  ;;  %v523_v23 = vmul.f32 %v2914_v59, %v415_v38  ;;  %v591_v4 = vmul.f32 %v1969_v27, %v3302_v58 }
  0xb7   : > { %v850_v55 = vadd.f32 %v818_v34, %v781_v57  ;;  %v851_v63 = vadd.f32 %v819_v54, %v782_v1  ;;  %v554_v26 = vadd.f32 %v522_v16, %v453_v48  ;;  %v696_v8 = vmul.f32 %v2823_v24, %v2902_v60 }
  0xb8   : > { %v864_v43 = vadd.f32 %v3060_v28, %v795_v7  ;;  %v865_v40 = vadd.f32 %v3064_v47, %v796_v37  ;;  %v555_v14 = vadd.f32 %v523_v23, %v454_v41  ;;  %v697_v61 = vmul.f32 %v2823_v24, %v2908_v5 }
  0xb9   : > { %v955_v12 = vadd.f32 %v923_v36, %v850_v55  ;;  %v956_v59 = vadd.f32 %v924_v29, %v851_v63  ;;  %v623_v38 = vadd.f32 %v591_v4, %v554_v26  ;;  %v765_v58 = vmul.f32 %v2834_v25, %v3035_v50 }
  0xba   : > { %v969_v34 = vadd.f32 %v3068_v2, %v864_v43  ;;  %v970_v60 = vadd.f32 %v3072_v52, %v865_v40  ;;  %v624_v54 = vadd.f32 %v591_v4, %v555_v14  ;;  %v766_v28 = vmul.f32 %v2834_v25, %v3037_v19 }
  0xbb   : > { %v1024_v47 = vadd.f32 %v992_v31, %v955_v12  ;;  %v1025_v22 = vadd.f32 %v993_v20, %v956_v59  ;;  %v728_v0 = vadd.f32 %v696_v8, %v623_v38  ;;  %v834_v24 = vmul.f32 %v2843_v42, %v659_v53  ;;  %v902_v31 = vld [vmem:[#allocation2 + $0x19a] sm:$0xff] }
  0xbc   : > { %v1038_v5 = vadd.f32 %v3076_v45, %v969_v34  ;;  %v1039_v36 = vadd.f32 %v3080_v46, %v970_v60  ;;  %v729_v29 = vadd.f32 %v697_v61, %v624_v54  ;;  %v835_v50 = vmul.f32 %v2843_v42, %v660_v13 }
  0xbd   : > { %v1093_v33 = vadd.f32 %v1061_v11, %v1024_v47  ;;  %v1094_v2 = vadd.f32 %v1062_v6, %v1025_v22  ;;  %v797_v32 = vadd.f32 %v765_v58, %v728_v0  ;;  %v939_v52 = vmul.f32 %v2855_v30, %v3299_v18 }
  0xbe   : > { %v1107_v17 = vadd.f32 %v1075_v15, %v1038_v5  ;;  %v1108_v25 = vadd.f32 %v1076_v9, %v1039_v36  ;;  %v798_v19 = vadd.f32 %v766_v28, %v729_v29  ;;  %v940_v3 = vmul.f32 %v2855_v30, %v2978_v44 }
  0xbf   : > { %v1118_v20 = vpack.c.bf16 %v1094_v2, %v1093_v33  ;;  %v866_v45 = vadd.f32 %v834_v24, %v797_v32  ;;  %v1008_v46 = vmul.f32 %v3013_v39, %v3096_v56  ;;  %v1009_v49 = vmul.f32 %v3013_v39, %v3103_v62  ;;  %v3156_v39 = vld [vmem:[%s3219_s3] ss:$0 sm:$0xff] }
  0xc0   : > { %v1125_v42 = vpack.c.bf16 %v1108_v25, %v1107_v17  ;;  %v867_v11 = vadd.f32 %v835_v50, %v798_v19  ;;  %v1077_v15 = vmul.f32 %v3022_v21, %v902_v31  ;;  %v1078_v30 = vmul.f32 %v3022_v21, %v903_v10 }
  0xc1   : > { %1896 = vmatmul.mubr.bf16.gmra.mrb[12].mxu0 %v1118_v20  ;;  %v971_v18 = vadd.f32 %v939_v52, %v866_v45 }
  0xc2   : > { %1911 = vmatprep.mubr.bf16.mxu1 %v1125_v42  ;;  %v972_v9 = vadd.f32 %v940_v3, %v867_v11 }
  0xc3   : > { %v1040_v44 = vadd.f32 %v1008_v46, %v971_v18 }
  0xc4   : > { %v1041_v35 = vadd.f32 %v1009_v49, %v972_v9 }
  0xc5   : > { %v1109_v51 = vadd.f32 %v1077_v15, %v1040_v44 }
  0xc6   : > { %v1110_v6 = vadd.f32 %v1078_v30, %v1041_v35 }
  0xc8   : > { %v1126_v48 = vpack.c.bf16 %v1110_v6, %v1109_v51 }
  0xca   : > { %1912 = vmatmul.mubr.bf16.gmra.mrb[12].mxu1 %v1126_v48 }
 0x12b   : > { %v1885_v56 = vpop.f32.mrb[0].mxu0 }
 0x12c   : > { %v1232_v62 = vpop.f32.mrb[1].mxu0  ;;  %v1241_v1 = vadd.f32 %v1885_v56, %v3156_v39 }
 0x12d   : > { %v1886_v57 = vpop.f32.mrb[2].mxu0  ;;  %v1233_v21 = vadd.f32 %v3156_v39, %v1232_v62 }
 0x12e   : > { %v1244_v41 = vadd.f32 %v1886_v57, %v3156_v39  ;;  %v1235_v16 = vpop.f32.mrb[3].mxu0 }
 0x12f   : > { %v1236_v7 = vadd.f32 %v3156_v39, %v1235_v16 }
 0x130   : > { %v1901_v37 = vpop.f32.mrb[0].mxu1  ;;  %v1741_v23 = vpack.c.bf16 %v1244_v41, %v1241_v1 }
 0x131   : > { %v1296_v27 = vpop.f32.mrb[1].mxu1  ;;  %v1736_v4 = vpack.c.bf16 %v1236_v7, %v1233_v21  ;;  %v1305_v63 = vadd.f32 %v1901_v37, %v3156_v39 }
 0x132   : > { %1828 = vst [vmem:[%s3166_s6 + $0x8] sm:$0xff] %v1741_v23   ;;  %v1902_v55 = vpop.f32.mrb[2].mxu1  ;;  %v1297_v43 = vadd.f32 %v3156_v39, %v1296_v27 }
 0x133   : > { %v1308_v26 = vadd.f32 %v1902_v55, %v3156_v39  ;;  %1737 = vst [vmem:[%s3166_s6] sm:$0xff] %v1736_v4   ;;  %v1299_v8 = vpop.f32.mrb[3].mxu1 }
 0x134   : > { %v1300_v40 = vadd.f32 %v3156_v39, %v1299_v8 }
 0x135   : > { %v1781_v14 = vpack.c.bf16 %v1308_v26, %v1305_v63 }
 0x136   : > { %v1776_v53 = vpack.c.bf16 %v1300_v40, %v1297_v43 }
 0x137   : > { %1836 = vst [vmem:[%s3166_s6 + $0x48] sm:$0xff] %v1781_v14  }
 0x138   : > { %1835 = vst [vmem:[%s3166_s6 + $0x40] sm:$0xff] %v1776_v53  }
 0x14c   : > { %v1889_v61 = vpop.f32.mrb[4].mxu0 }
 0x14d   : > { %v1248_v12 = vpop.f32.mrb[5].mxu0  ;;  %v1257_v38 = vadd.f32 %v1889_v61, %v3156_v39 }
 0x14e   : > { %v1890_v59 = vpop.f32.mrb[6].mxu0  ;;  %v1249_v34 = vadd.f32 %v3156_v39, %v1248_v12 }
 0x14f   : > { %v1260_v13 = vadd.f32 %v1890_v59, %v3156_v39  ;;  %v1251_v58 = vpop.f32.mrb[7].mxu0 }
 0x150   : > { %v1252_v60 = vadd.f32 %v3156_v39, %v1251_v58 }
 0x151   : > { %v1751_v54 = vpack.c.bf16 %v1260_v13, %v1257_v38 }
 0x152   : > { %v1746_v28 = vpack.c.bf16 %v1252_v60, %v1249_v34 }
 0x153   : > { %1830 = vst [vmem:[%s3166_s6 + $0x18] sm:$0xff] %v1751_v54  }
 0x154   : > { %1829 = vst [vmem:[%s3166_s6 + $0x10] sm:$0xff] %v1746_v28  }
 0x157   : > { %v1905_v47 = vpop.f32.mrb[4].mxu1 }
 0x158   : > { %v1312_v22 = vpop.f32.mrb[5].mxu1  ;;  %v1321_v24 = vadd.f32 %v1905_v47, %v3156_v39 }
 0x159   : > { %v1906_v0 = vpop.f32.mrb[6].mxu1  ;;  %v1313_v29 = vadd.f32 %v3156_v39, %v1312_v22 }
 0x15a   : > { %v1324_v5 = vadd.f32 %v1906_v0, %v3156_v39  ;;  %v1315_v36 = vpop.f32.mrb[7].mxu1 }
 0x15b   : > { %v1316_v50 = vadd.f32 %v3156_v39, %v1315_v36 }
 0x15c   : > { %v1791_v33 = vpack.c.bf16 %v1324_v5, %v1321_v24 }
 0x15d   : > { %v1786_v2 = vpack.c.bf16 %v1316_v50, %v1313_v29 }
 0x15e   : > { %1838 = vst [vmem:[%s3166_s6 + $0x58] sm:$0xff] %v1791_v33  }
 0x15f   : > { %1837 = vst [vmem:[%s3166_s6 + $0x50] sm:$0xff] %v1786_v2  }
 0x175   : > { %v1893_v32 = vpop.f32.mrb[8].mxu0 }
 0x176   : > { %v1264_v52 = vpop.f32.mrb[9].mxu0  ;;  %v1273_v25 = vadd.f32 %v1893_v32, %v3156_v39 }
 0x177   : > { %v1894_v17 = vpop.f32.mrb[10].mxu0  ;;  %v1265_v3 = vadd.f32 %v3156_v39, %v1264_v52 }
 0x178   : > { %v1276_v19 = vadd.f32 %v1894_v17, %v3156_v39  ;;  %v1267_v31 = vpop.f32.mrb[11].mxu0 }
 0x179   : > { %v1268_v20 = vadd.f32 %v3156_v39, %v1267_v31 }
 0x17a   : > { %v1761_v45 = vpack.c.bf16 %v1276_v19, %v1273_v25 }
 0x17b   : > { %v1756_v10 = vpack.c.bf16 %v1268_v20, %v1265_v3 }
 0x17c   : > { %1832 = vst [vmem:[%s3166_s6 + $0x28] sm:$0xff] %v1761_v45  }
 0x17d   : > { %1831 = vst [vmem:[%s3166_s6 + $0x20] sm:$0xff] %v1756_v10  }
 0x180   : > { %v1909_v46 = vpop.f32.mrb[8].mxu1 }
 0x181   : > { %v1328_v42 = vpop.f32.mrb[9].mxu1  ;;  %v1337_v49 = vadd.f32 %v1909_v46, %v3156_v39 }
 0x182   : > { %v1910_v11 = vpop.f32.mrb[10].mxu1  ;;  %v1329_v9 = vadd.f32 %v3156_v39, %v1328_v42 }
 0x183   : > { %v1340_v18 = vadd.f32 %v1910_v11, %v3156_v39  ;;  %v1331_v15 = vpop.f32.mrb[11].mxu1 }
 0x184   : > { %v1332_v30 = vadd.f32 %v3156_v39, %v1331_v15 }
 0x185   : > { %v1801_v44 = vpack.c.bf16 %v1340_v18, %v1337_v49 }
 0x186   : > { %v1796_v35 = vpack.c.bf16 %v1332_v30, %v1329_v9 }
 0x187   : > { %1840 = vst [vmem:[%s3166_s6 + $0x68] sm:$0xff] %v1801_v44  }
 0x188   : > { %1839 = vst [vmem:[%s3166_s6 + $0x60] sm:$0xff] %v1796_v35  }
 0x194   : > { %v1897_v51 = vpop.f32.mrb[12].mxu0 }
 0x195   : > { %v1280_v6 = vpop.f32.mrb[13].mxu0  ;;  %v1289_v56 = vadd.f32 %v1897_v51, %v3156_v39 }
 0x196   : > { %v1898_v48 = vpop.f32.mrb[14].mxu0  ;;  %v1281_v1 = vadd.f32 %v3156_v39, %v1280_v6 }
 0x197   : > { %v1292_v62 = vadd.f32 %v1898_v48, %v3156_v39  ;;  %v1283_v57 = vpop.f32.mrb[15].mxu0 }
 0x198   : > { %v1284_v41 = vadd.f32 %v3156_v39, %v1283_v57 }
 0x199   : > { %v1771_v16 = vpack.c.bf16 %v1292_v62, %v1289_v56 }
 0x19a   : > { %v1766_v21 = vpack.c.bf16 %v1284_v41, %v1281_v1 }
 0x19b   : > { %1834 = vst [vmem:[%s3166_s6 + $0x38] sm:$0xff] %v1771_v16  }
 0x19c   : > { %1833 = vst [vmem:[%s3166_s6 + $0x30] sm:$0xff] %v1766_v21  }
 0x19d   : > { %v1913_v7 = vpop.f32.mrb[12].mxu1 }
 0x19e   : > { %v1344_v37 = vpop.f32.mrb[13].mxu1  ;;  %v1353_v27 = vadd.f32 %v1913_v7, %v3156_v39 }
 0x19f   : > { %v1914_v23 = vpop.f32.mrb[14].mxu1  ;;  %v1345_v63 = vadd.f32 %v3156_v39, %v1344_v37 }
 0x1a0   : > { %v1356_v4 = vadd.f32 %v1914_v23, %v3156_v39  ;;  %v1347_v55 = vpop.f32.mrb[15].mxu1 }
 0x1a1   : > { %v1348_v26 = vadd.f32 %v3156_v39, %v1347_v55 }
 0x1a2   : > { %v1811_v8 = vpack.c.bf16 %v1356_v4, %v1353_v27 }
 0x1a3   : > { %v1806_v43 = vpack.c.bf16 %v1348_v26, %v1345_v63 }
 0x1a4   : > { %1842 = vst [vmem:[%s3166_s6 + $0x78] sm:$0xff] %v1811_v8  }
 0x1a5   : > { %1841 = vst [vmem:[%s3166_s6 + $0x70] sm:$0xff] %v1806_v43  }
 0x1a6 PF: > { %s14_s15 = sadd.s32 1, %s1976_s15  }
 0x1a7   : > { %p11_p4 = scmp.ge.s32.totalorder %s14_s15, 4  }
 0x1a9   :  { %13 = sbr.rel (!%p11_p4) target bundleno = 1 (0x1), region = 67 }

// kernel: block_forward.3
= control target key start
LH: loop header
LB: loop body
LE: loop exit
PB: predicated region body
PF: predicated region fallthrough
CT: control target
= control target key end

     0   :  { %9 = vsyncpa [#allocation4], 0  ;;  %s3266_s0 = inlined_call_operand.hbm [shape: f32[2,16,16,64], index: 0, kind: input, shape index: {}]   ;;  %s3267_s1 = inlined_call_operand.vmem [shape: f32[9,64], index: 1, kind: input, shape index: {}]   ;;  %s3268_s2 = inlined_call_operand.vmem [shape: bf16[64,128], index: 2, kind: input, shape index: {}]   ;;  %s3269_s3 = inlined_call_operand.vmem [shape: f32[1,128], index: 3, kind: input, shape index: {}]   ;;  %s3270_s4 = inlined_call_operand.vmem [shape: bf16[2,256,128], index: 4, kind: output, shape index: {}]  }
   0x1   :  { %11 = vsyncpa [#allocation4 + $0x1], 0  ;;  %s2015_s15 = smov 0   ;;  %s2017_s16 = smov 0  }
   0x2   :  { %s2019_s17 = smov 0   ;;  %s2021_s18 = smov 0  }
   0x3 LB: > { %s2034_s19 = sadd.s32 4294967295, %s1984_s18   ;;  %s2037_s20 = sadd.s32 1, %s1984_s18   ;;  %s1984_s18 = sphi %s2021_s18, %s3369_s18   ;;  %s1980_s17 = sphi %s2019_s17, %s3368_s17   ;;  %s1976_s16 = sphi %s2017_s16, %s3367_s16   ;;  %s1972_s15 = sphi %s2015_s15, %s3366_s15  }
   0x4   : > { %s21_s21 = ssub.s32 %s1984_s18, %s2037_s20  ;;  %s24_s22 = sadd.s32 1, %s1980_s17 }
   0x5   : > { %p22_p0 = scmp.eq.s32.totalorder %s21_s21, 0  ;;  %p31_p1 = scmp.ne.s32.totalorder %s1980_s17, %s1976_s16 }
   0x6   : > { %p32_p2 = scmp.eq.s32.totalorder %s1984_s18, 0  ;;  %p37_p3 = scmp.ne.s32.totalorder %s1976_s16, %s1972_s15 }
   0x7   : > { %s2047_s23 = scalar_select %p22_p0, %s1980_s17, %s24_s22  }
   0x8   : > { %p33_p4 = por %p32_p2, %p31_p1  ;;  %p38_p5 = scmp.eq.s32.totalorder %s2034_s19, 0 }
   0x9   : > { %p1869_p6 = scmp.lt.s32.totalorder %s1984_s18, 2  ;;  %s159_s25 = sand.u32 1, %s1980_s17  }
   0xa   : > { %p2051_p7 = por %p38_p5, %p37_p3  ;;  %s1595_s26 = sshll.u32 %s159_s25, 8 }
   0xb   : > { %s1666_s27 = sshll.u32 %s1984_s18, 12  ;;  %s163_s5 = scalar_lea.vmem [#allocation3], %s1595_s26 }
   0xc   : > { %s2060_s30 = scalar_lea.hbm %s3266_s0, %s1666_s27  ;;  %s170_s6 = sshll.u32 %s163_s5, 4  ;;  %s2062_s6 = int_to_ptr.vmem [resolvable:$true] %s170_s6 }
   0xd   : > { %p2064_p8 = pnand %p1869_p6, %p33_p4  ;;  %s2069_s8 = scalar_lea.sflag [#allocation4], %s159_s25 }
   0xe   : > { %s1920_s9 = scalar_lea.hbm %s2060_s30, 4096  ;;  %s1925_s12 = scalar_lea.hbm %s3266_s0, 8192 }
   0xf   : > { %p1921_p10 = scmp.ne.s32.totalorder %s2060_s30, %s1920_s9  ;;  %p1922_p11 = pneg %p2064_p8 }
  0x10   : > { %p1926_p0 = scmp.lt.u32.totalorder %s2060_s30, %s3266_s0  ;;  %p1927_p1 = scmp.lt.u32.totalorder %s1925_s12, %s1920_s9 }
  0x11   : > { %p1923_p12 = pnand %p1922_p11, %p1921_p10  ;;  %p1929_p3 = scmp.lt.u32.totalorder %s1920_s9, %s2060_s30 }
  0x12   : > { %p1928_p2 = por %p1927_p1, %p1926_p0 }
  0x13   : > { %p1924_p13 = pneg %p1923_p12 }
  0x14   : > { %p1930_p4 = por %p1929_p3, %p1928_p2 }
  0x16   : > { %p1931_p5 = pnand %p1930_p4, %p1924_p13 }
  0x18   : > { %1934 = shalt.err (!%p1931_p5)
}
  0x19   : > { %s1935_s15 = scalar_lea.vmem %s2062_s6, 4096  ;;  %s1986_s21 = smov [#allocation3]  }
  0x1a   : > { %p1936_p6 = scmp.ne.s32.totalorder %s2062_s6, %s1935_s15  ;;  %s1940_s22 = sshll.u32 %s1986_s21, 4  ;;  %s1941_s22 = int_to_ptr.vmem [resolvable:$false] %s1940_s22 }
  0x1b   : > { %s1942_s25 = scalar_lea.vmem %s1941_s22, 8192  ;;  %p1943_p9 = scmp.lt.s32.totalorder %s2062_s6, %s1941_s22 }
  0x1c   : > { %p1938_p10 = pnand %p1936_p6, %p1922_p11  ;;  %p1944_p0 = scmp.lt.s32.totalorder %s1942_s25, %s1935_s15 }
  0x1e   : > { %p1939_p12 = pneg %p1938_p10  ;;  %p1945_p1 = por %p1944_p0, %p1943_p9 }
  0x20   : > { %p1946_p2 = pnand %p1945_p1, %p1939_p12 }
  0x22   : > { %1949 = shalt.err (!%p1946_p2)
}
  0x23   : > { %s1987_s26 = smov 128   ;;  %s1988_s27 = smov 8  }
  0x24   : > { %1868 = dma.hbm_to_vmem [thread:$0]  (!%p2064_p8), %s2060_s30, 4096, %s2062_s6, %s2069_s8, %s1987_s26, %s1987_s26, %s1988_s27  }
  0x25   : > { %p178_p11 = scmp.lt.s32.totalorder %s1984_s18, 3  ;;  %p3304_p13 = scmp.ge.s32.totalorder %s1984_s18, 1 }
  0x27   : > { %p179_p3 = pnand %p3304_p13, %p178_p11 }
  0x29   : > { %182 = sbr.rel (%p179_p3) target bundleno = 461 (0x1cd), region = 36 }
  0x30   : > { %s184_s28 = sand.u32 1, %s1976_s16  }
  0x31   : > { %s1599_s29 = sshll.u32 %s184_s28, 8  ;;  %s185_s5 = scalar_lea.sflag [#allocation4], %s184_s28 }
  0x32   : > { %s2101_s9 = scalar_lea.vmem [#allocation3], %s1599_s29 }
  0x33   : > { %1967 = dma.done.wait (%p2051_p7), %s185_s5, 4096  }
  0x34   : > { %1969 = vsyncadd (%p2051_p7), %s185_s5, 4294963200  ;;  %vm283_vm0 = vcmask 523264   ;;  %vm286_vm1 = vcmask 517120   ;;  %v1989_v0 = vmov 0.0   ;;  %v1905_v1 = vld [vmem:[%s3268_s2] sm:$0xff]   ;;  %v1906_v2 = vld [vmem:[%s3268_s2 + $0x8] sm:$0xff]  }
  0x35   : > { %284 = vst.msk [vmem:[#allocation2] sm:$0xff] %vm283_vm0, %v1989_v0  ;;  %285 = vst.msk [vmem:[#allocation2 + $0x8] sm:$0xff] %vm283_vm0, %v1989_v0  ;;  %1815 = vmatprep.subr.bf16.mxu0 %v1905_v1  ;;  %1855 = vmatprep.subr.bf16.mxu1 %v1905_v1  ;;  %v1907_v3 = vld [vmem:[%s3268_s2 + $0x10] sm:$0xff]   ;;  %v220_v5 = vld [vmem:[%s2101_s9 + $0x8] sm:$0xff]  ;;  %p213_p7 = scmp.lt.s32.totalorder %s2034_s19, 1 }
  0x36   : > { %287 = vst.msk [vmem:[#allocation2 + $0x10] sm:$0x3] %vm286_vm1, %v1989_v0  ;;  %290 = vst.msk [vmem:[#allocation2 + $0x28] sm:$0x3] %vm286_vm1, %v1989_v0  ;;  %1816 = vmatpush3.bf16.msra.mxu0 %v1905_v1  ;;  %1859 = vmatpush3.bf16.msra.mxu1 %v1905_v1  ;;  %v219_v4 = vld [vmem:[%s2101_s9] sm:$0xff]  ;;  %v221_v6 = vld [vmem:[%s2101_s9 + $0x10] sm:$0xff] }
  0x37   : > { %288 = vst.msk [vmem:[#allocation2 + $0x18] sm:$0xff] %vm283_vm0, %v1989_v0  ;;  %289 = vst.msk [vmem:[#allocation2 + $0x20] sm:$0xff] %vm283_vm0, %v1989_v0  ;;  %1817 = vmatprep.subr.bf16.mxu0 %v1906_v2  ;;  %1856 = vmatprep.subr.bf16.mxu1 %v1906_v2  ;;  %v222_v7 = vld [vmem:[%s2101_s9 + $0x18] sm:$0xff]  ;;  %v223_v8 = vld [vmem:[%s2101_s9 + $0x20] sm:$0xff]  ;;  %v251_v10 = vmax.f32 %v219_v4, 0.0  ;;  %v252_v11 = vmax.f32 %v220_v5, 0.0 }
  0x38   : > { %291 = vst.msk [vmem:[#allocation2 + $0x30] sm:$0xff] %vm283_vm0, %v1989_v0  ;;  %292 = vst.msk [vmem:[#allocation2 + $0x38] sm:$0xff] %vm283_vm0, %v1989_v0  ;;  %v224_v9 = vld [vmem:[%s2101_s9 + $0x28] sm:$0xff]  ;;  %v253_v12 = vmax.f32 %v221_v6, 0.0  ;;  %v225_v13 = vld [vmem:[%s2101_s9 + $0x30] sm:$0xff]  ;;  %v254_v15 = vmax.f32 %v222_v7, 0.0 }
  0x39   : > { %293 = vst.msk [vmem:[#allocation2 + $0x40] sm:$0x3] %vm286_vm1, %v1989_v0  ;;  %296 = vst.msk [vmem:[#allocation2 + $0x58] sm:$0x3] %vm286_vm1, %v1989_v0  ;;  %v226_v14 = vld [vmem:[%s2101_s9 + $0x38] sm:$0xff]  ;;  %v255_v16 = vmax.f32 %v223_v8, 0.0 }
  0x3a   : > { %294 = vst.msk [vmem:[#allocation2 + $0x48] sm:$0xff] %vm283_vm0, %v1989_v0  ;;  %295 = vst.msk [vmem:[#allocation2 + $0x50] sm:$0xff] %vm283_vm0, %v1989_v0  ;;  %v256_v17 = vmax.f32 %v224_v9, 0.0  ;;  %1818 = vmatpush3.bf16.msra.mxu0 %v1906_v2  ;;  %1860 = vmatpush3.bf16.msra.mxu1 %v1906_v2  ;;  %v1908_v18 = vld [vmem:[%s3268_s2 + $0x18] sm:$0xff]   ;;  %v257_v19 = vmax.f32 %v225_v13, 0.0  ;;  %v258_v20 = vmax.f32 %v226_v14, 0.0 }
  0x3b   : > { %297 = vst.msk [vmem:[#allocation2 + $0x60] sm:$0xff] %vm283_vm0, %v1989_v0  ;;  %298 = vst.msk [vmem:[#allocation2 + $0x68] sm:$0xff] %vm283_vm0, %v1989_v0  ;;  %1819 = vmatprep.subr.bf16.mxu0 %v1907_v3  ;;  %1857 = vmatprep.subr.bf16.mxu1 %v1907_v3  ;;  %v2190_v23 = vld [vmem:[%s3267_s1] ss:$0 sm:$0xff]  ;;  %v2197_v26 = vld [vmem:[%s3267_s1 + $0x1] ss:$0 sm:$0xff] }
  0x3c   : > { %299 = vst.msk [vmem:[#allocation2 + $0x70] sm:$0x3] %vm286_vm1, %v1989_v0  ;;  %302 = vst.msk [vmem:[#allocation2 + $0x88] sm:$0x3] %vm286_vm1, %v1989_v0  ;;  %v372_v21 = vld [vmem:[#allocation2] sm:$0xff]  ;;  %v373_v22 = vld [vmem:[#allocation2 + $0x8] sm:$0xff] }
  0x3d   : > { %300 = vst.msk [vmem:[#allocation2 + $0x78] sm:$0xff] %vm283_vm0, %v1989_v0  ;;  %301 = vst.msk [vmem:[#allocation2 + $0x80] sm:$0xff] %vm283_vm0, %v1989_v0  ;;  %v615_v24 = vld [vmem:[#allocation2 + $0x1] sm:$0xff]  ;;  %v616_v25 = vld [vmem:[#allocation2 + $0x9] sm:$0xff]  ;;  %v413_v29 = vmul.f32 %v2190_v23, %v372_v21  ;;  %v414_v33 = vmul.f32 %v2190_v23, %v373_v22  ;;  %s3371_s19 = smov (!%p213_p7, %s2034_s19), 1 }
  0x3e   : > { %303 = vst.msk [vmem:[#allocation2 + $0x90] sm:$0xff] %vm283_vm0, %v1989_v0  ;;  %304 = vst.msk [vmem:[#allocation2 + $0x98] sm:$0xff] %vm283_vm0, %v1989_v0  ;;  %v858_v27 = vld [vmem:[#allocation2 + $0x2] sm:$0xff]  ;;  %1820 = vmatpush3.bf16.msra.mxu0 %v1907_v3  ;;  %1861 = vmatpush3.bf16.msra.mxu1 %v1907_v3  ;;  %v859_v31 = vld [vmem:[#allocation2 + $0xa] sm:$0xff]  ;;  %v2218_v35 = vmul.f32 %v2197_v26, %v615_v24  ;;  %v2221_v36 = vmul.f32 %v2197_v26, %v616_v25  ;;  %s1667_s8 = sshll.u32 %s3371_s19, 7 }
  0x3f   : > { %305 = vst.msk [vmem:[#allocation2 + $0xa0] sm:$0x3] %vm286_vm1, %v1989_v0  ;;  %308 = vst.msk [vmem:[#allocation2 + $0xb8] sm:$0x3] %vm286_vm1, %v1989_v0  ;;  %v2202_v28 = vld [vmem:[%s3267_s1 + $0x2] ss:$0 sm:$0xff]  ;;  %1821 = vmatprep.subr.bf16.mxu0 %v1908_v18  ;;  %1858 = vmatprep.subr.bf16.mxu1 %v1908_v18  ;;  %s3206_s12 = scalar_lea.vmem %s3270_s4, %s1667_s8 }
  0x40   : > { %306 = vst.msk [vmem:[#allocation2 + $0xa8] sm:$0xff] %vm283_vm0, %v1989_v0  ;;  %307 = vst.msk [vmem:[#allocation2 + $0xb0] sm:$0xff] %vm283_vm0, %v1989_v0  ;;  %v2208_v30 = vld [vmem:[%s3267_s1 + $0x3] ss:$0 sm:$0xff]  ;;  %v2215_v34 = vld [vmem:[%s3267_s1 + $0x6] ss:$0 sm:$0xff]  ;;  %v2227_v41 = vmul.f32 %v2202_v28, %v858_v27  ;;  %v2233_v51 = vmul.f32 %v2202_v28, %v859_v31 }
  0x41   : > { %309 = vst.msk [vmem:[#allocation2 + $0xc0] sm:$0xff] %vm283_vm0, %v1989_v0  ;;  %310 = vst.msk [vmem:[#allocation2 + $0xc8] sm:$0xff] %vm283_vm0, %v1989_v0  ;;  %v233_v32 = vld [vmem:[%s2101_s9 + $0x70] sm:$0xff]  ;;  %v234_v37 = vld [vmem:[%s2101_s9 + $0x78] sm:$0xff] }
  0x42   : > { %311 = vst.msk [vmem:[#allocation2 + $0xd0] sm:$0x3] %vm286_vm1, %v1989_v0  ;;  %314 = vst.msk [vmem:[#allocation2 + $0xe8] sm:$0x3] %vm286_vm1, %v1989_v0  ;;  %v235_v38 = vld [vmem:[%s2101_s9 + $0x80] sm:$0xff]  ;;  %v236_v39 = vld [vmem:[%s2101_s9 + $0x88] sm:$0xff]  ;;  %1822 = vmatpush3.bf16.msra.mxu0 %v1908_v18  ;;  %1862 = vmatpush3.bf16.msra.mxu1 %v1908_v18 }
  0x43   : > { %312 = vst.msk [vmem:[#allocation2 + $0xd8] sm:$0xff] %vm283_vm0, %v1989_v0  ;;  %313 = vst.msk [vmem:[#allocation2 + $0xe0] sm:$0xff] %vm283_vm0, %v1989_v0  ;;  %v265_v40 = vmax.f32 %v233_v32, 0.0  ;;  %v237_v42 = vld [vmem:[%s2101_s9 + $0x90] sm:$0xff]  ;;  %v238_v43 = vld [vmem:[%s2101_s9 + $0x98] sm:$0xff]  ;;  %v266_v45 = vmax.f32 %v234_v37, 0.0 }
  0x44   : > { %315 = vst.msk [vmem:[#allocation2 + $0xf0] sm:$0xff] %vm283_vm0, %v1989_v0  ;;  %316 = vst.msk [vmem:[#allocation2 + $0xf8] sm:$0xff] %vm283_vm0, %v1989_v0  ;;  %v239_v44 = vld [vmem:[%s2101_s9 + $0xa0] sm:$0xff]  ;;  %v267_v46 = vmax.f32 %v235_v38, 0.0  ;;  %v268_v47 = vmax.f32 %v236_v39, 0.0  ;;  %v269_v52 = vmax.f32 %v237_v42, 0.0 }
  0x45   : > { %317 = vst.msk [vmem:[#allocation2 + $0x100] sm:$0x3] %vm286_vm1, %v1989_v0  ;;  %320 = vst.msk [vmem:[#allocation2 + $0x118] sm:$0x3] %vm286_vm1, %v1989_v0  ;;  %v270_v53 = vmax.f32 %v238_v43, 0.0  ;;  %v271_v54 = vmax.f32 %v239_v44, 0.0 }
  0x46   : > { %318 = vst.msk [vmem:[#allocation2 + $0x108] sm:$0xff] %vm283_vm0, %v1989_v0  ;;  %319 = vst.msk [vmem:[#allocation2 + $0x110] sm:$0xff] %vm283_vm0, %v1989_v0  ;;  %v2277_v31 = vld [vmem:[%s3267_s1 + $0x4] ss:$0 sm:$0xff] }
  0x47   : > { %321 = vst.msk [vmem:[#allocation2 + $0x120] sm:$0xff] %vm283_vm0, %v1989_v0  ;;  %322 = vst.msk [vmem:[#allocation2 + $0x128] sm:$0xff] %vm283_vm0, %v1989_v0 }
  0x48   : > { %323 = vst.msk [vmem:[#allocation2 + $0x130] sm:$0x3] %vm286_vm1, %v1989_v0  ;;  %326 = vst.msk [vmem:[#allocation2 + $0x148] sm:$0x3] %vm286_vm1, %v1989_v0 }
  0x49   : > { %324 = vst.msk [vmem:[#allocation2 + $0x138] sm:$0xff] %vm283_vm0, %v1989_v0  ;;  %325 = vst.msk [vmem:[#allocation2 + $0x140] sm:$0xff] %vm283_vm0, %v1989_v0 }
  0x4a   : > { %327 = vst.msk [vmem:[#allocation2 + $0x150] sm:$0xff] %vm283_vm0, %v1989_v0  ;;  %328 = vst.msk [vmem:[#allocation2 + $0x158] sm:$0xff] %vm283_vm0, %v1989_v0 }
  0x4b   : > { %329 = vst.msk [vmem:[#allocation2 + $0x160] sm:$0x3] %vm286_vm1, %v1989_v0  ;;  %332 = vst.msk [vmem:[#allocation2 + $0x178] sm:$0x3] %vm286_vm1, %v1989_v0 }
  0x4c   : > { %330 = vst.msk [vmem:[#allocation2 + $0x168] sm:$0xff] %vm283_vm0, %v1989_v0  ;;  %331 = vst.msk [vmem:[#allocation2 + $0x170] sm:$0xff] %vm283_vm0, %v1989_v0 }
  0x4d   : > { %333 = vst.msk [vmem:[#allocation2 + $0x180] sm:$0xff] %vm283_vm0, %v1989_v0  ;;  %334 = vst.msk [vmem:[#allocation2 + $0x188] sm:$0xff] %vm283_vm0, %v1989_v0 }
  0x4e   : > { %335 = vst.msk [vmem:[#allocation2 + $0x190] sm:$0x3] %vm286_vm1, %v1989_v0  ;;  %338 = vst.msk [vmem:[#allocation2 + $0x1a8] sm:$0x3] %vm286_vm1, %v1989_v0 }
  0x4f   : > { %336 = vst.msk [vmem:[#allocation2 + $0x198] sm:$0xff] %vm283_vm0, %v1989_v0  ;;  %337 = vst.msk [vmem:[#allocation2 + $0x1a0] sm:$0xff] %vm283_vm0, %v1989_v0 }
  0x50   : > { %340 = vst.msk [vmem:[#allocation2 + $0x19] sm:$0xff] %vm283_vm0, %v251_v10  ;;  %341 = vst.msk [vmem:[#allocation2 + $0x21] sm:$0xff] %vm283_vm0, %v252_v11 }
  0x51   : > { %342 = vst.msk [vmem:[#allocation2 + $0x31] sm:$0xff] %vm283_vm0, %v253_v12  ;;  %343 = vst.msk [vmem:[#allocation2 + $0x39] sm:$0xff] %vm283_vm0, %v254_v15 }
  0x52   : > { %344 = vst.msk [vmem:[#allocation2 + $0x49] sm:$0xff] %vm283_vm0, %v255_v16  ;;  %345 = vst.msk [vmem:[#allocation2 + $0x51] sm:$0xff] %vm283_vm0, %v256_v17 }
  0x53   : > { %346 = vst.msk [vmem:[#allocation2 + $0x61] sm:$0xff] %vm283_vm0, %v257_v19  ;;  %347 = vst.msk [vmem:[#allocation2 + $0x69] sm:$0xff] %vm283_vm0, %v258_v20 }
  0x54   : > { %3305 = vst [vmem:[#allocation6_spill] sm:$0xff] %v2197_v26  ;;  %354 = vst.msk [vmem:[#allocation2 + $0xc1] sm:$0xff] %vm283_vm0, %v265_v40 }
  0x55   : > { %355 = vst.msk [vmem:[#allocation2 + $0xc9] sm:$0xff] %vm283_vm0, %v266_v45  ;;  %356 = vst.msk [vmem:[#allocation2 + $0xd9] sm:$0xff] %vm283_vm0, %v267_v46 }
  0x56   : > { %357 = vst.msk [vmem:[#allocation2 + $0xe1] sm:$0xff] %vm283_vm0, %v268_v47  ;;  %358 = vst.msk [vmem:[#allocation2 + $0xf1] sm:$0xff] %vm283_vm0, %v269_v52 }
  0x57   : > { %v374_v48 = vld [vmem:[#allocation2 + $0x18] sm:$0xff]  ;;  %v375_v49 = vld [vmem:[#allocation2 + $0x20] sm:$0xff]  ;;  %359 = vst.msk [vmem:[#allocation2 + $0xf9] sm:$0xff] %vm283_vm0, %v270_v53  ;;  %360 = vst.msk [vmem:[#allocation2 + $0x109] sm:$0xff] %vm283_vm0, %v271_v54 }
  0x58   : > { %v376_v50 = vld [vmem:[#allocation2 + $0x30] sm:$0xff]  ;;  %v377_v55 = vld [vmem:[#allocation2 + $0x38] sm:$0xff]  ;;  %v415_v56 = vmul.f32 %v2190_v23, %v374_v48  ;;  %v416_v57 = vmul.f32 %v2190_v23, %v375_v49  ;;  %v482_v62 = vmul.f32 %v2208_v30, %v374_v48  ;;  %v483_v63 = vmul.f32 %v2208_v30, %v375_v49  ;;  %v618_v12 = vld [vmem:[#allocation2 + $0x21] sm:$0xff] }
  0x59   : > { %v417_v58 = vmul.f32 %v2190_v23, %v376_v50  ;;  %v2242_v59 = vld [vmem:[#allocation2 + $0x48] sm:$0xff]  ;;  %v2244_v60 = vld [vmem:[#allocation2 + $0x50] sm:$0xff]  ;;  %v418_v61 = vmul.f32 %v2190_v23, %v377_v55  ;;  %v484_v0 = vmul.f32 %v2208_v30, %v376_v50  ;;  %v485_v3 = vmul.f32 %v2208_v30, %v377_v55  ;;  %v617_v11 = vld [vmem:[#allocation2 + $0x19] sm:$0xff] }
  0x5a   : > { %v2253_v1 = vld [vmem:[#allocation2 + $0x60] sm:$0xff]  ;;  %v2255_v2 = vld [vmem:[#allocation2 + $0x68] sm:$0xff]  ;;  %v486_v4 = vmul.f32 %v2208_v30, %v2242_v59  ;;  %v487_v5 = vmul.f32 %v2208_v30, %v2244_v60  ;;  %v551_v6 = vmul.f32 %v2215_v34, %v376_v50  ;;  %v514_v7 = vadd.f32 %v482_v62, %v413_v29  ;;  %v619_v24 = vld [vmem:[#allocation2 + $0x31] sm:$0xff] }
  0x5b   : > { %v515_v8 = vadd.f32 %v483_v63, %v414_v33  ;;  %v516_v9 = vadd.f32 %v484_v0, %v415_v56  ;;  %v552_v10 = vmul.f32 %v2215_v34, %v377_v55  ;;  %v517_v13 = vadd.f32 %v485_v3, %v416_v57  ;;  %v620_v25 = vld [vmem:[#allocation2 + $0x39] sm:$0xff]  ;;  %v621_v38 = vld [vmem:[#allocation2 + $0x49] sm:$0xff]  ;;  %v622_v39 = vld [vmem:[#allocation2 + $0x51] sm:$0xff] }
  0x5c   : > { %v518_v14 = vadd.f32 %v486_v4, %v417_v58  ;;  %v519_v15 = vadd.f32 %v487_v5, %v418_v61  ;;  %v553_v16 = vmul.f32 %v2215_v34, %v2242_v59  ;;  %v554_v17 = vmul.f32 %v2215_v34, %v2244_v60  ;;  %v2279_v40 = vld [vmem:[#allocation2 + $0x61] sm:$0xff]  ;;  %v2282_v43 = vld [vmem:[#allocation2 + $0x69] sm:$0xff] }
  0x5d   : > { %v555_v18 = vmul.f32 %v2215_v34, %v2253_v1  ;;  %v556_v19 = vmul.f32 %v2215_v34, %v2255_v2  ;;  %v583_v20 = vadd.f32 %v551_v6, %v514_v7  ;;  %v584_v21 = vadd.f32 %v552_v10, %v515_v8  ;;  %v2304_v53 = vld [vmem:[%s3267_s1 + $0x7] ss:$0 sm:$0xff]  ;;  %v860_v4 = vld [vmem:[#allocation2 + $0x1a] sm:$0xff] }
  0x5e   : > { %v585_v22 = vadd.f32 %v553_v16, %v516_v9  ;;  %v658_v27 = vmul.f32 %v2197_v26, %v617_v11  ;;  %v659_v29 = vmul.f32 %v2197_v26, %v618_v12  ;;  %v586_v32 = vadd.f32 %v554_v17, %v517_v13  ;;  %v861_v9 = vld [vmem:[#allocation2 + $0x22] sm:$0xff] }
  0x5f   : > { %v587_v33 = vadd.f32 %v555_v18, %v518_v14  ;;  %v588_v37 = vadd.f32 %v556_v19, %v519_v15  ;;  %v660_v42 = vmul.f32 %v2197_v26, %v619_v24  ;;  %v661_v44 = vmul.f32 %v2197_v26, %v620_v25  ;;  %v2324_v18 = vld [vmem:[%s3267_s1 + $0x5] ss:$0 sm:$0xff] }
  0x60   : > { %v2286_v45 = vmul.f32 %v2197_v26, %v621_v38  ;;  %v2289_v46 = vmul.f32 %v2197_v26, %v622_v39  ;;  %v2293_v47 = vmul.f32 %v2197_v26, %v2279_v40  ;;  %v2297_v48 = vmul.f32 %v2197_v26, %v2282_v43 }
  0x61   : > { %v688_v49 = vadd.f32 %v2218_v35, %v583_v20  ;;  %v689_v50 = vadd.f32 %v2221_v36, %v584_v21  ;;  %v690_v52 = vadd.f32 %v658_v27, %v585_v22  ;;  %v691_v54 = vadd.f32 %v659_v29, %v586_v32  ;;  %v862_v22 = vld [vmem:[#allocation2 + $0x32] sm:$0xff] }
  0x62   : > { %3306 = vst [vmem:[#allocation7_spill] sm:$0xff] %v2286_v45  ;;  %3307 = vst [vmem:[#allocation8_spill] sm:$0xff] %v2289_v46  ;;  %v692_v55 = vadd.f32 %v660_v42, %v587_v33  ;;  %v693_v56 = vadd.f32 %v661_v44, %v588_v37  ;;  %v725_v57 = vmul.f32 %v2277_v31, %v617_v11  ;;  %v2333_v37 = vld [vmem:[%s3267_s1 + $0x8] ss:$0 sm:$0xff] }
  0x63   : > { %3308 = vst [vmem:[#allocation9_spill] sm:$0xff] %v2293_v47  ;;  %3309 = vst [vmem:[#allocation10_spill] sm:$0xff] %v2297_v48  ;;  %v726_v58 = vmul.f32 %v2277_v31, %v618_v12  ;;  %v727_v61 = vmul.f32 %v2277_v31, %v619_v24  ;;  %v728_v62 = vmul.f32 %v2277_v31, %v620_v25  ;;  %v2471_v46 = vld [vmem:[#allocation2 + $0xe2] sm:$0xff] }
  0x64   : > { %v729_v35 = vmul.f32 %v2277_v31, %v621_v38  ;;  %v730_v36 = vmul.f32 %v2277_v31, %v622_v39  ;;  %v757_v63 = vadd.f32 %v725_v57, %v688_v49  ;;  %v794_v0 = vmul.f32 %v2304_v53, %v619_v24  ;;  %v863_v24 = vld [vmem:[#allocation2 + $0x3a] sm:$0xff]  ;;  %3325 = vst [vmem:[#allocation26_spill] sm:$0xff] %v2471_v46 }
  0x65   : > { %v795_v3 = vmul.f32 %v2304_v53, %v620_v25  ;;  %v758_v5 = vadd.f32 %v726_v58, %v689_v50  ;;  %v759_v6 = vadd.f32 %v727_v61, %v690_v52  ;;  %v760_v7 = vadd.f32 %v728_v62, %v691_v54  ;;  %v240_v49 = vld [vmem:[%s2101_s9 + $0xa8] sm:$0xff]  ;;  %v241_v50 = vld [vmem:[%s2101_s9 + $0xb0] sm:$0xff]  ;;  %v242_v52 = vld [vmem:[%s2101_s9 + $0xb8] sm:$0xff] }
  0x66   : > { %v761_v8 = vadd.f32 %v729_v35, %v692_v55  ;;  %v762_v10 = vadd.f32 %v730_v36, %v693_v56  ;;  %v796_v11 = vmul.f32 %v2304_v53, %v621_v38  ;;  %v797_v12 = vmul.f32 %v2304_v53, %v622_v39  ;;  %v2352_v57 = vld [vmem:[#allocation2 + $0xc0] sm:$0xff]  ;;  %v390_v58 = vld [vmem:[#allocation2 + $0xd8] sm:$0xff] }
  0x67   : > { %v798_v13 = vmul.f32 %v2304_v53, %v2279_v40  ;;  %v799_v14 = vmul.f32 %v2304_v53, %v2282_v43  ;;  %v826_v15 = vadd.f32 %v794_v0, %v757_v63  ;;  %v827_v16 = vadd.f32 %v795_v3, %v758_v5  ;;  %3310 = vst [vmem:[#allocation11_spill] sm:$0xff] %v2352_v57  ;;  %v391_v63 = vld [vmem:[#allocation2 + $0xe0] sm:$0xff] }
  0x68   : > { %v901_v17 = vmul.f32 %v2202_v28, %v860_v4  ;;  %v828_v19 = vadd.f32 %v796_v11, %v759_v6  ;;  %v829_v20 = vadd.f32 %v797_v12, %v760_v7  ;;  %v902_v25 = vmul.f32 %v2202_v28, %v861_v9  ;;  %v392_v7 = vld [vmem:[#allocation2 + $0xf0] sm:$0xff] }
  0x69   : > { %v830_v21 = vadd.f32 %v798_v13, %v761_v8  ;;  %v831_v27 = vadd.f32 %v799_v14, %v762_v10  ;;  %v903_v29 = vmul.f32 %v2202_v28, %v862_v22  ;;  %v904_v32 = vmul.f32 %v2202_v28, %v863_v24  ;;  %v393_v8 = vld [vmem:[#allocation2 + $0xf8] sm:$0xff]  ;;  %v2371_v13 = vld [vmem:[#allocation2 + $0x108] sm:$0xff] }
  0x6a   : > { %v931_v33 = vadd.f32 %v2227_v41, %v826_v15  ;;  %v932_v38 = vadd.f32 %v2233_v51, %v827_v16  ;;  %v2336_v39 = vadd.f32 %v901_v17, %v828_v19  ;;  %v2338_v42 = vadd.f32 %v902_v25, %v829_v20  ;;  %v2354_v51 = vld [vmem:[#allocation2 + $0xc8] sm:$0xff]  ;;  %v2392_v25 = vld [vmem:[#allocation2 + $0xd9] sm:$0xff] }
  0x6b   : > { %v968_v44 = vmul.f32 %v2324_v18, %v860_v4  ;;  %v2344_v54 = vadd.f32 %v903_v29, %v830_v21  ;;  %v2346_v55 = vadd.f32 %v904_v32, %v831_v27  ;;  %v969_v41 = vmul.f32 %v2324_v18, %v861_v9  ;;  %3311 = vst [vmem:[#allocation12_spill] sm:$0xff] %v2354_v51 }
  0x6c   : > { %v2350_v56 = vmul.f32 %v2324_v18, %v862_v22  ;;  %v2357_v61 = vmul.f32 %v2324_v18, %v863_v24  ;;  %v1037_v35 = vmul.f32 %v2333_v37, %v862_v22  ;;  %v1038_v36 = vmul.f32 %v2333_v37, %v863_v24  ;;  %v2388_v22 = vld [vmem:[#allocation2 + $0xc1] sm:$0xff]  ;;  %v2390_v24 = vld [vmem:[#allocation2 + $0xc9] sm:$0xff]  ;;  %3316 = vst [vmem:[#allocation17_spill] sm:$0xff] %v2392_v25 }
  0x6d   : > { %v1000_v62 = vadd.f32 %v968_v44, %v931_v33  ;;  %v1001_v0 = vadd.f32 %v969_v41, %v932_v38  ;;  %v272_v3 = vmax.f32 %v240_v49, 0.0  ;;  %v273_v4 = vmax.f32 %v241_v50, 0.0  ;;  %3314 = vst [vmem:[#allocation15_spill] sm:$0xff] %v2388_v22  ;;  %3315 = vst [vmem:[#allocation16_spill] sm:$0xff] %v2390_v24  ;;  %v2402_v38 = vld [vmem:[#allocation2 + $0xe1] sm:$0xff]  ;;  %v635_v41 = vld [vmem:[#allocation2 + $0xf1] sm:$0xff] }
  0x6e   : > { %v274_v5 = vmax.f32 %v242_v52, 0.0  ;;  %v429_v9 = vmul.f32 %v2190_v23, %v2352_v57  ;;  %v430_v10 = vmul.f32 %v2190_v23, %v2354_v51  ;;  %v2366_v11 = vmul.f32 %v2190_v23, %v390_v58  ;;  %3317 = vst [vmem:[#allocation18_spill] sm:$0xff] %v2402_v38 }
  0x6f   : > { %v1069_v6 = vadd.f32 %v1037_v35, %v1000_v62  ;;  %v1070_v12 = vadd.f32 %v1038_v36, %v1001_v0  ;;  %361 = vst.msk [vmem:[#allocation2 + $0x111] sm:$0xff] %vm283_vm0, %v272_v3  ;;  %362 = vst.msk [vmem:[#allocation2 + $0x121] sm:$0xff] %vm283_vm0, %v273_v4  ;;  %v2374_v14 = vmul.f32 %v2190_v23, %v391_v63  ;;  %v636_v62 = vld [vmem:[#allocation2 + $0xf9] sm:$0xff] }
  0x70   : > { %363 = vst.msk [vmem:[#allocation2 + $0x129] sm:$0xff] %vm283_vm0, %v274_v5  ;;  %v433_v15 = vmul.f32 %v2190_v23, %v392_v7  ;;  %v434_v16 = vmul.f32 %v2190_v23, %v393_v8  ;;  %v2380_v17 = vmul.f32 %v2208_v30, %v2352_v57  ;;  %v2384_v19 = vmul.f32 %v2208_v30, %v2354_v51 }
  0x71   : > { %v498_v20 = vmul.f32 %v2208_v30, %v390_v58  ;;  %v499_v21 = vmul.f32 %v2208_v30, %v391_v63  ;;  %v1101_v27 = vpack.c.bf16 %v1070_v12, %v1069_v6  ;;  %v2395_v29 = vmul.f32 %v2208_v30, %v392_v7  ;;  %v2420_v6 = vld [vmem:[#allocation2 + $0x109] sm:$0xff] }
  0x72   : > { %3312 = vst [vmem:[#allocation13_spill] sm:$0xff] %v2380_v17  ;;  %3313 = vst [vmem:[#allocation14_spill] sm:$0xff] %v2384_v19  ;;  %v2398_v32 = vmul.f32 %v2208_v30, %v393_v8  ;;  %v502_v33 = vmul.f32 %v2208_v30, %v2371_v13  ;;  %v567_v50 = vmul.f32 %v2215_v34, %v392_v7  ;;  %v2430_v12 = vld [vmem:[#allocation2 + $0xc2] sm:$0xff] }
  0x73   : > { %v530_v44 = vadd.f32 %v498_v20, %v429_v9  ;;  %v531_v49 = vadd.f32 %v499_v21, %v430_v10  ;;  %v568_v52 = vmul.f32 %v2215_v34, %v393_v8  ;;  %1823 = vmatprep.mubr.msk.bf16.mxu0 %vm283_vm0, %v1101_v27  ;;  %v672_v35 = vmul.f32 %v2197_v26, %v2388_v22  ;;  %v2466_v22 = vld [vmem:[#allocation2 + $0xca] sm:$0xff] }
  0x74   : > { %v534_v58 = vadd.f32 %v502_v33, %v433_v15  ;;  %v673_v36 = vmul.f32 %v2197_v26, %v2390_v24  ;;  %v2413_v63 = vmul.f32 %v2197_v26, %v2392_v25  ;;  %v2417_v4 = vmul.f32 %v2197_v26, %v2402_v38  ;;  %3318 = vst [vmem:[#allocation19_spill] sm:$0xff] %v2430_v12 }
  0x75   : > { %v599_v0 = vadd.f32 %v567_v50, %v530_v44  ;;  %v600_v3 = vadd.f32 %v568_v52, %v531_v49  ;;  %v676_v5 = vmul.f32 %v2197_v26, %v635_v41  ;;  %v677_v7 = vmul.f32 %v2197_v26, %v636_v62  ;;  %3323 = vst [vmem:[#allocation24_spill] sm:$0xff] %v2466_v22 }
  0x76   : > { %v741_v8 = vmul.f32 %v2277_v31, %v2392_v25  ;;  %v742_v9 = vmul.f32 %v2277_v31, %v2402_v38  ;;  %v2428_v10 = vmul.f32 %v2277_v31, %v635_v41  ;;  %v2432_v15 = vld [vmem:[#allocation2 + $0x110] sm:$0xff]  ;;  %v2434_v20 = vld [vmem:[#allocation2 + $0x120] sm:$0xff]  ;;  %v2439_v44 = vmul.f32 %v2277_v31, %v636_v62 }
  0x77   : > { %v2436_v21 = vld [vmem:[#allocation2 + $0x128] sm:$0xff]  ;;  %v704_v27 = vadd.f32 %v672_v35, %v599_v0  ;;  %v705_v33 = vadd.f32 %v673_v36, %v600_v3  ;;  %v745_v49 = vmul.f32 %v2277_v31, %v2420_v6  ;;  %v503_v50 = vmul.f32 %v2208_v30, %v2432_v15  ;;  %v2449_v25 = vld [vmem:[#allocation2 + $0x111] sm:$0xff] }
  0x78   : > { %v571_v52 = vmul.f32 %v2215_v34, %v2434_v20  ;;  %v572_v38 = vmul.f32 %v2215_v34, %v2436_v21  ;;  %v2451_v19 = vld [vmem:[#allocation2 + $0x121] sm:$0xff]  ;;  %v2453_v35 = vld [vmem:[#allocation2 + $0x129] sm:$0xff]  ;;  %v810_v36 = vmul.f32 %v2304_v53, %v635_v41  ;;  %v746_v17 = vmul.f32 %v2277_v31, %v2449_v25 }
  0x79   : > { %3319 = vst [vmem:[#allocation20_spill] sm:$0xff] %v2451_v19  ;;  %3320 = vst [vmem:[#allocation21_spill] sm:$0xff] %v2453_v35  ;;  %v2458_v0 = vmul.f32 %v2197_v26, %v2451_v19  ;;  %v2462_v3 = vmul.f32 %v2197_v26, %v2453_v35  ;;  %v773_v24 = vadd.f32 %v741_v8, %v704_v27  ;;  %v2469_v41 = vld [vmem:[#allocation2 + $0xda] sm:$0xff] }
  0x7a   : > { %v535_v51 = vadd.f32 %v503_v50, %v434_v16  ;;  %v603_v57 = vadd.f32 %v571_v52, %v534_v58  ;;  %v774_v48 = vadd.f32 %v742_v9, %v705_v33  ;;  %v811_v47 = vmul.f32 %v2304_v53, %v636_v62  ;;  %3324 = vst [vmem:[#allocation25_spill] sm:$0xff] %v2469_v41  ;;  %v878_v9 = vld [vmem:[#allocation2 + $0xf2] sm:$0xff]  ;;  %v879_v33 = vld [vmem:[#allocation2 + $0xfa] sm:$0xff] }
  0x7b   : > { %3321 = vst [vmem:[#allocation22_spill] sm:$0xff] %v2458_v0  ;;  %3322 = vst [vmem:[#allocation23_spill] sm:$0xff] %v2462_v3  ;;  %v814_v0 = vmul.f32 %v2304_v53, %v2451_v19  ;;  %v815_v3 = vmul.f32 %v2304_v53, %v2453_v35  ;;  %v842_v45 = vadd.f32 %v810_v36, %v773_v24  ;;  %v2501_v35 = vld [vmem:[#allocation2 + $0x4a] sm:$0xff]  ;;  %v2503_v19 = vld [vmem:[#allocation2 + $0x52] sm:$0xff] }
  0x7c   : > { %v915_v8 = vmul.f32 %v2202_v28, %v2430_v12  ;;  %v604_v27 = vadd.f32 %v572_v38, %v535_v51  ;;  %v708_v16 = vadd.f32 %v676_v5, %v603_v57  ;;  %v843_v58 = vadd.f32 %v811_v47, %v774_v48 }
  0x7d   : > { %v916_v62 = vmul.f32 %v2202_v28, %v2466_v22  ;;  %v2483_v50 = vmul.f32 %v2202_v28, %v2469_v41  ;;  %v2487_v52 = vmul.f32 %v2202_v28, %v2471_v46  ;;  %v919_v24 = vmul.f32 %v2202_v28, %v878_v9 }
  0x7e   : > { %v920_v36 = vmul.f32 %v2202_v28, %v879_v33  ;;  %v709_v51 = vadd.f32 %v677_v7, %v604_v27  ;;  %v777_v57 = vadd.f32 %v745_v49, %v708_v16  ;;  %v947_v47 = vadd.f32 %v915_v8, %v842_v45 }
  0x7f   : > { %v948_v48 = vadd.f32 %v916_v62, %v843_v58  ;;  %v984_v38 = vmul.f32 %v2324_v18, %v2469_v41  ;;  %v985_v5 = vmul.f32 %v2324_v18, %v2471_v46  ;;  %v2496_v22 = vmul.f32 %v2324_v18, %v878_v9 }
  0x80   : > { %v2499_v12 = vmul.f32 %v2324_v18, %v879_v33  ;;  %v778_v7 = vadd.f32 %v746_v17, %v709_v51  ;;  %v846_v49 = vadd.f32 %v814_v0, %v777_v57  ;;  %v1053_v45 = vmul.f32 %v2333_v37, %v878_v9  ;;  %v2525_v57 = vld [vmem:[#allocation2 + $0x62] sm:$0xff] }
  0x81   : > { %v1054_v8 = vmul.f32 %v2333_v37, %v879_v33  ;;  %v1016_v27 = vadd.f32 %v984_v38, %v947_v47  ;;  %v1017_v16 = vadd.f32 %v985_v5, %v948_v48  ;;  %v1002_v58 = vadd.f32 %v2350_v56, %v2336_v39  ;;  %v2519_v39 = vld [vmem:[#allocation2 + $0x10a] sm:$0xff]  ;;  %v2521_v56 = vld [vmem:[#allocation2 + $0x112] sm:$0xff]  ;;  %v2539_v38 = vld [vmem:[#allocation2 + $0x122] sm:$0xff] }
  0x82   : > { %v1003_v62 = vadd.f32 %v2357_v61, %v2338_v42  ;;  %v847_v46 = vadd.f32 %v815_v3, %v778_v7  ;;  %v951_v41 = vadd.f32 %v919_v24, %v846_v49  ;;  %v1039_v26 = vmul.f32 %v2333_v37, %v2501_v35 }
  0x83   : > { %v1040_v17 = vmul.f32 %v2333_v37, %v2503_v19  ;;  %v1085_v0 = vadd.f32 %v1053_v45, %v1016_v27  ;;  %v1086_v9 = vadd.f32 %v1054_v8, %v1017_v16  ;;  %v532_v33 = vadd.f32 %v2395_v29, %v2366_v11  ;;  %v2533_v29 = vld [vmem:[#allocation2 + $0x6a] sm:$0xff] }
  0x84   : > { %v533_v51 = vadd.f32 %v2398_v32, %v2374_v14  ;;  %v952_v42 = vadd.f32 %v920_v36, %v847_v46  ;;  %v1071_v61 = vadd.f32 %v1039_v26, %v1002_v58  ;;  %v569_v24 = vmul.f32 %v2215_v34, %v2371_v13  ;;  %v2548_v8 = vld [vmem:[#allocation2 + $0x12a] sm:$0xff] }
  0x85   : > { %v1072_v3 = vadd.f32 %v1040_v17, %v1003_v62  ;;  %v1109_v47 = vpack.c.bf16 %v1086_v9, %v1085_v0  ;;  %v570_v48 = vmul.f32 %v2215_v34, %v2432_v15  ;;  %v812_v11 = vmul.f32 %v2304_v53, %v2420_v6  ;;  %v227_v17 = vld [vmem:[%s2101_s9 + $0x40] sm:$0xff] }
  0x86   : > { %v813_v14 = vmul.f32 %v2304_v53, %v2449_v25  ;;  %v601_v26 = vadd.f32 %v569_v24, %v532_v33  ;;  %v1055_v32 = vmul.f32 %v2333_v37, %v2519_v39  ;;  %v1056_v36 = vmul.f32 %v2333_v37, %v2521_v56 }
  0x87   : > { %v1102_v46 = vpack.c.bf16 %v1072_v3, %v1071_v61  ;;  %1839 = vmatprep.mubr.msk.bf16.mxu1 %vm283_vm0, %v1109_v47  ;;  %v602_v5 = vadd.f32 %v570_v48, %v533_v51  ;;  %v972_v7 = vmul.f32 %v2324_v18, %v2501_v35  ;;  %v973_v49 = vmul.f32 %v2324_v18, %v2503_v19 }
  0x88   : > { %v1041_v45 = vmul.f32 %v2333_v37, %v2525_v57  ;;  %v706_v27 = vadd.f32 %v2413_v63, %v601_v26  ;;  %v1042_v16 = vmul.f32 %v2333_v37, %v2533_v29  ;;  %v988_v58 = vmul.f32 %v2324_v18, %v2519_v39  ;;  %v228_v63 = vld [vmem:[%s2101_s9 + $0x48] sm:$0xff] }
  0x89   : > { %1824 = vmatmul.mubr.msk.bf16.vlgmr.msra.gmra.mrb[0].mxu0 %vm283_vm0, %v1102_v46  ;;  %v989_v62 = vmul.f32 %v2324_v18, %v2521_v56  ;;  %v707_v0 = vadd.f32 %v2417_v4, %v602_v5  ;;  %v1004_v9 = vadd.f32 %v972_v7, %v2344_v54  ;;  %v1005_v33 = vadd.f32 %v973_v49, %v2346_v55 }
  0x8a   : > { %v1057_v51 = vmul.f32 %v2333_v37, %v2539_v38  ;;  %v775_v61 = vadd.f32 %v2428_v10, %v706_v27  ;;  %v1020_v3 = vadd.f32 %v988_v58, %v951_v41  ;;  %v1058_v47 = vmul.f32 %v2333_v37, %v2548_v8  ;;  %v243_v27 = vld [vmem:[%s2101_s9 + $0xc0] sm:$0xff]  ;;  %v244_v58 = vld [vmem:[%s2101_s9 + $0xc8] sm:$0xff] }
  0x8b   : > { %v1021_v24 = vadd.f32 %v989_v62, %v952_v42  ;;  %v776_v48 = vadd.f32 %v2439_v44, %v707_v0  ;;  %v1073_v46 = vadd.f32 %v1041_v45, %v1004_v9  ;;  %v1074_v26 = vadd.f32 %v1042_v16, %v1005_v33 }
  0x8c   : > { %v259_v4 = vmax.f32 %v227_v17, 0.0  ;;  %v844_v54 = vadd.f32 %v812_v11, %v775_v61  ;;  %v2569_v5 = vadd.f32 %v1057_v51, %v1020_v3  ;;  %v260_v7 = vmax.f32 %v228_v63, 0.0  ;;  %v3326_v3 = vld [vmem:[#allocation6_spill] sm:$0xff] }
  0x8d   : > { %v2571_v55 = vadd.f32 %v1058_v47, %v1021_v24  ;;  %v845_v49 = vadd.f32 %v813_v14, %v776_v48  ;;  %v1103_v10 = vpack.c.bf16 %v1074_v26, %v1073_v46  ;;  %v419_v41 = vmul.f32 %v2190_v23, %v2242_v59  ;;  %v229_v24 = vld [vmem:[%s2101_s9 + $0x50] sm:$0xff]  ;;  %v3329_v46 = vld [vmem:[#allocation21_spill] sm:$0xff] }
  0x8e   : > { %348 = vst.msk [vmem:[#allocation2 + $0x79] sm:$0xff] %vm283_vm0, %v259_v4  ;;  %v420_v44 = vmul.f32 %v2190_v23, %v2244_v60  ;;  %v949_v42 = vadd.f32 %v2483_v50, %v844_v54  ;;  %349 = vst.msk [vmem:[#allocation2 + $0x81] sm:$0xff] %vm283_vm0, %v260_v7  ;;  %v488_v14 = vmul.f32 %v2208_v30, %v2253_v1  ;;  %v275_v9 = vmax.f32 %v243_v27, 0.0  ;;  %v230_v4 = vld [vmem:[%s2101_s9 + $0x58] sm:$0xff] }
  0x8f   : > { %v1111_v11 = vpack.c.bf16 %v2571_v55, %v2569_v5  ;;  %v489_v45 = vmul.f32 %v2208_v30, %v2255_v2  ;;  %v950_v16 = vadd.f32 %v2487_v52, %v845_v49  ;;  %1827 = vmatprep.mubr.msk.bf16.mxu0 %vm283_vm0, %v1103_v10  ;;  %v2591_v59 = vmul.f32 %v2277_v31, %v2279_v40 }
  0x90   : > { %v2595_v60 = vmul.f32 %v2277_v31, %v2282_v43  ;;  %v2599_v50 = vmul.f32 %v2202_v28, %v2501_v35  ;;  %v1018_v62 = vadd.f32 %v2496_v22, %v949_v42  ;;  %v520_v17 = vadd.f32 %v488_v14, %v419_v41  ;;  %364 = vst.msk [vmem:[#allocation2 + $0x139] sm:$0xff] %vm283_vm0, %v275_v9 }
  0x91   : > { %v521_v52 = vadd.f32 %v489_v45, %v420_v44  ;;  %v2605_v0 = vmul.f32 %v2202_v28, %v2503_v19  ;;  %v1019_v40 = vadd.f32 %v2499_v12, %v950_v16  ;;  %v2610_v43 = vmul.f32 %v2324_v18, %v2525_v57 }
  0x92   : > { %v2614_v35 = vmul.f32 %v2324_v18, %v2533_v29  ;;  %v1087_v33 = vadd.f32 %v1055_v32, %v1018_v62  ;;  %v276_v22 = vmax.f32 %v244_v58, 0.0  ;;  %v435_v51 = vmul.f32 %v2190_v23, %v2371_v13 }
  0x93   : > { %v436_v19 = vmul.f32 %v2190_v23, %v2432_v15  ;;  %v1088_v63 = vadd.f32 %v1056_v36, %v1019_v40  ;;  %v504_v12 = vmul.f32 %v2208_v30, %v2434_v20  ;;  %v505_v61 = vmul.f32 %v2208_v30, %v2436_v21  ;;  %v3328_v36 = vld [vmem:[#allocation20_spill] sm:$0xff] }
  0x94   : > { %v2627_v32 = vmul.f32 %v3326_v3, %v2420_v6  ;;  %365 = vst.msk [vmem:[#allocation2 + $0x141] sm:$0xff] %vm283_vm0, %v276_v22  ;;  %v2637_v15 = vmul.f32 %v3326_v3, %v2449_v25  ;;  %v2641_v48 = vmul.f32 %v2277_v31, %v3328_v36  ;;  %v2645_v26 = vmul.f32 %v2277_v31, %v3329_v46 }
  0x95   : > { %v2630_v47 = vld [vmem:[#allocation2 + $0x78] sm:$0xff]  ;;  %v2649_v6 = vmul.f32 %v2202_v28, %v2519_v39  ;;  %v1110_v54 = vpack.c.bf16 %v1088_v63, %v1087_v33  ;;  %v2652_v5 = vld [vmem:[#allocation2 + $0x80] sm:$0xff]  ;;  %v536_v10 = vadd.f32 %v504_v12, %v435_v51  ;;  %v537_v14 = vadd.f32 %v505_v61, %v436_v19 }
  0x96   : > { %v2632_v13 = vld [vmem:[#allocation2 + $0x79] sm:$0xff]  ;;  %v557_v25 = vmul.f32 %v2215_v34, %v2630_v47  ;;  %v2656_v55 = vld [vmem:[#allocation2 + $0x81] sm:$0xff]  ;;  %v558_v41 = vmul.f32 %v2215_v34, %v2652_v5  ;;  %v2679_v16 = vmul.f32 %v2202_v28, %v2521_v56  ;;  %v2683_v58 = vmul.f32 %v2324_v18, %v2539_v38 }
  0x97   : > { %3327 = vst [vmem:[#allocation27_spill] sm:$0xff] %v2632_v13  ;;  %3330 = vst [vmem:[#allocation20_spill] sm:$0xff] %v2656_v55  ;;  %v800_v7 = vmul.f32 %v2304_v53, %v2632_v13  ;;  %v2660_v49 = vld [vmem:[#allocation2 + $0x7a] sm:$0xff]  ;;  %v801_v39 = vmul.f32 %v2304_v53, %v2656_v55  ;;  %v2666_v44 = vld [vmem:[#allocation2 + $0x82] sm:$0xff]  ;;  %1840 = vmatmul.mubr.msk.bf16.vlgmr.msra.gmra.mrb[0].mxu1 %vm283_vm0, %v1110_v54  ;;  %v2688_v40 = vmul.f32 %v2324_v18, %v2548_v8 }
  0x98   : > { %v2670_v42 = vmul.f32 %v2333_v37, %v2660_v49  ;;  %v589_v45 = vadd.f32 %v557_v25, %v520_v17  ;;  %v2675_v27 = vmul.f32 %v2333_v37, %v2666_v44  ;;  %1843 = vmatprep.mubr.msk.bf16.mxu1 %vm283_vm0, %v1111_v11  ;;  %v590_v62 = vadd.f32 %v558_v41, %v521_v52  ;;  %v3331_v33 = vld [vmem:[#allocation7_spill] sm:$0xff]  ;;  %v3332_v63 = vld [vmem:[#allocation8_spill] sm:$0xff] }
  0x99   : > { %v261_v17 = vmax.f32 %v229_v24, 0.0  ;;  %v262_v9 = vmax.f32 %v230_v4, 0.0  ;;  %v421_v51 = vmul.f32 %v2190_v23, %v2253_v1  ;;  %v422_v56 = vmul.f32 %v2190_v23, %v2255_v2  ;;  %v2698_v52 = vld [vmem:[#allocation2 + $0x138] sm:$0xff] }
  0x9a   : > { %v694_v22 = vadd.f32 %v3331_v33, %v589_v45  ;;  %v490_v19 = vmul.f32 %v2208_v30, %v2630_v47  ;;  %v695_v11 = vadd.f32 %v3332_v63, %v590_v62  ;;  %v2700_v12 = vld [vmem:[#allocation2 + $0x139] sm:$0xff]  ;;  %v491_v61 = vmul.f32 %v2208_v30, %v2652_v5 }
  0x9b   : > { %350 = vst.msk [vmem:[#allocation2 + $0x91] sm:$0xff] %vm283_vm0, %v261_v17  ;;  %351 = vst.msk [vmem:[#allocation2 + $0x99] sm:$0xff] %vm283_vm0, %v262_v9  ;;  %v2708_v1 = vmul.f32 %v2277_v31, %v2632_v13  ;;  %v2712_v2 = vmul.f32 %v2277_v31, %v2656_v55  ;;  %v2715_v36 = vld [vmem:[#allocation2 + $0x140] sm:$0xff]  ;;  %v573_v46 = vmul.f32 %v2215_v34, %v2698_v52 }
  0x9c   : > { %v763_v24 = vadd.f32 %v2591_v59, %v694_v22  ;;  %v2719_v4 = vld [vmem:[#allocation2 + $0x141] sm:$0xff]  ;;  %v816_v54 = vmul.f32 %v2304_v53, %v2700_v12  ;;  %v522_v41 = vadd.f32 %v490_v19, %v421_v51  ;;  %v764_v45 = vadd.f32 %v2595_v60, %v695_v11 }
  0x9d   : > { %v2723_v25 = vld [vmem:[#allocation2 + $0x13a] sm:$0xff]  ;;  %v574_v59 = vmul.f32 %v2215_v34, %v2715_v36  ;;  %v817_v62 = vmul.f32 %v2304_v53, %v2719_v4  ;;  %v2730_v17 = vld [vmem:[#allocation2 + $0x142] sm:$0xff]  ;;  %v605_v22 = vadd.f32 %v573_v46, %v536_v10  ;;  %v523_v51 = vadd.f32 %v491_v61, %v422_v56 }
  0x9e   : > { %v1059_v9 = vmul.f32 %v2333_v37, %v2723_v25  ;;  %v832_v33 = vadd.f32 %v800_v7, %v763_v24  ;;  %v2736_v63 = vmul.f32 %v2333_v37, %v2730_v17  ;;  %v245_v19 = vld [vmem:[%s2101_s9 + $0xd0] sm:$0xff]  ;;  %v246_v60 = vld [vmem:[%s2101_s9 + $0xd8] sm:$0xff]  ;;  %v833_v11 = vadd.f32 %v801_v39, %v764_v45 }
  0x9f   : > { %v606_v55 = vadd.f32 %v574_v59, %v537_v14  ;;  %v2742_v3 = vmul.f32 %v2202_v28, %v2525_v57  ;;  %v2746_v13 = vmul.f32 %v2202_v28, %v2533_v29  ;;  %v710_v10 = vadd.f32 %v2627_v32, %v605_v22 }
  0xa0   : > { %v937_v7 = vadd.f32 %v2599_v50, %v832_v33  ;;  %v2752_v24 = vmul.f32 %v2324_v18, %v2660_v49  ;;  %v2756_v39 = vmul.f32 %v2324_v18, %v2666_v44  ;;  %v938_v14 = vadd.f32 %v2605_v0, %v833_v11 }
  0xa1   : > { %v711_v57 = vadd.f32 %v2637_v15, %v606_v55  ;;  %v277_v56 = vmax.f32 %v245_v19, 0.0  ;;  %v278_v61 = vmax.f32 %v246_v60, 0.0  ;;  %v779_v50 = vadd.f32 %v2641_v48, %v710_v10 }
  0xa2   : > { %v1006_v29 = vadd.f32 %v2610_v43, %v937_v7  ;;  %v2762_v46 = vld [vmem:[#allocation2 + $0x90] sm:$0xff]  ;;  %v2764_v32 = vld [vmem:[#allocation2 + $0x98] sm:$0xff]  ;;  %v437_v59 = vmul.f32 %v2190_v23, %v2434_v20  ;;  %v438_v0 = vmul.f32 %v2190_v23, %v2436_v21  ;;  %v1007_v15 = vadd.f32 %v2614_v35, %v938_v14 }
  0xa3   : > { %v2766_v45 = vld [vmem:[#allocation2 + $0x91] sm:$0xff]  ;;  %v780_v55 = vadd.f32 %v2645_v26, %v711_v57  ;;  %v559_v43 = vmul.f32 %v2215_v34, %v2762_v46  ;;  %v560_v48 = vmul.f32 %v2215_v34, %v2764_v32  ;;  %v2778_v33 = vld [vmem:[#allocation2 + $0x99] sm:$0xff]  ;;  %366 = vst.msk [vmem:[#allocation2 + $0x151] sm:$0xff] %vm283_vm0, %v277_v56  ;;  %367 = vst.msk [vmem:[#allocation2 + $0x159] sm:$0xff] %vm283_vm0, %v278_v61 }
  0xa4   : > { %v2780_v22 = vld [vmem:[#allocation2 + $0x92] sm:$0xff]  ;;  %v2782_v19 = vld [vmem:[#allocation2 + $0x9a] sm:$0xff]  ;;  %v1075_v20 = vadd.f32 %v2670_v42, %v1006_v29  ;;  %v848_v21 = vadd.f32 %v816_v54, %v779_v50  ;;  %v802_v35 = vmul.f32 %v2304_v53, %v2766_v45  ;;  %v803_v26 = vmul.f32 %v2304_v53, %v2778_v33  ;;  %v3333_v29 = vld [vmem:[#allocation9_spill] sm:$0xff] }
  0xa5   : > { %v1076_v60 = vadd.f32 %v2675_v27, %v1007_v15  ;;  %v849_v11 = vadd.f32 %v817_v62, %v780_v55  ;;  %v591_v7 = vadd.f32 %v559_v43, %v522_v41  ;;  %v592_v10 = vadd.f32 %v560_v48, %v523_v51  ;;  %v3334_v27 = vld [vmem:[#allocation10_spill] sm:$0xff] }
  0xa6   : > { %v953_v14 = vadd.f32 %v2649_v6, %v848_v21  ;;  %v1045_v57 = vmul.f32 %v2333_v37, %v2780_v22  ;;  %v1046_v42 = vmul.f32 %v2333_v37, %v2782_v19  ;;  %v506_v54 = vmul.f32 %v2208_v30, %v2698_v52 }
  0xa7   : > { %v1104_v56 = vpack.c.bf16 %v1076_v60, %v1075_v20  ;;  %v954_v61 = vadd.f32 %v2679_v16, %v849_v11  ;;  %v696_v50 = vadd.f32 %v3333_v29, %v591_v7  ;;  %v697_v62 = vadd.f32 %v3334_v27, %v592_v10  ;;  %v232_v29 = vld [vmem:[%s2101_s9 + $0x68] sm:$0xff] }
  0xa8   : > { %v1022_v41 = vadd.f32 %v2683_v58, %v953_v14  ;;  %v507_v6 = vmul.f32 %v2208_v30, %v2715_v36  ;;  %v538_v51 = vadd.f32 %v506_v54, %v437_v59  ;;  %v749_v15 = vmul.f32 %v2277_v31, %v2700_v12 }
  0xa9   : > { %1828 = vmatmul.mubr.msk.bf16.gmra.mrb[4].mxu0 %vm283_vm0, %v1104_v56  ;;  %v1023_v55 = vadd.f32 %v2688_v40, %v954_v61  ;;  %v765_v43 = vadd.f32 %v2708_v1, %v696_v50  ;;  %v766_v16 = vadd.f32 %v2712_v2, %v697_v62  ;;  %v750_v48 = vmul.f32 %v2277_v31, %v2719_v4 }
  0xaa   : > { %v1091_v20 = vadd.f32 %v1059_v9, %v1022_v41  ;;  %v2813_v58 = vld [vmem:[#allocation2 + $0x150] sm:$0xff]  ;;  %v2815_v21 = vld [vmem:[#allocation2 + $0x158] sm:$0xff]  ;;  %v539_v59 = vadd.f32 %v507_v6, %v438_v0  ;;  %v923_v11 = vmul.f32 %v2202_v28, %v2539_v38  ;;  %v924_v40 = vmul.f32 %v2202_v28, %v2548_v8 }
  0xab   : > { %v2817_v60 = vld [vmem:[#allocation2 + $0x151] sm:$0xff]  ;;  %v1092_v1 = vadd.f32 %v2736_v63, %v1023_v55  ;;  %v834_v2 = vadd.f32 %v802_v35, %v765_v43  ;;  %v835_v7 = vadd.f32 %v803_v26, %v766_v16  ;;  %v575_v9 = vmul.f32 %v2215_v34, %v2813_v58  ;;  %v2826_v10 = vld [vmem:[#allocation2 + $0x159] sm:$0xff] }
  0xac   : > { %v2828_v14 = vld [vmem:[#allocation2 + $0x152] sm:$0xff]  ;;  %v2830_v0 = vld [vmem:[#allocation2 + $0x15a] sm:$0xff]  ;;  %v576_v38 = vmul.f32 %v2215_v34, %v2815_v21  ;;  %v818_v28 = vmul.f32 %v2304_v53, %v2817_v60  ;;  %v819_v8 = vmul.f32 %v2304_v53, %v2826_v10  ;;  %v992_v63 = vmul.f32 %v2324_v18, %v2723_v25 }
  0xad   : > { %3335 = vst [vmem:[#allocation21_spill] sm:$0xff] %v2828_v14  ;;  %3336 = vst [vmem:[#allocation7_spill] sm:$0xff] %v2830_v0  ;;  %v231_v35 = vld [vmem:[%s2101_s9 + $0x60] sm:$0xff]  ;;  %v1112_v26 = vpack.c.bf16 %v1092_v1, %v1091_v20  ;;  %v939_v54 = vadd.f32 %v2742_v3, %v834_v2  ;;  %v940_v56 = vadd.f32 %v2746_v13, %v835_v7  ;;  %v3338_v55 = vld [vmem:[#allocation23_spill] sm:$0xff]  ;;  %v264_v16 = vmax.f32 %v232_v29, 0.0 }
  0xae   : > { %v607_v61 = vadd.f32 %v575_v9, %v538_v51  ;;  %v608_v50 = vadd.f32 %v576_v38, %v539_v59  ;;  %v993_v34 = vmul.f32 %v2324_v18, %v2730_v17  ;;  %v1061_v27 = vmul.f32 %v2333_v37, %v2828_v14  ;;  %v3337_v13 = vld [vmem:[#allocation22_spill] sm:$0xff] }
  0xaf   : > { %v2850_v62 = vmul.f32 %v2333_v37, %v2830_v0  ;;  %1844 = vmatmul.mubr.msk.bf16.gmra.mrb[4].mxu1 %vm283_vm0, %v1112_v26  ;;  %v1008_v41 = vadd.f32 %v2752_v24, %v939_v54  ;;  %v1009_v3 = vadd.f32 %v2756_v39, %v940_v56  ;;  %v263_v51 = vmax.f32 %v231_v35, 0.0  ;;  %353 = vst.msk [vmem:[#allocation2 + $0xb1] sm:$0xff] %vm283_vm0, %v264_v16  ;;  %v3340_v38 = vld [vmem:[#allocation6_spill] sm:$0xff]  ;;  %v3341_v26 = vld [vmem:[#allocation20_spill] sm:$0xff]  ;;  %v248_v56 = vld [vmem:[%s2101_s9 + $0xe8] sm:$0xff] }
  0xb0   : > { %v712_v6 = vadd.f32 %v3337_v13, %v607_v61  ;;  %v713_v43 = vadd.f32 %v3338_v55, %v608_v50  ;;  %v423_v20 = vmul.f32 %v2190_v23, %v2630_v47  ;;  %v424_v59 = vmul.f32 %v2190_v23, %v2652_v5  ;;  %v3339_v47 = vld [vmem:[#allocation27_spill] sm:$0xff]  ;;  %v247_v54 = vld [vmem:[%s2101_s9 + $0xe0] sm:$0xff] }
  0xb1   : > { %v1077_v1 = vadd.f32 %v1045_v57, %v1008_v41  ;;  %v1078_v2 = vadd.f32 %v1046_v42, %v1009_v3  ;;  %352 = vst.msk [vmem:[#allocation2 + $0xa9] sm:$0xff] %vm283_vm0, %v263_v51  ;;  %v492_v24 = vmul.f32 %v2208_v30, %v2762_v46  ;;  %v493_v9 = vmul.f32 %v2208_v30, %v2764_v32  ;;  %v2882_v30 = vld [vmem:[%s3267_s1 + $0x2] ss:$0 sm:$0xff] }
  0xb2   : > { %v781_v7 = vadd.f32 %v749_v15, %v712_v6  ;;  %v782_v39 = vadd.f32 %v750_v48, %v713_v43  ;;  %v666_v35 = vmul.f32 %v3340_v38, %v3339_v47  ;;  %v667_v23 = vmul.f32 %v3340_v38, %v3341_v26  ;;  %v2913_v43 = vld [vmem:[%s3267_s1 + $0x3] ss:$0 sm:$0xff] }
  0xb3   : > { %v1105_v5 = vpack.c.bf16 %v1078_v2, %v1077_v1  ;;  %v524_v42 = vadd.f32 %v492_v24, %v423_v20  ;;  %v735_v15 = vmul.f32 %v2277_v31, %v2766_v45  ;;  %v525_v61 = vadd.f32 %v493_v9, %v424_v59  ;;  %v2943_v24 = vld [vmem:[%s3267_s1 + $0x6] ss:$0 sm:$0xff] }
  0xb4   : > { %v850_v57 = vadd.f32 %v818_v28, %v781_v7  ;;  %v851_v48 = vadd.f32 %v819_v8, %v782_v39  ;;  %v2877_v29 = vmul.f32 %v2277_v31, %v2778_v33  ;;  %v2886_v28 = vmul.f32 %v2882_v30, %v2660_v49  ;;  %v2904_v49 = vld [vmem:[%s3267_s1] ss:$0 sm:$0xff]  ;;  %3344 = vst [vmem:[#allocation10_spill] sm:$0xff] %v2943_v24 }
  0xb5   : > { %1831 = vmatprep.mubr.msk.bf16.mxu0 %vm283_vm0, %v1105_v5  ;;  %v2891_v8 = vmul.f32 %v2882_v30, %v2666_v44  ;;  %v2895_v41 = vmul.f32 %v2324_v18, %v2780_v22  ;;  %v2899_v3 = vmul.f32 %v2324_v18, %v2782_v19  ;;  %v279_v6 = vmax.f32 %v247_v54, 0.0 }
  0xb6   : > { %v955_v50 = vadd.f32 %v923_v11, %v850_v57  ;;  %v956_v13 = vadd.f32 %v924_v40, %v851_v48  ;;  %v280_v51 = vmax.f32 %v248_v56, 0.0  ;;  %v439_v44 = vmul.f32 %v2904_v49, %v2698_v52  ;;  %v2928_v52 = vld [vmem:[%s3267_s1 + $0x1] ss:$0 sm:$0xff]  ;;  %v2947_v9 = vld [vmem:[#allocation2 + $0xb1] sm:$0xff] }
  0xb7   : > { %v440_v55 = vmul.f32 %v2904_v49, %v2715_v36  ;;  %v508_v40 = vmul.f32 %v2913_v43, %v2813_v58  ;;  %v509_v16 = vmul.f32 %v2913_v43, %v2815_v21  ;;  %368 = vst.msk [vmem:[#allocation2 + $0x169] sm:$0xff] %vm283_vm0, %v279_v6  ;;  %v682_v36 = vmul.f32 %v2928_v52, %v2700_v12  ;;  %v2958_v5 = vld [vmem:[#allocation2 + $0xb2] sm:$0xff] }
  0xb8   : > { %v1024_v11 = vadd.f32 %v992_v63, %v955_v50  ;;  %v1025_v20 = vadd.f32 %v993_v34, %v956_v13  ;;  %v2919_v59 = vld [vmem:[#allocation2 + $0xa8] sm:$0xff]  ;;  %369 = vst.msk [vmem:[#allocation2 + $0x171] sm:$0xff] %vm283_vm0, %v280_v51  ;;  %v683_v63 = vmul.f32 %v2928_v52, %v2719_v4  ;;  %v2936_v34 = vmul.f32 %v2277_v31, %v2817_v60  ;;  %v2938_v7 = vld [vmem:[#allocation2 + $0xb0] sm:$0xff] }
  0xb9   : > { %3342 = vst [vmem:[#allocation8_spill] sm:$0xff] %v2919_v59  ;;  %v2921_v1 = vld [vmem:[#allocation2 + $0xa9] sm:$0xff]  ;;  %3343 = vst [vmem:[#allocation9_spill] sm:$0xff] %v2938_v7  ;;  %v561_v39 = vmul.f32 %v2943_v24, %v2919_v59  ;;  %v540_v47 = vadd.f32 %v508_v40, %v439_v44  ;;  %v562_v38 = vmul.f32 %v2943_v24, %v2938_v7 }
  0xba   : > { %v1093_v2 = vadd.f32 %v1061_v27, %v1024_v11  ;;  %v804_v12 = vmul.f32 %v2304_v53, %v2921_v1  ;;  %v2951_v4 = vld [vmem:[#allocation2 + $0xaa] sm:$0xff]  ;;  %v1094_v27 = vadd.f32 %v2850_v62, %v1025_v20  ;;  %v805_v26 = vmul.f32 %v2304_v53, %v2947_v9 }
  0xbb   : > { %v1047_v57 = vmul.f32 %v2333_v37, %v2951_v4  ;;  %v593_v54 = vadd.f32 %v561_v39, %v524_v42  ;;  %v1048_v56 = vmul.f32 %v2333_v37, %v2958_v5  ;;  %v541_v48 = vadd.f32 %v509_v16, %v440_v55 }
  0xbc   : > { %v752_v50 = vmul.f32 %v2277_v31, %v2826_v10  ;;  %v1113_v62 = vpack.c.bf16 %v1094_v27, %v1093_v2  ;;  %v594_v13 = vadd.f32 %v562_v38, %v525_v61  ;;  %v2968_v6 = vmul.f32 %v2882_v30, %v2723_v25 }
  0xbd   : > { %v2972_v51 = vmul.f32 %v2882_v30, %v2730_v17  ;;  %v698_v44 = vadd.f32 %v666_v35, %v593_v54  ;;  %v2976_v42 = vmul.f32 %v2324_v18, %v2828_v14  ;;  %v2980_v11 = vmul.f32 %v2324_v18, %v2830_v0 }
  0xbe   : > { %v425_v31 = vmul.f32 %v2904_v49, %v2762_v46  ;;  %1847 = vmatprep.mubr.msk.bf16.mxu1 %vm283_vm0, %v1113_v62  ;;  %v699_v25 = vadd.f32 %v667_v23, %v594_v13  ;;  %v426_v61 = vmul.f32 %v2904_v49, %v2764_v32  ;;  %v494_v17 = vmul.f32 %v2913_v43, %v2919_v59  ;;  %v2991_v40 = vld [vmem:[#allocation2 + $0x168] sm:$0xff]  ;;  %v3346_v46 = vld [vmem:[#allocation11_spill] sm:$0xff]  ;;  %v3347_v23 = vld [vmem:[#allocation12_spill] sm:$0xff] }
  0xbf   : > { %v495_v35 = vmul.f32 %v2913_v43, %v2938_v7  ;;  %v767_v55 = vadd.f32 %v735_v15, %v698_v44  ;;  %v2993_v16 = vld [vmem:[#allocation2 + $0x170] sm:$0xff]  ;;  %v563_v2 = vmul.f32 %v2943_v24, %v3346_v46  ;;  %v564_v39 = vmul.f32 %v2943_v24, %v3347_v23 }
  0xc0   : > { %v2995_v20 = vld [vmem:[#allocation2 + $0x169] sm:$0xff]  ;;  %v668_v32 = vmul.f32 %v2928_v52, %v2766_v45  ;;  %v768_v27 = vadd.f32 %v2877_v29, %v699_v25  ;;  %v577_v15 = vmul.f32 %v2943_v24, %v2991_v40  ;;  %v578_v38 = vmul.f32 %v2943_v24, %v2993_v16  ;;  %v3008_v54 = vld [vmem:[#allocation2 + $0x171] sm:$0xff] }
  0xc1   : > { %3345 = vst [vmem:[#allocation22_spill] sm:$0xff] %v2995_v20  ;;  %v820_v62 = vmul.f32 %v2304_v53, %v2995_v20  ;;  %v3012_v13 = vld [vmem:[#allocation2 + $0x16a] sm:$0xff]  ;;  %v3014_v44 = vld [vmem:[#allocation2 + $0x172] sm:$0xff]  ;;  %v836_v46 = vadd.f32 %v804_v12, %v767_v55  ;;  %v821_v45 = vmul.f32 %v2304_v53, %v3008_v54  ;;  %v526_v59 = vadd.f32 %v494_v17, %v425_v31  ;;  %v3028_v12 = vld [vmem:[%s3267_s1 + $0x4] ss:$0 sm:$0xff] }
  0xc2   : > { %3348 = vst [vmem:[#allocation23_spill] sm:$0xff] %v3014_v44  ;;  %v1063_v29 = vmul.f32 %v2333_v37, %v3012_v13  ;;  %v1064_v25 = vmul.f32 %v2333_v37, %v3014_v44  ;;  %v837_v23 = vadd.f32 %v805_v26, %v768_v27  ;;  %v609_v24 = vadd.f32 %v577_v15, %v540_v47 }
  0xc3   : > { %v610_v7 = vadd.f32 %v578_v38, %v541_v48  ;;  %v941_v0 = vadd.f32 %v2886_v28, %v836_v46  ;;  %v527_v14 = vadd.f32 %v495_v35, %v426_v61  ;;  %v669_v20 = vmul.f32 %v2928_v52, %v2778_v33  ;;  %v3349_v61 = vld [vmem:[#allocation15_spill] sm:$0xff] }
  0xc4   : > { %v737_v55 = vmul.f32 %v3028_v12, %v2921_v1  ;;  %v942_v44 = vadd.f32 %v2891_v8, %v837_v23  ;;  %v714_v26 = vadd.f32 %v682_v36, %v609_v24  ;;  %v595_v48 = vadd.f32 %v563_v2, %v526_v59  ;;  %v249_v24 = vld [vmem:[%s2101_s9 + $0xf0] sm:$0xff] }
  0xc5   : > { %v715_v47 = vadd.f32 %v683_v63, %v610_v7  ;;  %v1010_v31 = vadd.f32 %v2895_v41, %v941_v0  ;;  %v596_v28 = vadd.f32 %v564_v39, %v527_v14  ;;  %v738_v33 = vmul.f32 %v3028_v12, %v2947_v9  ;;  %v3043_v14 = vld [vmem:[%s3267_s1 + $0x7] ss:$0 sm:$0xff]  ;;  %v250_v39 = vld [vmem:[%s2101_s9 + $0xf8] sm:$0xff] }
  0xc6   : > { %v806_v17 = vmul.f32 %v2304_v53, %v3349_v61  ;;  %v1011_v35 = vadd.f32 %v2899_v3, %v942_v44  ;;  %v783_v27 = vadd.f32 %v2936_v34, %v714_v26  ;;  %v700_v8 = vadd.f32 %v668_v32, %v595_v48  ;;  %v3350_v0 = vld [vmem:[#allocation16_spill] sm:$0xff]  ;;  %v3351_v44 = vld [vmem:[#allocation19_spill] sm:$0xff] }
  0xc7   : > { %v784_v15 = vadd.f32 %v752_v50, %v715_v47  ;;  %v1079_v36 = vadd.f32 %v1047_v57, %v1010_v31  ;;  %v701_v63 = vadd.f32 %v669_v20, %v596_v28  ;;  %v807_v41 = vmul.f32 %v3043_v14, %v3350_v0 }
  0xc8   : > { %v911_v53 = vmul.f32 %v2882_v30, %v2780_v22  ;;  %v1080_v59 = vadd.f32 %v1048_v56, %v1011_v35  ;;  %v852_v3 = vadd.f32 %v820_v62, %v783_v27  ;;  %v769_v34 = vadd.f32 %v737_v55, %v700_v8  ;;  %v3353_v8 = vld [vmem:[#allocation22_spill] sm:$0xff] }
  0xc9   : > { %v853_v7 = vadd.f32 %v821_v45, %v784_v15  ;;  %v770_v50 = vadd.f32 %v738_v33, %v701_v63  ;;  %v912_v57 = vmul.f32 %v2882_v30, %v2782_v19  ;;  %v980_v20 = vmul.f32 %v2324_v18, %v2951_v4  ;;  %v3352_v45 = vld [vmem:[#allocation24_spill] sm:$0xff]  ;;  %v3354_v63 = vld [vmem:[#allocation21_spill] sm:$0xff] }
  0xca   : > { %v981_v2 = vmul.f32 %v2324_v18, %v2958_v5  ;;  %v1106_v32 = vpack.c.bf16 %v1080_v59, %v1079_v36  ;;  %v957_v38 = vadd.f32 %v2968_v6, %v852_v3  ;;  %v838_v56 = vadd.f32 %v806_v17, %v769_v34  ;;  %v3356_v3 = vld [vmem:[#allocation23_spill] sm:$0xff]  ;;  %v3357_v34 = vld [vmem:[#allocation8_spill] sm:$0xff] }
  0xcb   : > { %v958_v22 = vadd.f32 %v2972_v51, %v853_v7  ;;  %v839_v62 = vadd.f32 %v807_v41, %v770_v50  ;;  %v1049_v46 = vmul.f32 %v2333_v37, %v3351_v44  ;;  %v1050_v19 = vmul.f32 %v2333_v37, %v3352_v45  ;;  %v3358_v50 = vld [vmem:[#allocation9_spill] sm:$0xff] }
  0xcc   : > { %v281_v23 = vmax.f32 %v249_v24, 0.0  ;;  %1832 = vmatmul.mubr.msk.bf16.gmra.mrb[8].mxu0 %vm283_vm0, %v1106_v32  ;;  %v1026_v55 = vadd.f32 %v2976_v42, %v957_v38  ;;  %v943_v26 = vadd.f32 %v911_v53, %v838_v56  ;;  %v282_v47 = vmax.f32 %v250_v39, 0.0  ;;  %v3355_v53 = vld [vmem:[#allocation7_spill] sm:$0xff]  ;;  %v3359_v39 = vld [vmem:[#allocation10_spill] sm:$0xff]  ;;  %v1918_v38 = vld [vmem:[#allocation2 + $0xe0] sm:$0xff] }
  0xcd   : > { %v1027_v18 = vadd.f32 %v2980_v11, %v958_v22  ;;  %v944_v6 = vadd.f32 %v912_v57, %v839_v62  ;;  %v441_v51 = vmul.f32 %v2904_v49, %v2813_v58  ;;  %v442_v48 = vmul.f32 %v2904_v49, %v2815_v21 }
  0xce   : > { %370 = vst.msk [vmem:[#allocation2 + $0x181] sm:$0xff] %vm283_vm0, %v281_v23  ;;  %v510_v37 = vmul.f32 %v2913_v43, %v2991_v40  ;;  %v1095_v31 = vadd.f32 %v1063_v29, %v1026_v55  ;;  %v1012_v33 = vadd.f32 %v980_v20, %v943_v26  ;;  %371 = vst.msk [vmem:[#allocation2 + $0x189] sm:$0xff] %vm283_vm0, %v282_v47  ;;  %v3361_v55 = vld [vmem:[#allocation14_spill] sm:$0xff] }
  0xcf   : > { %v1096_v28 = vadd.f32 %v1064_v25, %v1027_v18  ;;  %v511_v42 = vmul.f32 %v2913_v43, %v2993_v16  ;;  %v1013_v11 = vadd.f32 %v981_v2, %v944_v6  ;;  %v684_v35 = vmul.f32 %v2928_v52, %v2817_v60  ;;  %v1917_v2 = vld [vmem:[#allocation2 + $0xd8] sm:$0xff] }
  0xd0   : > { %v542_v17 = vadd.f32 %v510_v37, %v441_v51  ;;  %v685_v58 = vmul.f32 %v2928_v52, %v2826_v10  ;;  %v1081_v27 = vadd.f32 %v1049_v46, %v1012_v33  ;;  %v753_v29 = vmul.f32 %v3028_v12, %v3353_v8  ;;  %v3096_v10 = vld [vmem:[%s3267_s1 + $0x5] ss:$0 sm:$0xff] }
  0xd1   : > { %v1114_v21 = vpack.c.bf16 %v1096_v28, %v1095_v31  ;;  %v543_v15 = vadd.f32 %v511_v42, %v442_v48  ;;  %v1082_v25 = vadd.f32 %v1050_v19, %v1013_v11  ;;  %v754_v36 = vmul.f32 %v3028_v12, %v3008_v54  ;;  %v3360_v19 = vld [vmem:[#allocation13_spill] sm:$0xff] }
  0xd2   : > { %v3086_v41 = vmul.f32 %v2882_v30, %v3354_v63  ;;  %v3090_v60 = vmul.f32 %v2882_v30, %v3355_v53  ;;  %v3100_v59 = vmul.f32 %v3096_v10, %v3012_v13  ;;  %v3104_v7 = vmul.f32 %v3096_v10, %v3356_v3  ;;  %v3362_v28 = vld [vmem:[#allocation17_spill] sm:$0xff]  ;;  %v3363_v53 = vld [vmem:[#allocation18_spill] sm:$0xff] }
  0xd3   : > { %1848 = vmatmul.mubr.msk.bf16.gmra.mrb[8].mxu1 %vm283_vm0, %v1114_v21  ;;  %v427_v24 = vmul.f32 %v2904_v49, %v3357_v34  ;;  %v428_v57 = vmul.f32 %v2904_v49, %v3358_v50  ;;  %v1107_v20 = vpack.c.bf16 %v1082_v25, %v1081_v27  ;;  %v565_v32 = vmul.f32 %v1917_v2, %v3359_v39  ;;  %v3139_v11 = vld [vmem:[%s3267_s1 + $0x8] ss:$0 sm:$0xff] }
  0xd4   : > { %v566_v22 = vmul.f32 %v1918_v38, %v3359_v39  ;;  %v670_v56 = vmul.f32 %v2928_v52, %v2921_v1  ;;  %v671_v26 = vmul.f32 %v2928_v52, %v2947_v9  ;;  %v739_v47 = vmul.f32 %v3028_v12, %v3349_v61 }
  0xd5   : > { %v404_v62 = vld [vmem:[#allocation2 + $0x180] sm:$0xff]  ;;  %v528_v23 = vadd.f32 %v3360_v19, %v427_v24  ;;  %v529_v18 = vadd.f32 %v3361_v55, %v428_v57  ;;  %1835 = vmatprep.mubr.msk.bf16.mxu0 %vm283_vm0, %v1107_v20  ;;  %v405_v6 = vld [vmem:[#allocation2 + $0x188] sm:$0xff]  ;;  %v740_v31 = vmul.f32 %v3028_v12, %v3350_v0  ;;  %v808_v9 = vmul.f32 %v3043_v14, %v3362_v28 }
  0xd6   : > { %v3114_v46 = vld [vmem:[#allocation2 + $0x181] sm:$0xff]  ;;  %v579_v51 = vmul.f32 %v3359_v39, %v404_v62  ;;  %v648_v48 = vld [vmem:[#allocation2 + $0x189] sm:$0xff]  ;;  %v580_v33 = vmul.f32 %v3359_v39, %v405_v6  ;;  %v809_v34 = vmul.f32 %v3043_v14, %v3363_v53  ;;  %v913_v57 = vmul.f32 %v2882_v30, %v2951_v4  ;;  %v406_v4 = vld [vmem:[#allocation2 + $0x198] sm:$0xff] }
  0xd7   : > { %v822_v1 = vmul.f32 %v3043_v14, %v3114_v46  ;;  %v3126_v37 = vld [vmem:[#allocation2 + $0x182] sm:$0xff]  ;;  %v823_v61 = vmul.f32 %v3043_v14, %v648_v48  ;;  %v3134_v42 = vld [vmem:[#allocation2 + $0x18a] sm:$0xff]  ;;  %v597_v27 = vadd.f32 %v565_v32, %v528_v23  ;;  %v598_v63 = vadd.f32 %v566_v22, %v529_v18 }
  0xd8   : > { %v1065_v21 = vmul.f32 %v3139_v11, %v3126_v37  ;;  %v611_v25 = vadd.f32 %v579_v51, %v542_v17  ;;  %v1066_v0 = vmul.f32 %v3139_v11, %v3134_v42  ;;  %v612_v24 = vadd.f32 %v580_v33, %v543_v15  ;;  %v3364_v23 = vld [vmem:[#allocation25_spill] sm:$0xff]  ;;  %v407_v18 = vld [vmem:[#allocation2 + $0x1a0] sm:$0xff] }
  0xd9   : > { %v702_v50 = vadd.f32 %v670_v56, %v597_v27  ;;  %v914_v20 = vmul.f32 %v2882_v30, %v2958_v5  ;;  %v703_v38 = vadd.f32 %v671_v26, %v598_v63  ;;  %v982_v17 = vmul.f32 %v3096_v10, %v3351_v44  ;;  %v3365_v56 = vld [vmem:[#allocation26_spill] sm:$0xff] }
  0xda   : > { %v716_v2 = vadd.f32 %v684_v35, %v611_v25  ;;  %v983_v32 = vmul.f32 %v3096_v10, %v3352_v45  ;;  %v717_v22 = vadd.f32 %v685_v58, %v612_v24  ;;  %v1051_v15 = vmul.f32 %v3139_v11, %v3364_v23 }
  0xdb   : > { %v771_v19 = vadd.f32 %v739_v47, %v702_v50  ;;  %v1052_v55 = vmul.f32 %v3139_v11, %v3365_v56  ;;  %v772_v5 = vadd.f32 %v740_v31, %v703_v38  ;;  %v443_v35 = vmul.f32 %v2904_v49, %v2991_v40 }
  0xdc   : > { %v785_v51 = vadd.f32 %v753_v29, %v716_v2  ;;  %v444_v44 = vmul.f32 %v2904_v49, %v2993_v16  ;;  %v786_v26 = vadd.f32 %v754_v36, %v717_v22  ;;  %v512_v58 = vmul.f32 %v2913_v43, %v404_v62  ;;  %v892_v22 = vld [vmem:[#allocation2 + $0x19a] sm:$0xff] }
  0xdd   : > { %v840_v45 = vadd.f32 %v808_v9, %v771_v19  ;;  %v513_v47 = vmul.f32 %v2913_v43, %v405_v6  ;;  %v841_v33 = vadd.f32 %v809_v34, %v772_v5  ;;  %v581_v27 = vmul.f32 %v3359_v39, %v406_v4 }
  0xde   : > { %v854_v28 = vadd.f32 %v822_v1, %v785_v51  ;;  %v582_v25 = vmul.f32 %v3359_v39, %v407_v18  ;;  %v855_v29 = vadd.f32 %v823_v61, %v786_v26  ;;  %v544_v63 = vadd.f32 %v512_v58, %v443_v35  ;;  %v649_v1 = vld [vmem:[#allocation2 + $0x199] sm:$0xff]  ;;  %v650_v39 = vld [vmem:[#allocation2 + $0x1a1] sm:$0xff] }
  0xdf   : > { %v945_v31 = vadd.f32 %v913_v57, %v840_v45  ;;  %v545_v53 = vadd.f32 %v513_v47, %v444_v44  ;;  %v946_v24 = vadd.f32 %v914_v20, %v841_v33  ;;  %v686_v49 = vmul.f32 %v2928_v52, %v3353_v8 }
  0xe0   : > { %v959_v40 = vadd.f32 %v3086_v41, %v854_v28  ;;  %v687_v16 = vmul.f32 %v2928_v52, %v3008_v54  ;;  %v960_v43 = vadd.f32 %v3090_v60, %v855_v29  ;;  %v613_v62 = vadd.f32 %v581_v27, %v544_v63 }
  0xe1   : > { %v1014_v36 = vadd.f32 %v982_v17, %v945_v31  ;;  %v614_v6 = vadd.f32 %v582_v25, %v545_v53  ;;  %v1015_v61 = vadd.f32 %v983_v32, %v946_v24  ;;  %v755_v41 = vmul.f32 %v3028_v12, %v3114_v46 }
  0xe2   : > { %v1028_v9 = vadd.f32 %v3100_v59, %v959_v40  ;;  %v756_v34 = vmul.f32 %v3028_v12, %v648_v48  ;;  %v1029_v8 = vadd.f32 %v3104_v7, %v960_v43  ;;  %v718_v57 = vadd.f32 %v686_v49, %v613_v62  ;;  %v893_v12 = vld [vmem:[#allocation2 + $0x1a2] sm:$0xff] }
  0xe3   : > { %v1083_v50 = vadd.f32 %v1051_v15, %v1014_v36  ;;  %v719_v52 = vadd.f32 %v687_v16, %v614_v6  ;;  %v1084_v60 = vadd.f32 %v1052_v55, %v1015_v61  ;;  %v824_v20 = vmul.f32 %v3043_v14, %v649_v1 }
  0xe4   : > { %v1097_v54 = vadd.f32 %v1065_v21, %v1028_v9  ;;  %v825_v2 = vmul.f32 %v3043_v14, %v650_v39  ;;  %v1098_v38 = vadd.f32 %v1066_v0, %v1029_v8  ;;  %v787_v17 = vadd.f32 %v755_v41, %v718_v57 }
  0xe5   : > { %v788_v59 = vadd.f32 %v756_v34, %v719_v52  ;;  %v929_v32 = vmul.f32 %v2882_v30, %v3012_v13  ;;  %v1108_v46 = vpack.c.bf16 %v1084_v60, %v1083_v50  ;;  %v930_v7 = vmul.f32 %v2882_v30, %v3356_v3 }
  0xe6   : > { %v998_v48 = vmul.f32 %v3096_v10, %v3126_v37  ;;  %v1115_v21 = vpack.c.bf16 %v1098_v38, %v1097_v54  ;;  %v856_v19 = vadd.f32 %v824_v20, %v787_v17  ;;  %v999_v0 = vmul.f32 %v3096_v10, %v3134_v42  ;;  %v3198_v42 = vld [vmem:[%s3269_s3] ss:$0 sm:$0xff] }
  0xe7   : > { %v857_v14 = vadd.f32 %v825_v2, %v788_v59  ;;  %1836 = vmatmul.mubr.msk.bf16.gmra.mrb[12].mxu0 %vm283_vm0, %v1108_v46  ;;  %v1067_v15 = vmul.f32 %v3139_v11, %v892_v22  ;;  %v1068_v30 = vmul.f32 %v3139_v11, %v893_v12 }
  0xe8   : > { %1851 = vmatprep.mubr.msk.bf16.mxu1 %vm283_vm0, %v1115_v21  ;;  %v961_v13 = vadd.f32 %v929_v32, %v856_v19 }
  0xe9   : > { %v962_v23 = vadd.f32 %v930_v7, %v857_v14 }
  0xea   : > { %v1030_v3 = vadd.f32 %v998_v48, %v961_v13 }
  0xeb   : > { %v1031_v37 = vadd.f32 %v999_v0, %v962_v23 }
  0xec   : > { %v1099_v56 = vadd.f32 %v1067_v15, %v1030_v3 }
  0xed   : > { %v1100_v55 = vadd.f32 %v1068_v30, %v1031_v37 }
  0xef   : > { %v1116_v4 = vpack.c.bf16 %v1100_v55, %v1099_v56 }
  0xf1   : > { %1852 = vmatmul.mubr.msk.bf16.gmra.mrb[12].mxu1 %vm283_vm0, %v1116_v4 }
 0x15c   : > { %v1825_v10 = vpop.f32.mrb[0].mxu0 }
 0x15d   : > { %v1238_v18 = vpop.f32.mrb[1].mxu0  ;;  %v1247_v11 = vadd.f32 %v1825_v10, %v3198_v42 }
 0x15e   : > { %v1826_v51 = vpop.f32.mrb[2].mxu0  ;;  %v1239_v44 = vadd.f32 %v3198_v42, %v1238_v18 }
 0x15f   : > { %v1250_v5 = vadd.f32 %v1826_v51, %v3198_v42  ;;  %v1241_v35 = vpop.f32.mrb[3].mxu0 }
 0x160   : > { %v1242_v26 = vadd.f32 %v3198_v42, %v1241_v35 }
 0x161   : > { %v1708_v45 = vpack.c.bf16 %v1250_v5, %v1247_v11 }
 0x162   : > { %v1703_v58 = vpack.c.bf16 %v1242_v26, %v1239_v44 }
 0x163   : > { %1780 = vst [vmem:[%s3206_s12 + $0x8] sm:$0xff] %v1708_v45  }
 0x164   : > { %1704 = vst [vmem:[%s3206_s12] sm:$0xff] %v1703_v58  }
 0x16a   : > { %v1841_v47 = vpop.f32.mrb[0].mxu1 }
 0x16b   : > { %v1302_v28 = vpop.f32.mrb[1].mxu1  ;;  %v1311_v27 = vadd.f32 %v1841_v47, %v3198_v42 }
 0x16c   : > { %v1842_v33 = vpop.f32.mrb[2].mxu1  ;;  %v1303_v31 = vadd.f32 %v3198_v42, %v1302_v28 }
 0x16d   : > { %v1314_v25 = vadd.f32 %v1842_v33, %v3198_v42  ;;  %v1305_v29 = vpop.f32.mrb[3].mxu1 }
 0x16e   : > { %v1306_v63 = vadd.f32 %v3198_v42, %v1305_v29 }
 0x16f   : > { %v1748_v53 = vpack.c.bf16 %v1314_v25, %v1311_v27 }
 0x170   : > { %v1743_v40 = vpack.c.bf16 %v1306_v63, %v1303_v31 }
 0x171   : > { %1788 = vst [vmem:[%s3206_s12 + $0x48] sm:$0xff] %v1748_v53  }
 0x172   : > { %1787 = vst [vmem:[%s3206_s12 + $0x40] sm:$0xff] %v1743_v40  }
 0x17c   : > { %v1829_v24 = vpop.f32.mrb[4].mxu0 }
 0x17d   : > { %v1254_v49 = vpop.f32.mrb[5].mxu0  ;;  %v1263_v43 = vadd.f32 %v1829_v24, %v3198_v42 }
 0x17e   : > { %v1830_v16 = vpop.f32.mrb[6].mxu0  ;;  %v1255_v6 = vadd.f32 %v3198_v42, %v1254_v49 }
 0x17f   : > { %v1266_v36 = vadd.f32 %v1830_v16, %v3198_v42  ;;  %v1257_v62 = vpop.f32.mrb[7].mxu0 }
 0x180   : > { %v1258_v1 = vadd.f32 %v3198_v42, %v1257_v62 }
 0x181   : > { %v1718_v39 = vpack.c.bf16 %v1266_v36, %v1263_v43 }
 0x182   : > { %v1845_v9 = vpop.f32.mrb[4].mxu1  ;;  %v1713_v61 = vpack.c.bf16 %v1258_v1, %v1255_v6 }
 0x183   : > { %v1318_v41 = vpop.f32.mrb[5].mxu1  ;;  %1782 = vst [vmem:[%s3206_s12 + $0x18] sm:$0xff] %v1718_v39   ;;  %v1327_v8 = vadd.f32 %v1845_v9, %v3198_v42 }
 0x184   : > { %v1846_v34 = vpop.f32.mrb[6].mxu1  ;;  %1781 = vst [vmem:[%s3206_s12 + $0x10] sm:$0xff] %v1713_v61   ;;  %v1319_v52 = vadd.f32 %v3198_v42, %v1318_v41 }
 0x185   : > { %v1330_v50 = vadd.f32 %v1846_v34, %v3198_v42  ;;  %v1321_v57 = vpop.f32.mrb[7].mxu1 }
 0x186   : > { %v1322_v54 = vadd.f32 %v3198_v42, %v1321_v57 }
 0x187   : > { %v1758_v60 = vpack.c.bf16 %v1330_v50, %v1327_v8 }
 0x188   : > { %v1753_v20 = vpack.c.bf16 %v1322_v54, %v1319_v52 }
 0x189   : > { %1790 = vst [vmem:[%s3206_s12 + $0x58] sm:$0xff] %v1758_v60  }
 0x18a   : > { %1789 = vst [vmem:[%s3206_s12 + $0x50] sm:$0xff] %v1753_v20  }
 0x19f   : > { %v1833_v2 = vpop.f32.mrb[8].mxu0 }
 0x1a0   : > { %v1270_v38 = vpop.f32.mrb[9].mxu0  ;;  %v1279_v59 = vadd.f32 %v1833_v2, %v3198_v42 }
 0x1a1   : > { %v1834_v17 = vpop.f32.mrb[10].mxu0  ;;  %v1271_v22 = vadd.f32 %v3198_v42, %v1270_v38 }
 0x1a2   : > { %v1282_v32 = vadd.f32 %v1834_v17, %v3198_v42  ;;  %v1273_v46 = vpop.f32.mrb[11].mxu0 }
 0x1a3   : > { %v1274_v12 = vadd.f32 %v3198_v42, %v1273_v46 }
 0x1a4   : > { %v1728_v7 = vpack.c.bf16 %v1282_v32, %v1279_v59 }
 0x1a5   : > { %v1723_v21 = vpack.c.bf16 %v1274_v12, %v1271_v22 }
 0x1a6   : > { %v1849_v48 = vpop.f32.mrb[8].mxu1  ;;  %1784 = vst [vmem:[%s3206_s12 + $0x28] sm:$0xff] %v1728_v7  }
 0x1a7   : > { %v1334_v19 = vpop.f32.mrb[9].mxu1  ;;  %1783 = vst [vmem:[%s3206_s12 + $0x20] sm:$0xff] %v1723_v21   ;;  %v1343_v0 = vadd.f32 %v1849_v48, %v3198_v42 }
 0x1a8   : > { %v1850_v14 = vpop.f32.mrb[10].mxu1  ;;  %v1335_v15 = vadd.f32 %v3198_v42, %v1334_v19 }
 0x1a9   : > { %v1346_v13 = vadd.f32 %v1850_v14, %v3198_v42  ;;  %v1337_v23 = vpop.f32.mrb[11].mxu1 }
 0x1aa   : > { %v1338_v30 = vadd.f32 %v3198_v42, %v1337_v23 }
 0x1ab   : > { %v1768_v3 = vpack.c.bf16 %v1346_v13, %v1343_v0 }
 0x1ac   : > { %v1763_v37 = vpack.c.bf16 %v1338_v30, %v1335_v15 }
 0x1ad   : > { %1792 = vst [vmem:[%s3206_s12 + $0x68] sm:$0xff] %v1768_v3  }
 0x1ae   : > { %1791 = vst [vmem:[%s3206_s12 + $0x60] sm:$0xff] %v1763_v37  }
 0x1ba   : > { %v1837_v56 = vpop.f32.mrb[12].mxu0 }
 0x1bb   : > { %v1286_v55 = vpop.f32.mrb[13].mxu0  ;;  %v1295_v10 = vadd.f32 %v1837_v56, %v3198_v42 }
 0x1bc   : > { %v1838_v4 = vpop.f32.mrb[14].mxu0  ;;  %v1287_v11 = vadd.f32 %v3198_v42, %v1286_v55 }
 0x1bd   : > { %v1298_v18 = vadd.f32 %v1838_v4, %v3198_v42  ;;  %v1289_v51 = vpop.f32.mrb[15].mxu0 }
 0x1be   : > { %v1290_v5 = vadd.f32 %v3198_v42, %v1289_v51 }
 0x1bf   : > { %v1738_v35 = vpack.c.bf16 %v1298_v18, %v1295_v10 }
 0x1c0   : > { %v1733_v44 = vpack.c.bf16 %v1290_v5, %v1287_v11 }
 0x1c1   : > { %1786 = vst [vmem:[%s3206_s12 + $0x38] sm:$0xff] %v1738_v35  }
 0x1c2   : > { %1785 = vst [vmem:[%s3206_s12 + $0x30] sm:$0xff] %v1733_v44  }
 0x1c4   : > { %v1853_v26 = vpop.f32.mrb[12].mxu1 }
 0x1c5   : > { %v1350_v45 = vpop.f32.mrb[13].mxu1  ;;  %v1359_v47 = vadd.f32 %v1853_v26, %v3198_v42 }
 0x1c6   : > { %v1854_v58 = vpop.f32.mrb[14].mxu1  ;;  %v1351_v27 = vadd.f32 %v3198_v42, %v1350_v45 }
 0x1c7   : > { %v1362_v28 = vadd.f32 %v1854_v58, %v3198_v42  ;;  %v1353_v33 = vpop.f32.mrb[15].mxu1 }
 0x1c8   : > { %v1354_v25 = vadd.f32 %v3198_v42, %v1353_v33 }
 0x1c9   : > { %v1778_v29 = vpack.c.bf16 %v1362_v28, %v1359_v47 }
 0x1ca   : > { %v1773_v31 = vpack.c.bf16 %v1354_v25, %v1351_v27 }
 0x1cb   : > { %1794 = vst [vmem:[%s3206_s12 + $0x78] sm:$0xff] %v1778_v29  }
 0x1cc   : > { %1793 = vst [vmem:[%s3206_s12 + $0x70] sm:$0xff] %v1773_v31  }
 0x1cd PF: > { %p14_p8 = scmp.ge.s32.totalorder %s2037_s20, 4   ;;  %s3366_s15 = smov %s1976_s16 }
 0x1ce   : > { %s3367_s16 = smov %s1980_s17  ;;  %s3368_s17 = smov %s2047_s23 }
 0x1cf   : > { %s3369_s18 = smov %s2037_s20  ;;  %16 = sbr.rel (!%p14_p8) target bundleno = 3 (0x3), region = 77 }
 0x1d6   :  { %1546 = vsyncpa [#allocation4], 1 }
 0x1d7   :  { %1548 = vsyncpa [#allocation4 + $0x1], 1 }

</bundles_post_ra>
